<compile_context>
chip_gen: v5e
topology: v5e:2x2
jax: 0.10.0
libtpu: 0.0.40
codegen_flags: <defaults>
</compile_context>

<pallas_src>
import math
from functools import partial

import jax
import jax.numpy as jnp
from jax.experimental import pallas as pl
from jax.experimental.pallas import tpu as pltpu


# ----------------------------- config helpers ------------------------------
def _make_divisible(v, divisor=8, min_value=None):
    if min_value is None:
        min_value = divisor
    new_v = max(min_value, int(v + divisor / 2) // divisor * divisor)
    if new_v < 0.9 * v:
        new_v += divisor
    return new_v


def adjust_channels(channels, width_multiplier, min_value=None):
    return _make_divisible(channels * width_multiplier, 8, min_value)


# ------------------------------ activations ---------------------------------
def _silu_fast(x):
    # x * sigmoid(x); divide runs on the EUP via the approximate reciprocal.
    return x * pl.reciprocal(1.0 + jnp.exp(-x), approx=True)


def _silu_exact(x):
    return x / (1.0 + jnp.exp(-x))


def _sigmoid_exact(x):
    return 1.0 / (1.0 + jnp.exp(-x))


# ------------------------------ Pallas kernel -------------------------------
def mbconv_kernel(x_ref, w_exp_ref, exp_scale_ref, exp_shift_ref,
                  w_dw_ref, dw_scale_ref, dw_shift_ref,
                  w_se1_ref, b_se1_ref, w_se2_ref, b_se2_ref,
                  w_proj_ref, proj_scale_ref, proj_shift_ref,
                  o_ref, epad_ref, *, H, W, Wp, use_res):
    Bt, _, _, Cin = x_ref.shape
    Cexp = w_exp_ref.shape[1]
    Cout = w_proj_ref.shape[1]
    Hp = H + 2
    HW = H * W
    M = Bt * HW

    # ---- 1x1 expand conv + folded BN + SiLU on REAL pixels only (MXU) --------
    x_bf = x_ref[...]                                        # (Bt, H, W, Cin) bf16
    e = jnp.dot(x_bf.reshape(M, Cin), w_exp_ref[...],
                preferred_element_type=jnp.float32)          # (M, Cexp) f32
    e = _silu_fast(e * exp_scale_ref[...] + exp_shift_ref[...])

    # ---- stage into the zero-bordered padded VMEM scratch ---------------------
    # Real pixel (i, j) lives at padded (i + 1, j); rows 0 / H+1 and columns
    # W..Wp-1 are zero, so every depthwise tap is a pure flattened roll/slice.
    # Border is re-zeroed every step: the scratch persists across grid steps and
    # the grid axis is "parallel", so a one-shot pid==0 init would be unsafe.
    epad_ref[:, 0:1, :, :] = jnp.zeros((Bt, 1, Wp, Cexp), jnp.float32)
    epad_ref[:, H + 1:H + 2, :, :] = jnp.zeros((Bt, 1, Wp, Cexp), jnp.float32)
    epad_ref[:, 1:H + 1, W:Wp, :] = jnp.zeros((Bt, H, Wp - W, Cexp), jnp.float32)
    epad_ref[:, 1:H + 1, 0:W, :] = e.reshape(Bt, H, W, Cexp)

    # ---- 3x3 depthwise conv (stride 1): VPU MAC, width shifts via XLU rolls ---
    n_rows = Bt * Hp * Wp
    e_flat = epad_ref[...].reshape(n_rows, Cexp)
    shifted = []
    for dj in range(3):
        s = (1 - dj) % n_rows                  # dj=0 -> +1, dj=1 -> 0, dj=2 -> -1
        ej = e_flat if s == 0 else pltpu.roll(e_flat, shift=s, axis=0)
        shifted.append(ej.reshape(Bt, Hp, Wp, Cexp))
    dw = jnp.zeros((Bt, H, Wp, Cexp), jnp.float32)
    for di in range(3):
        for dj in range(3):
            k = di * 3 + dj
            tap = w_dw_ref[k:k + 1, :]                       # (1, Cexp), lane bcast
            dw = dw + shifted[dj][:, di:di + H, :, :] * tap
    # drop padded columns BEFORE BN/SiLU so the EUP only sees the real pixels
    a = dw[:, :, 0:W, :].reshape(M, Cexp)
    a = _silu_fast(a * dw_scale_ref[...] + dw_shift_ref[...])

    # ---- squeeze & excitation (tiny: exact sigmoid/SiLU, batched over Bt) -----
    a3 = a.reshape(Bt, HW, Cexp)
    pooled = jnp.sum(a3, axis=1) * (1.0 / HW)                # (Bt, Cexp)
    s1 = jnp.dot(pooled, w_se1_ref[...], preferred_element_type=jnp.float32)
    s1 = _silu_exact(s1 + b_se1_ref[...])                    # (Bt, Csq)
    g = jnp.dot(s1, w_se2_ref[...], preferred_element_type=jnp.float32)
    gate = _sigmoid_exact(g + b_se2_ref[...])                # (Bt, Cexp)
    ag = (a3 * gate[:, None, :]).reshape(M, Cexp)

    # ---- 1x1 project conv + folded BN + SiLU (MXU) ----------------------------
    # (spec passes act_layer=SiLU to the project ConvNormActivation)
    y = jnp.dot(ag.astype(jnp.bfloat16), w_proj_ref[...],
                preferred_element_type=jnp.float32)          # (M, Cout)
    y = _silu_fast(y * proj_scale_ref[...] + proj_shift_ref[...])

    # ---- residual (StochasticDepth is identity in eval mode) ------------------
    if use_res:
        y = y + x_ref[...].astype(jnp.float32).reshape(M, Cin)

    # TODO(synk): a (Bt, H, W*Cout) lane-dense out layout would avoid masked vst
    # on v5e, but the in-kernel (HW,Cout)->(H,W*Cout) relayout is not obviously
    # free; keeping the natural NHWC block here.
    o_ref[...] = y.reshape(Bt, H, W, Cout)


# ------------------------------- wrapper -------------------------------------
def mbconv_forward(params, x_nchw, *, kernel_size=3, stride=1, use_res=True,
                   images_per_step=None):
    if kernel_size != 3 or stride != 1:
        # TODO(synk): stride-2 / non-3x3 depthwise variants are not fused here.
        raise NotImplementedError("fused kernel covers the 3x3 / stride-1 MBConv")

    # NCHW -> NHWC, cast to bf16 ONCE (halves the input DMA; matmul operand dtype)
    x = jnp.transpose(x_nchw, (0, 2, 3, 1)).astype(jnp.bfloat16)
    B, H, W, Cin = x.shape
    Cexp = params["w_exp"].shape[1]
    Csq = params["w_se1"].shape[1]
    Cout = params["w_proj"].shape[1]

    Hp = H + 2                                   # one zero row above / below
    Wp = ((W + 1) + 7) // 8 * 8                  # >=1 zero col right, sublane aligned

    if images_per_step is None:
        images_per_step = 1
        for bt in (8, 4, 2):
            if B % bt == 0 and B // bt >= 2:     # keep >=2 grid steps so both
                images_per_step = bt             # v7x TensorCores get work
                break
    Bt = images_per_step
    assert B % Bt == 0, (B, Bt)

    kernel = partial(mbconv_kernel, H=H, W=W, Wp=Wp, use_res=use_res)

    def _full(shape):
        n = len(shape)
        return pl.BlockSpec(shape, lambda b, n=n: (0,) * n)

    out_nhwc = pl.pallas_call(
        kernel,
        out_shape=jax.ShapeDtypeStruct((B, H, W, Cout), jnp.float32),
        grid=(B // Bt,),                         # Bt images per grid step
        in_specs=[
            pl.BlockSpec((Bt, H, W, Cin), lambda b: (b, 0, 0, 0)),   # x (bf16)
            _full((Cin, Cexp)),                                      # w_exp (bf16)
            _full((1, Cexp)), _full((1, Cexp)),                      # expand BN
            _full((9, Cexp)),                                        # depthwise taps
            _full((1, Cexp)), _full((1, Cexp)),                      # depthwise BN
            _full((Cexp, Csq)), _full((1, Csq)),                     # SE fc1
            _full((Csq, Cexp)), _full((1, Cexp)),                    # SE fc2
            _full((Cexp, Cout)),                                     # w_proj (bf16)
            _full((1, Cout)), _full((1, Cout)),                      # project BN
        ],
        out_specs=pl.BlockSpec((Bt, H, W, Cout), lambda b: (b, 0, 0, 0)),
        scratch_shapes=[pltpu.VMEM((Bt, Hp, Wp, Cexp), jnp.float32)],
        compiler_params=pltpu.CompilerParams(
            dimension_semantics=("parallel",),
            vmem_limit_bytes=32 * 1024 * 1024),
    )(
        x,
        params["w_exp"],
        params["exp_scale"].reshape(1, Cexp), params["exp_shift"].reshape(1, Cexp),
        params["w_dw"],
        params["dw_scale"].reshape(1, Cexp), params["dw_shift"].reshape(1, Cexp),
        params["w_se1"], params["b_se1"].reshape(1, Csq),
        params["w_se2"], params["b_se2"].reshape(1, Cexp),
        params["w_proj"],
        params["proj_scale"].reshape(1, Cout), params["proj_shift"].reshape(1, Cout),
    )
    return jnp.transpose(out_nhwc, (0, 3, 1, 2))             # back to NCHW


# --------------------------- pure-JAX reference ------------------------------
def mbconv_ref(params, x_nchw, *, use_res=True):
    """XLA reference with the same bf16 input / matmul-operand casts as the kernel."""
    cexp = params["w_exp"].shape[1]
    x_bf = jnp.transpose(x_nchw, (0, 2, 3, 1)).astype(jnp.bfloat16)
    x32 = x_bf.astype(jnp.float32)

    e = jnp.einsum("bhwc,cd->bhwd", x_bf, params["w_exp"],
                   preferred_element_type=jnp.float32)
    e = jax.nn.silu(e * params["exp_scale"] + params["exp_shift"])

    wdw = params["w_dw"].reshape(3, 3, 1, cexp)
    dw = jax.lax.conv_general_dilated(
        e, wdw, window_strides=(1, 1), padding="SAME",
        dimension_numbers=("NHWC", "HWIO", "NHWC"),
        feature_group_count=cexp)
    a = jax.nn.silu(dw * params["dw_scale"] + params["dw_shift"])

    pooled = jnp.mean(a, axis=(1, 2))                                 # (B, Cexp)
    s = jax.nn.silu(pooled @ params["w_se1"] + params["b_se1"])
    gate = jax.nn.sigmoid(s @ params["w_se2"] + params["b_se2"])
    a = a * gate[:, None, None, :]

    y = jnp.einsum("bhwc,cd->bhwd", a.astype(jnp.bfloat16), params["w_proj"],
                   preferred_element_type=jnp.float32)
    y = jax.nn.silu(y * params["proj_scale"] + params["proj_shift"])
    if use_res:
        y = y + x32
    return jnp.transpose(y, (0, 3, 1, 2))


# ------------------------------- param init ----------------------------------
def _rand_bn(key, c, eps=1e-5):
    k1, k2, k3, k4 = jax.random.split(key, 4)
    gamma = jax.random.uniform(k1, (c,), jnp.float32, 0.5, 1.5)
    beta = 0.1 * jax.random.normal(k2, (c,), jnp.float32)
    mean = 0.1 * jax.random.normal(k3, (c,), jnp.float32)
    var = jax.random.uniform(k4, (c,), jnp.float32, 0.5, 1.5)
    scale = gamma / jnp.sqrt(var + eps)                  # eval-mode BN folded
    shift = beta - mean * scale
    return scale, shift


def init_params(key, cin, cexp, csq, cout):
    k = jax.random.split(key, 10)
    p = {}
    p["w_exp"] = (jax.random.normal(k[0], (cin, cexp), jnp.float32)
                  * math.sqrt(2.0 / cexp)).astype(jnp.bfloat16)       # MXU operand
    p["exp_scale"], p["exp_shift"] = _rand_bn(k[1], cexp)
    p["w_dw"] = jax.random.normal(k[2], (9, cexp), jnp.float32) * math.sqrt(2.0 / 9.0)
    p["dw_scale"], p["dw_shift"] = _rand_bn(k[3], cexp)
    p["w_se1"] = jax.random.normal(k[4], (cexp, csq), jnp.float32) * math.sqrt(1.0 / cexp)
    p["b_se1"] = 0.1 * jax.random.normal(k[5], (csq,), jnp.float32)
    p["w_se2"] = jax.random.normal(k[6], (csq, cexp), jnp.float32) * math.sqrt(1.0 / csq)
    p["b_se2"] = 0.1 * jax.random.normal(k[7], (cexp,), jnp.float32)
    p["w_proj"] = (jax.random.normal(k[8], (cexp, cout), jnp.float32)
                   * math.sqrt(2.0 / cout)).astype(jnp.bfloat16)      # MXU operand
    p["proj_scale"], p["proj_shift"] = _rand_bn(k[9], cout)
    return p


# ---------------------------------- main --------------------------------------
if __name__ == "__main__":
    # MBConvConfig(expand_ratio=4, kernel_size=3, stride=1, in=32, out=32,
    #              num_layers=1, width_multiplier=1.0, depth_multiplier=1.0)
    width_mult = 1.0
    cin = adjust_channels(32, width_mult)           # 32
    cout = adjust_channels(32, width_mult)          # 32
    cexp = adjust_channels(cin, 4.0)                # 128 (expand_ratio = 4)
    csq = max(1, cin // 4)                          # 8
    kernel_size, stride = 3, 1
    use_res = (stride == 1 and cin == cout)         # True -> residual path exercised

    key = jax.random.PRNGKey(0)
    pkey, xkey, xkey2 = jax.random.split(key, 3)
    params = init_params(pkey, cin, cexp, csq, cout)

    # TODO(synk): StochasticDepth / training-mode BatchNorm are eval-mode
    # identities here; their training-time randomness is not reproduced.

    # --- run 1: B=2 -> one image per grid step (both v7x TCs get one step) ---
    x = jax.random.normal(xkey, (2, cin, 16, 16), jnp.float32)        # NCHW
    out = mbconv_forward(params, x, kernel_size=kernel_size, stride=stride,
                         use_res=use_res)
    out = jax.block_until_ready(out)
    assert out.shape == (2, cout, 16, 16), out.shape
    assert bool(jnp.all(jnp.isfinite(out)))
    ref = mbconv_ref(params, x, use_res=use_res)
    err = float(jnp.max(jnp.abs(out - ref)))
    assert err < 0.15, f"kernel vs reference max abs err = {err}"

    # --- run 2: B=4 -> two images folded per grid step (batched M / SE path) ---
    x2 = jax.random.normal(xkey2, (4, cin, 16, 16), jnp.float32)
    out2 = mbconv_forward(params, x2, kernel_size=kernel_size, stride=stride,
                          use_res=use_res)
    out2 = jax.block_until_ready(out2)
    assert out2.shape == (4, cout, 16, 16), out2.shape
    ref2 = mbconv_ref(params, x2, use_res=use_res)
    err2 = float(jnp.max(jnp.abs(out2 - ref2)))
    assert err2 < 0.15, f"batched kernel vs reference max abs err = {err2}"

    print("KERNEL_OK")
</pallas_src>

<mosaic_0001>
module attributes {stable_mosaic.version = 11 : i64} {
  func.func @mbconv_kernel(%arg0: i32, %arg1: memref<1x16x16x32xbf16, #tpu.memory_space<vmem>>, %arg2: memref<32x128xbf16, #tpu.memory_space<vmem>>, %arg3: memref<1x128xf32, #tpu.memory_space<vmem>>, %arg4: memref<1x128xf32, #tpu.memory_space<vmem>>, %arg5: memref<9x128xf32, #tpu.memory_space<vmem>>, %arg6: memref<1x128xf32, #tpu.memory_space<vmem>>, %arg7: memref<1x128xf32, #tpu.memory_space<vmem>>, %arg8: memref<128x8xf32, #tpu.memory_space<vmem>>, %arg9: memref<1x8xf32, #tpu.memory_space<vmem>>, %arg10: memref<8x128xf32, #tpu.memory_space<vmem>>, %arg11: memref<1x128xf32, #tpu.memory_space<vmem>>, %arg12: memref<128x32xbf16, #tpu.memory_space<vmem>>, %arg13: memref<1x32xf32, #tpu.memory_space<vmem>>, %arg14: memref<1x32xf32, #tpu.memory_space<vmem>>, %arg15: memref<1x16x16x32xf32, #tpu.memory_space<vmem>>, %arg16: memref<1x18x24x128xf32, #tpu.memory_space<vmem>>) attributes {dimension_semantics = [#tpu.dimension_semantics<parallel>], iteration_bounds = array<i64: 2>, scalar_prefetch = 0 : i64, scratch_operands = 1 : i64, tpu.core_type = #tpu.core_type<tc>, window_params = [{transform_indices = @transform_0, window_bounds = array<i64: 1, 16, 16, 32>}, {pipeline_mode = #tpu.pipeline_mode<synchronous>, transform_indices = @transform_1, window_bounds = array<i64: 32, 128>}, {pipeline_mode = #tpu.pipeline_mode<synchronous>, transform_indices = @transform_2, window_bounds = array<i64: 1, 128>}, {pipeline_mode = #tpu.pipeline_mode<synchronous>, transform_indices = @transform_3, window_bounds = array<i64: 1, 128>}, {pipeline_mode = #tpu.pipeline_mode<synchronous>, transform_indices = @transform_4, window_bounds = array<i64: 9, 128>}, {pipeline_mode = #tpu.pipeline_mode<synchronous>, transform_indices = @transform_5, window_bounds = array<i64: 1, 128>}, {pipeline_mode = #tpu.pipeline_mode<synchronous>, transform_indices = @transform_6, window_bounds = array<i64: 1, 128>}, {pipeline_mode = #tpu.pipeline_mode<synchronous>, transform_indices = @transform_7, window_bounds = array<i64: 128, 8>}, {pipeline_mode = #tpu.pipeline_mode<synchronous>, transform_indices = @transform_8, window_bounds = array<i64: 1, 8>}, {pipeline_mode = #tpu.pipeline_mode<synchronous>, transform_indices = @transform_9, window_bounds = array<i64: 8, 128>}, {pipeline_mode = #tpu.pipeline_mode<synchronous>, transform_indices = @transform_10, window_bounds = array<i64: 1, 128>}, {pipeline_mode = #tpu.pipeline_mode<synchronous>, transform_indices = @transform_11, window_bounds = array<i64: 128, 32>}, {pipeline_mode = #tpu.pipeline_mode<synchronous>, transform_indices = @transform_12, window_bounds = array<i64: 1, 32>}, {pipeline_mode = #tpu.pipeline_mode<synchronous>, transform_indices = @transform_13, window_bounds = array<i64: 1, 32>}, {transform_indices = @transform_14, window_bounds = array<i64: 1, 16, 16, 32>}]} {
    %c0 = arith.constant 0 : index
    %c0_0 = arith.constant 0 : index
    %c0_1 = arith.constant 0 : index
    %c0_2 = arith.constant 0 : index
    %0 = vector.load %arg1[%c0, %c0_0, %c0_1, %c0_2] : memref<1x16x16x32xbf16, #tpu.memory_space<vmem>>, vector<1x16x16x32xbf16>
    %1 = vector.shape_cast %0 : vector<1x16x16x32xbf16> to vector<256x32xbf16>
    %c0_3 = arith.constant 0 : index
    %c0_4 = arith.constant 0 : index
    %2 = vector.load %arg2[%c0_3, %c0_4] : memref<32x128xbf16, #tpu.memory_space<vmem>>, vector<32x128xbf16>
    %cst = arith.constant dense<0.000000e+00> : vector<256x128xf32>
    %3 = tpu.matmul %1, %2, %cst {dimension_numbers = #tpu.dot_dimension_numbers<[1], [0], [0], [1], [0, 0, 1, 1], [], []>} : vector<256x32xbf16>, vector<32x128xbf16>, vector<256x128xf32> -> vector<256x128xf32>
    %c0_5 = arith.constant 0 : index
    %c0_6 = arith.constant 0 : index
    %4 = vector.load %arg3[%c0_5, %c0_6] : memref<1x128xf32, #tpu.memory_space<vmem>>, vector<1x128xf32>
    %5 = vector.broadcast %4 : vector<1x128xf32> to vector<256x128xf32>
    %6 = arith.mulf %3, %5 : vector<256x128xf32>
    %c0_7 = arith.constant 0 : index
    %c0_8 = arith.constant 0 : index
    %7 = vector.load %arg4[%c0_7, %c0_8] : memref<1x128xf32, #tpu.memory_space<vmem>>, vector<1x128xf32>
    %8 = vector.broadcast %7 : vector<1x128xf32> to vector<256x128xf32>
    %9 = arith.addf %6, %8 : vector<256x128xf32>
    %cst_9 = arith.constant 0.000000e+00 : f32
    %10 = vector.broadcast %cst_9 : f32 to vector<256x128xf32>
    %11 = arith.subf %10, %9 : vector<256x128xf32>
    %12 = math.exp %11 : vector<256x128xf32>
    %cst_10 = arith.constant 1.000000e+00 : f32
    %13 = vector.broadcast %cst_10 : f32 to vector<256x128xf32>
    %14 = arith.addf %13, %12 : vector<256x128xf32>
    %15 = tpu.reciprocal %14 {approx = true} : vector<256x128xf32> -> vector<256x128xf32>
    %16 = arith.mulf %9, %15 : vector<256x128xf32>
    %cst_11 = arith.constant 0.000000e+00 : f32
    %17 = vector.broadcast %cst_11 : f32 to vector<1x1x24x128xf32>
    %c0_12 = arith.constant 0 : index
    %c0_13 = arith.constant 0 : index
    %c0_14 = arith.constant 0 : index
    %c0_15 = arith.constant 0 : index
    %18 = vector.load %arg16[%c0_12, %c0_13, %c0_14, %c0_15] : memref<1x18x24x128xf32, #tpu.memory_space<vmem>>, vector<1x1x24x128xf32>
    tpu.vector_store %arg16[%c0_12, %c0_13, %c0_14, %c0_15], %17 {strides = array<i32>} : memref<1x18x24x128xf32, #tpu.memory_space<vmem>>, vector<1x1x24x128xf32>,
    %cst_16 = arith.constant 0.000000e+00 : f32
    %19 = vector.broadcast %cst_16 : f32 to vector<1x1x24x128xf32>
    %c0_17 = arith.constant 0 : index
    %c17 = arith.constant 17 : index
    %c0_18 = arith.constant 0 : index
    %c0_19 = arith.constant 0 : index
    %20 = vector.load %arg16[%c0_17, %c17, %c0_18, %c0_19] : memref<1x18x24x128xf32, #tpu.memory_space<vmem>>, vector<1x1x24x128xf32>
    tpu.vector_store %arg16[%c0_17, %c17, %c0_18, %c0_19], %19 {strides = array<i32>} : memref<1x18x24x128xf32, #tpu.memory_space<vmem>>, vector<1x1x24x128xf32>,
    %cst_20 = arith.constant 0.000000e+00 : f32
    %21 = vector.broadcast %cst_20 : f32 to vector<1x16x8x128xf32>
    %c0_21 = arith.constant 0 : index
    %c1 = arith.constant 1 : index
    %c16 = arith.constant 16 : index
    %c0_22 = arith.constant 0 : index
    %22 = vector.load %arg16[%c0_21, %c1, %c16, %c0_22] : memref<1x18x24x128xf32, #tpu.memory_space<vmem>>, vector<1x16x8x128xf32>
    tpu.vector_store %arg16[%c0_21, %c1, %c16, %c0_22], %21 {strides = array<i32>} : memref<1x18x24x128xf32, #tpu.memory_space<vmem>>, vector<1x16x8x128xf32>,
    %23 = vector.shape_cast %16 : vector<256x128xf32> to vector<1x16x16x128xf32>
    %c0_23 = arith.constant 0 : index
    %c1_24 = arith.constant 1 : index
    %c0_25 = arith.constant 0 : index
    %c0_26 = arith.constant 0 : index
    %24 = vector.load %arg16[%c0_23, %c1_24, %c0_25, %c0_26] : memref<1x18x24x128xf32, #tpu.memory_space<vmem>>, vector<1x16x16x128xf32>
    tpu.vector_store %arg16[%c0_23, %c1_24, %c0_25, %c0_26], %23 {strides = array<i32>} : memref<1x18x24x128xf32, #tpu.memory_space<vmem>>, vector<1x16x16x128xf32>,
    %c0_27 = arith.constant 0 : index
    %c0_28 = arith.constant 0 : index
    %c0_29 = arith.constant 0 : index
    %c0_30 = arith.constant 0 : index
    %25 = vector.load %arg16[%c0_27, %c0_28, %c0_29, %c0_30] : memref<1x18x24x128xf32, #tpu.memory_space<vmem>>, vector<1x18x24x128xf32>
    %26 = vector.shape_cast %25 : vector<1x18x24x128xf32> to vector<432x128xf32>
    %c1_i32 = arith.constant 1 : i32
    %27 = tpu.dynamic_rotate %26 by %c1_i32 dim 0 : vector<432x128xf32>, i32 -> vector<432x128xf32>
    %28 = vector.shape_cast %27 : vector<432x128xf32> to vector<1x18x24x128xf32>
    %29 = vector.shape_cast %26 : vector<432x128xf32> to vector<1x18x24x128xf32>
    %c431_i32 = arith.constant 431 : i32
    %30 = tpu.dynamic_rotate %26 by %c431_i32 dim 0 : vector<432x128xf32>, i32 -> vector<432x128xf32>
    %31 = vector.shape_cast %30 : vector<432x128xf32> to vector<1x18x24x128xf32>
    %cst_31 = arith.constant 0.000000e+00 : f32
    %32 = vector.broadcast %cst_31 : f32 to vector<1x16x24x128xf32>
    %c0_32 = arith.constant 0 : index
    %c0_33 = arith.constant 0 : index
    %33 = vector.load %arg5[%c0_32, %c0_33] : memref<9x128xf32, #tpu.memory_space<vmem>>, vector<1x128xf32>
    %34 = vector.extract_strided_slice %28 {offsets = [0, 0, 0, 0], sizes = [1, 16, 24, 128], strides = [1, 1, 1, 1]} : vector<1x18x24x128xf32> to vector<1x16x24x128xf32>
    %35 = vector.shape_cast %33 : vector<1x128xf32> to vector<1x1x1x128xf32>
    %36 = vector.broadcast %35 : vector<1x1x1x128xf32> to vector<1x16x24x128xf32>
    %37 = arith.mulf %34, %36 : vector<1x16x24x128xf32>
    %38 = arith.addf %32, %37 : vector<1x16x24x128xf32>
    %c1_34 = arith.constant 1 : index
    %c0_35 = arith.constant 0 : index
    %39 = vector.load %arg5[%c1_34, %c0_35] : memref<9x128xf32, #tpu.memory_space<vmem>>, vector<1x128xf32>
    %40 = vector.extract_strided_slice %29 {offsets = [0, 0, 0, 0], sizes = [1, 16, 24, 128], strides = [1, 1, 1, 1]} : vector<1x18x24x128xf32> to vector<1x16x24x128xf32>
    %41 = vector.shape_cast %39 : vector<1x128xf32> to vector<1x1x1x128xf32>
    %42 = vector.broadcast %41 : vector<1x1x1x128xf32> to vector<1x16x24x128xf32>
    %43 = arith.mulf %40, %42 : vector<1x16x24x128xf32>
    %44 = arith.addf %38, %43 : vector<1x16x24x128xf32>
    %c2 = arith.constant 2 : index
    %c0_36 = arith.constant 0 : index
    %45 = vector.load %arg5[%c2, %c0_36] : memref<9x128xf32, #tpu.memory_space<vmem>>, vector<1x128xf32>
    %46 = vector.extract_strided_slice %31 {offsets = [0, 0, 0, 0], sizes = [1, 16, 24, 128], strides = [1, 1, 1, 1]} : vector<1x18x24x128xf32> to vector<1x16x24x128xf32>
    %47 = vector.shape_cast %45 : vector<1x128xf32> to vector<1x1x1x128xf32>
    %48 = vector.broadcast %47 : vector<1x1x1x128xf32> to vector<1x16x24x128xf32>
    %49 = arith.mulf %46, %48 : vector<1x16x24x128xf32>
    %50 = arith.addf %44, %49 : vector<1x16x24x128xf32>
    %c3 = arith.constant 3 : index
    %c0_37 = arith.constant 0 : index
    %51 = vector.load %arg5[%c3, %c0_37] : memref<9x128xf32, #tpu.memory_space<vmem>>, vector<1x128xf32>
    %52 = vector.extract_strided_slice %28 {offsets = [0, 1, 0, 0], sizes = [1, 16, 24, 128], strides = [1, 1, 1, 1]} : vector<1x18x24x128xf32> to vector<1x16x24x128xf32>
    %53 = vector.shape_cast %51 : vector<1x128xf32> to vector<1x1x1x128xf32>
    %54 = vector.broadcast %53 : vector<1x1x1x128xf32> to vector<1x16x24x128xf32>
    %55 = arith.mulf %52, %54 : vector<1x16x24x128xf32>
    %56 = arith.addf %50, %55 : vector<1x16x24x128xf32>
    %c4 = arith.constant 4 : index
    %c0_38 = arith.constant 0 : index
    %57 = vector.load %arg5[%c4, %c0_38] : memref<9x128xf32, #tpu.memory_space<vmem>>, vector<1x128xf32>
    %58 = vector.extract_strided_slice %29 {offsets = [0, 1, 0, 0], sizes = [1, 16, 24, 128], strides = [1, 1, 1, 1]} : vector<1x18x24x128xf32> to vector<1x16x24x128xf32>
    %59 = vector.shape_cast %57 : vector<1x128xf32> to vector<1x1x1x128xf32>
    %60 = vector.broadcast %59 : vector<1x1x1x128xf32> to vector<1x16x24x128xf32>
    %61 = arith.mulf %58, %60 : vector<1x16x24x128xf32>
    %62 = arith.addf %56, %61 : vector<1x16x24x128xf32>
    %c5 = arith.constant 5 : index
    %c0_39 = arith.constant 0 : index
    %63 = vector.load %arg5[%c5, %c0_39] : memref<9x128xf32, #tpu.memory_space<vmem>>, vector<1x128xf32>
    %64 = vector.extract_strided_slice %31 {offsets = [0, 1, 0, 0], sizes = [1, 16, 24, 128], strides = [1, 1, 1, 1]} : vector<1x18x24x128xf32> to vector<1x16x24x128xf32>
    %65 = vector.shape_cast %63 : vector<1x128xf32> to vector<1x1x1x128xf32>
    %66 = vector.broadcast %65 : vector<1x1x1x128xf32> to vector<1x16x24x128xf32>
    %67 = arith.mulf %64, %66 : vector<1x16x24x128xf32>
    %68 = arith.addf %62, %67 : vector<1x16x24x128xf32>
    %c6 = arith.constant 6 : index
    %c0_40 = arith.constant 0 : index
    %69 = vector.load %arg5[%c6, %c0_40] : memref<9x128xf32, #tpu.memory_space<vmem>>, vector<1x128xf32>
    %70 = vector.extract_strided_slice %28 {offsets = [0, 2, 0, 0], sizes = [1, 16, 24, 128], strides = [1, 1, 1, 1]} : vector<1x18x24x128xf32> to vector<1x16x24x128xf32>
    %71 = vector.shape_cast %69 : vector<1x128xf32> to vector<1x1x1x128xf32>
    %72 = vector.broadcast %71 : vector<1x1x1x128xf32> to vector<1x16x24x128xf32>
    %73 = arith.mulf %70, %72 : vector<1x16x24x128xf32>
    %74 = arith.addf %68, %73 : vector<1x16x24x128xf32>
    %c7 = arith.constant 7 : index
    %c0_41 = arith.constant 0 : index
    %75 = vector.load %arg5[%c7, %c0_41] : memref<9x128xf32, #tpu.memory_space<vmem>>, vector<1x128xf32>
    %76 = vector.extract_strided_slice %29 {offsets = [0, 2, 0, 0], sizes = [1, 16, 24, 128], strides = [1, 1, 1, 1]} : vector<1x18x24x128xf32> to vector<1x16x24x128xf32>
    %77 = vector.shape_cast %75 : vector<1x128xf32> to vector<1x1x1x128xf32>
    %78 = vector.broadcast %77 : vector<1x1x1x128xf32> to vector<1x16x24x128xf32>
    %79 = arith.mulf %76, %78 : vector<1x16x24x128xf32>
    %80 = arith.addf %74, %79 : vector<1x16x24x128xf32>
    %c8 = arith.constant 8 : index
    %c0_42 = arith.constant 0 : index
    %81 = vector.load %arg5[%c8, %c0_42] : memref<9x128xf32, #tpu.memory_space<vmem>>, vector<1x128xf32>
    %82 = vector.extract_strided_slice %31 {offsets = [0, 2, 0, 0], sizes = [1, 16, 24, 128], strides = [1, 1, 1, 1]} : vector<1x18x24x128xf32> to vector<1x16x24x128xf32>
    %83 = vector.shape_cast %81 : vector<1x128xf32> to vector<1x1x1x128xf32>
    %84 = vector.broadcast %83 : vector<1x1x1x128xf32> to vector<1x16x24x128xf32>
    %85 = arith.mulf %82, %84 : vector<1x16x24x128xf32>
    %86 = arith.addf %80, %85 : vector<1x16x24x128xf32>
    %87 = vector.extract_strided_slice %86 {offsets = [0, 0, 0, 0], sizes = [1, 16, 16, 128], strides = [1, 1, 1, 1]} : vector<1x16x24x128xf32> to vector<1x16x16x128xf32>
    %88 = vector.shape_cast %87 : vector<1x16x16x128xf32> to vector<256x128xf32>
    %c0_43 = arith.constant 0 : index
    %c0_44 = arith.constant 0 : index
    %89 = vector.load %arg6[%c0_43, %c0_44] : memref<1x128xf32, #tpu.memory_space<vmem>>, vector<1x128xf32>
    %90 = vector.broadcast %89 : vector<1x128xf32> to vector<256x128xf32>
    %91 = arith.mulf %88, %90 : vector<256x128xf32>
    %c0_45 = arith.constant 0 : index
    %c0_46 = arith.constant 0 : index
    %92 = vector.load %arg7[%c0_45, %c0_46] : memref<1x128xf32, #tpu.memory_space<vmem>>, vector<1x128xf32>
    %93 = vector.broadcast %92 : vector<1x128xf32> to vector<256x128xf32>
    %94 = arith.addf %91, %93 : vector<256x128xf32>
    %cst_47 = arith.constant 0.000000e+00 : f32
    %95 = vector.broadcast %cst_47 : f32 to vector<256x128xf32>
    %96 = arith.subf %95, %94 : vector<256x128xf32>
    %97 = math.exp %96 : vector<256x128xf32>
    %cst_48 = arith.constant 1.000000e+00 : f32
    %98 = vector.broadcast %cst_48 : f32 to vector<256x128xf32>
    %99 = arith.addf %98, %97 : vector<256x128xf32>
    %100 = tpu.reciprocal %99 {approx = true} : vector<256x128xf32> -> vector<256x128xf32>
    %101 = arith.mulf %94, %100 : vector<256x128xf32>
    %102 = vector.shape_cast %101 : vector<256x128xf32> to vector<1x256x128xf32>
    %cst_49 = arith.constant dense<0.000000e+00> : vector<1x128xf32>
    %103 = vector.multi_reduction <add>, %102, %cst_49 [1] : vector<1x256x128xf32> to vector<1x128xf32>
    %cst_50 = arith.constant 3.906250e-03 : f32
    %104 = vector.broadcast %cst_50 : f32 to vector<1x128xf32>
    %105 = arith.mulf %103, %104 : vector<1x128xf32>
    %c0_51 = arith.constant 0 : index
    %c0_52 = arith.constant 0 : index
    %106 = vector.load %arg8[%c0_51, %c0_52] : memref<128x8xf32, #tpu.memory_space<vmem>>, vector<128x8xf32>
    %cst_53 = arith.constant dense<0.000000e+00> : vector<1x8xf32>
    %107 = tpu.matmul %105, %106, %cst_53 {dimension_numbers = #tpu.dot_dimension_numbers<[1], [0], [0], [1], [0, 0, 1, 1], [], []>} : vector<1x128xf32>, vector<128x8xf32>, vector<1x8xf32> -> vector<1x8xf32>
    %c0_54 = arith.constant 0 : index
    %c0_55 = arith.constant 0 : index
    %108 = vector.load %arg9[%c0_54, %c0_55] : memref<1x8xf32, #tpu.memory_space<vmem>>, vector<1x8xf32>
    %109 = arith.addf %107, %108 : vector<1x8xf32>
    %cst_56 = arith.constant 0.000000e+00 : f32
    %110 = vector.broadcast %cst_56 : f32 to vector<1x8xf32>
    %111 = arith.subf %110, %109 : vector<1x8xf32>
    %112 = math.exp %111 : vector<1x8xf32>
    %cst_57 = arith.constant 1.000000e+00 : f32
    %113 = vector.broadcast %cst_57 : f32 to vector<1x8xf32>
    %114 = arith.addf %113, %112 : vector<1x8xf32>
    %115 = arith.divf %109, %114 : vector<1x8xf32>
    %c0_58 = arith.constant 0 : index
    %c0_59 = arith.constant 0 : index
    %116 = vector.load %arg10[%c0_58, %c0_59] : memref<8x128xf32, #tpu.memory_space<vmem>>, vector<8x128xf32>
    %cst_60 = arith.constant dense<0.000000e+00> : vector<1x128xf32>
    %117 = tpu.matmul %115, %116, %cst_60 {dimension_numbers = #tpu.dot_dimension_numbers<[1], [0], [0], [1], [0, 0, 1, 1], [], []>} : vector<1x8xf32>, vector<8x128xf32>, vector<1x128xf32> -> vector<1x128xf32>
    %c0_61 = arith.constant 0 : index
    %c0_62 = arith.constant 0 : index
    %118 = vector.load %arg11[%c0_61, %c0_62] : memref<1x128xf32, #tpu.memory_space<vmem>>, vector<1x128xf32>
    %119 = arith.addf %117, %118 : vector<1x128xf32>
    %cst_63 = arith.constant 0.000000e+00 : f32
    %120 = vector.broadcast %cst_63 : f32 to vector<1x128xf32>
    %121 = arith.subf %120, %119 : vector<1x128xf32>
    %122 = math.exp %121 : vector<1x128xf32>
    %cst_64 = arith.constant 1.000000e+00 : f32
    %123 = vector.broadcast %cst_64 : f32 to vector<1x128xf32>
    %124 = arith.addf %123, %122 : vector<1x128xf32>
    %cst_65 = arith.constant 1.000000e+00 : f32
    %125 = vector.broadcast %cst_65 : f32 to vector<1x128xf32>
    %126 = arith.divf %125, %124 : vector<1x128xf32>
    %127 = vector.shape_cast %126 : vector<1x128xf32> to vector<1x1x128xf32>
    %128 = vector.broadcast %127 : vector<1x1x128xf32> to vector<1x256x128xf32>
    %129 = arith.mulf %102, %128 : vector<1x256x128xf32>
    %130 = vector.shape_cast %129 : vector<1x256x128xf32> to vector<256x128xf32>
    %131 = arith.truncf %130 : vector<256x128xf32> to vector<256x128xbf16>
    %c0_66 = arith.constant 0 : index
    %c0_67 = arith.constant 0 : index
    %132 = vector.load %arg12[%c0_66, %c0_67] : memref<128x32xbf16, #tpu.memory_space<vmem>>, vector<128x32xbf16>
    %cst_68 = arith.constant dense<0.000000e+00> : vector<256x32xf32>
    %133 = tpu.matmul %131, %132, %cst_68 {dimension_numbers = #tpu.dot_dimension_numbers<[1], [0], [0], [1], [0, 0, 1, 1], [], []>} : vector<256x128xbf16>, vector<128x32xbf16>, vector<256x32xf32> -> vector<256x32xf32>
    %c0_69 = arith.constant 0 : index
    %c0_70 = arith.constant 0 : index
    %134 = vector.load %arg13[%c0_69, %c0_70] : memref<1x32xf32, #tpu.memory_space<vmem>>, vector<1x32xf32>
    %135 = vector.broadcast %134 : vector<1x32xf32> to vector<256x32xf32>
    %136 = arith.mulf %133, %135 : vector<256x32xf32>
    %c0_71 = arith.constant 0 : index
    %c0_72 = arith.constant 0 : index
    %137 = vector.load %arg14[%c0_71, %c0_72] : memref<1x32xf32, #tpu.memory_space<vmem>>, vector<1x32xf32>
    %138 = vector.broadcast %137 : vector<1x32xf32> to vector<256x32xf32>
    %139 = arith.addf %136, %138 : vector<256x32xf32>
    %cst_73 = arith.constant 0.000000e+00 : f32
    %140 = vector.broadcast %cst_73 : f32 to vector<256x32xf32>
    %141 = arith.subf %140, %139 : vector<256x32xf32>
    %142 = math.exp %141 : vector<256x32xf32>
    %cst_74 = arith.constant 1.000000e+00 : f32
    %143 = vector.broadcast %cst_74 : f32 to vector<256x32xf32>
    %144 = arith.addf %143, %142 : vector<256x32xf32>
    %145 = tpu.reciprocal %144 {approx = true} : vector<256x32xf32> -> vector<256x32xf32>
    %146 = arith.mulf %139, %145 : vector<256x32xf32>
    %c0_75 = arith.constant 0 : index
    %c0_76 = arith.constant 0 : index
    %c0_77 = arith.constant 0 : index
    %c0_78 = arith.constant 0 : index
    %147 = vector.load %arg1[%c0_75, %c0_76, %c0_77, %c0_78] : memref<1x16x16x32xbf16, #tpu.memory_space<vmem>>, vector<1x16x16x32xbf16>
    %148 = arith.extf %147 : vector<1x16x16x32xbf16> to vector<1x16x16x32xf32>
    %149 = vector.shape_cast %148 : vector<1x16x16x32xf32> to vector<256x32xf32>
    %150 = arith.addf %146, %149 : vector<256x32xf32>
    %151 = vector.shape_cast %150 : vector<256x32xf32> to vector<1x16x16x32xf32>
    %c0_79 = arith.constant 0 : index
    %c0_80 = arith.constant 0 : index
    %c0_81 = arith.constant 0 : index
    %c0_82 = arith.constant 0 : index
    %152 = vector.load %arg15[%c0_79, %c0_80, %c0_81, %c0_82] : memref<1x16x16x32xf32, #tpu.memory_space<vmem>>, vector<1x16x16x32xf32>
    tpu.vector_store %arg15[%c0_79, %c0_80, %c0_81, %c0_82], %151 {strides = array<i32>} : memref<1x16x16x32xf32, #tpu.memory_space<vmem>>, vector<1x16x16x32xf32>,
    return
  }
  func.func @transform_0(%arg0: i32) -> (i32, i32, i32, i32) {
    %c0_i32 = arith.constant 0 : i32
    %c0_i32_0 = arith.constant 0 : i32
    %c0_i32_1 = arith.constant 0 : i32
    %c0_i32_2 = arith.constant 0 : i32
    return %arg0, %c0_i32, %c0_i32_0, %c0_i32_1 : i32, i32, i32, i32
  }
  func.func @transform_1(%arg0: i32) -> (i32, i32) {
    %c0_i32 = arith.constant 0 : i32
    %c0_i32_0 = arith.constant 0 : i32
    %c0_i32_1 = arith.constant 0 : i32
    return %c0_i32, %c0_i32_0 : i32, i32
  }
  func.func @transform_2(%arg0: i32) -> (i32, i32) {
    %c0_i32 = arith.constant 0 : i32
    %c0_i32_0 = arith.constant 0 : i32
    %c0_i32_1 = arith.constant 0 : i32
    return %c0_i32, %c0_i32_0 : i32, i32
  }
  func.func @transform_3(%arg0: i32) -> (i32, i32) {
    %c0_i32 = arith.constant 0 : i32
    %c0_i32_0 = arith.constant 0 : i32
    %c0_i32_1 = arith.constant 0 : i32
    return %c0_i32, %c0_i32_0 : i32, i32
  }
  func.func @transform_4(%arg0: i32) -> (i32, i32) {
    %c0_i32 = arith.constant 0 : i32
    %c0_i32_0 = arith.constant 0 : i32
    %c0_i32_1 = arith.constant 0 : i32
    return %c0_i32, %c0_i32_0 : i32, i32
  }
  func.func @transform_5(%arg0: i32) -> (i32, i32) {
    %c0_i32 = arith.constant 0 : i32
    %c0_i32_0 = arith.constant 0 : i32
    %c0_i32_1 = arith.constant 0 : i32
    return %c0_i32, %c0_i32_0 : i32, i32
  }
  func.func @transform_6(%arg0: i32) -> (i32, i32) {
    %c0_i32 = arith.constant 0 : i32
    %c0_i32_0 = arith.constant 0 : i32
    %c0_i32_1 = arith.constant 0 : i32
    return %c0_i32, %c0_i32_0 : i32, i32
  }
  func.func @transform_7(%arg0: i32) -> (i32, i32) {
    %c0_i32 = arith.constant 0 : i32
    %c0_i32_0 = arith.constant 0 : i32
    %c0_i32_1 = arith.constant 0 : i32
    return %c0_i32, %c0_i32_0 : i32, i32
  }
  func.func @transform_8(%arg0: i32) -> (i32, i32) {
    %c0_i32 = arith.constant 0 : i32
    %c0_i32_0 = arith.constant 0 : i32
    %c0_i32_1 = arith.constant 0 : i32
    return %c0_i32, %c0_i32_0 : i32, i32
  }
  func.func @transform_9(%arg0: i32) -> (i32, i32) {
    %c0_i32 = arith.constant 0 : i32
    %c0_i32_0 = arith.constant 0 : i32
    %c0_i32_1 = arith.constant 0 : i32
    return %c0_i32, %c0_i32_0 : i32, i32
  }
  func.func @transform_10(%arg0: i32) -> (i32, i32) {
    %c0_i32 = arith.constant 0 : i32
    %c0_i32_0 = arith.constant 0 : i32
    %c0_i32_1 = arith.constant 0 : i32
    return %c0_i32, %c0_i32_0 : i32, i32
  }
  func.func @transform_11(%arg0: i32) -> (i32, i32) {
    %c0_i32 = arith.constant 0 : i32
    %c0_i32_0 = arith.constant 0 : i32
    %c0_i32_1 = arith.constant 0 : i32
    return %c0_i32, %c0_i32_0 : i32, i32
  }
  func.func @transform_12(%arg0: i32) -> (i32, i32) {
    %c0_i32 = arith.constant 0 : i32
    %c0_i32_0 = arith.constant 0 : i32
    %c0_i32_1 = arith.constant 0 : i32
    return %c0_i32, %c0_i32_0 : i32, i32
  }
  func.func @transform_13(%arg0: i32) -> (i32, i32) {
    %c0_i32 = arith.constant 0 : i32
    %c0_i32_0 = arith.constant 0 : i32
    %c0_i32_1 = arith.constant 0 : i32
    return %c0_i32, %c0_i32_0 : i32, i32
  }
  func.func @transform_14(%arg0: i32) -> (i32, i32, i32, i32) {
    %c0_i32 = arith.constant 0 : i32
    %c0_i32_0 = arith.constant 0 : i32
    %c0_i32_1 = arith.constant 0 : i32
    %c0_i32_2 = arith.constant 0 : i32
    return %arg0, %c0_i32, %c0_i32_0, %c0_i32_1 : i32, i32, i32, i32
  }
}

</mosaic_0001>

<bundles_post_ra>
// kernel: tpu_custom_call.1
= control target key start
LH: loop header
LB: loop body
LE: loop exit
PB: predicated region body
PF: predicated region fallthrough
CT: control target
= control target key end

     0   :  { %s6158_s0 = inlined_call_operand.hbm [shape: bf16[2,16,16,32], index: 0, kind: input, shape index: {}]   ;;  %s6159_s1 = inlined_call_operand.vmem [shape: bf16[32,128], index: 1, kind: input, shape index: {}]   ;;  %s6160_s2 = inlined_call_operand.vmem [shape: f32[1,128], index: 2, kind: input, shape index: {}]   ;;  %s6161_s3 = inlined_call_operand.vmem [shape: f32[1,128], index: 3, kind: input, shape index: {}]   ;;  %s6162_s4 = inlined_call_operand.vmem [shape: f32[9,128], index: 4, kind: input, shape index: {}]   ;;  %s6163_s5 = inlined_call_operand.vmem [shape: f32[1,128], index: 5, kind: input, shape index: {}]   ;;  %s6164_s6 = inlined_call_operand.vmem [shape: f32[1,128], index: 6, kind: input, shape index: {}]   ;;  %s6165_s7 = inlined_call_operand.vmem [shape: f32[128,8], index: 7, kind: input, shape index: {}]   ;;  %s6166_s8 = inlined_call_operand.vmem [shape: f32[1,8], index: 8, kind: input, shape index: {}]   ;;  %s6167_s9 = inlined_call_operand.vmem [shape: f32[8,128], index: 9, kind: input, shape index: {}]   ;;  %s6168_s10 = inlined_call_operand.vmem [shape: f32[1,128], index: 10, kind: input, shape index: {}]   ;;  %s6169_s11 = inlined_call_operand.vmem [shape: bf16[128,32], index: 11, kind: input, shape index: {}]   ;;  %s6170_s12 = inlined_call_operand.vmem [shape: f32[1,32], index: 12, kind: input, shape index: {}]   ;;  %s6171_s13 = inlined_call_operand.vmem [shape: f32[1,32], index: 13, kind: input, shape index: {}]   ;;  %s6172_s14 = inlined_call_operand.hbm [shape: f32[2,16,16,32], index: 14, kind: output, shape index: {}]  }
   0x1   :  { %6206 = sst [smem:[#allocation54_spill]] %s6158_s0 }
   0x2   :  { %6207 = sst [smem:[#allocation55_spill]] %s6159_s1 }
   0x3   :  { %6208 = sst [smem:[#allocation56_spill]] %s6172_s14 }
   0x4   :  { %19 = vsyncpa [#allocation4], 0 }
   0x5   :  { %21 = vsyncpa [#allocation4 + $0x1], 0 }
   0x6   :  { %22 = vsyncpa [#allocation5], 0 }
   0x7   :  { %24 = vsyncpa [#allocation5 + $0x1], 0  ;;  %s3900_s29 = smov 0   ;;  %s3902_s30 = smov 0  }
   0x8   :  { %s3904_s15 = smov 0   ;;  %s3906_s16 = smov 0  }
   0x9 LB: > { %6209 = sst [smem:[#allocation9_spill]] %s3806_s29  ;;  %s3921_s17 = sadd.s32 4294967295, %s3818_s16   ;;  %s3818_s16 = sphi %s3906_s16, %s6322_s16   ;;  %s3814_s15 = sphi %s3904_s15, %s6324_s15   ;;  %s3810_s30 = sphi %s3902_s30, %s6326_s30   ;;  %s3806_s29 = sphi %s3900_s29, %s6325_s29  }
   0xa   : > { %6210 = sst [smem:[#allocation10_spill]] %s3814_s15  ;;  %s2993_s18 = sadd.s32 4294967294, %s3818_s16  }
   0xb   : > { %6211 = sst [smem:[#allocation11_spill]] %s3921_s17  ;;  %s3925_s19 = sadd.s32 1, %s3818_s16  }
   0xc   : > { %6212 = sst [smem:[#allocation12_spill]] %s3925_s19  ;;  %s37_s20 = sadd.s32 1, %s3814_s15 }
   0xd   : > { %s34_s21 = ssub.s32 %s3818_s16, %s3925_s19  ;;  %p44_p0 = scmp.ne.s32.totalorder %s3814_s15, %s3810_s30 }
   0xe   : > { %p35_p1 = scmp.eq.s32.totalorder %s34_s21, 0  ;;  %p45_p2 = scmp.eq.s32.totalorder %s3818_s16, 0 }
   0xf   : > { %p50_p3 = scmp.ne.s32.totalorder %s3810_s30, %s3806_s29  ;;  %p51_p4 = scmp.eq.s32.totalorder %s3921_s17, 0 }
  0x10   : > { %s3937_s22 = scalar_select %p35_p1, %s3814_s15, %s37_s20  }
  0x11   : > { %p3939_p5 = por %p45_p2, %p44_p0  ;;  %p3943_p6 = por %p51_p4, %p50_p3 }
  0x12   : > { %6213 = sst [smem:[#allocation13_spill]] %s3937_s22  ;;  %p347_p7 = scmp.eq.s32.totalorder %s3921_s17, 1 }
  0x13   : > { %p353_p8 = scmp.eq.s32.totalorder %s2993_s18, 1  ;;  %p3257_p10 = scmp.lt.s32.totalorder %s3818_s16, 2 }
  0x14   : > { %p3950_p11 = por %p347_p7, %p44_p0  ;;  %s412_s27 = sand.u32 1, %s3814_s15  }
  0x15   : > { %p3954_p12 = por %p353_p8, %p50_p3  ;;  %s3128_s28 = sshll.u32 %s3818_s16, 7 }
  0x16   : > { %s6216_s25 = scalar_select %p3950_p11, 1, 0 }
  0x17   : > { %s6218_s26 = scalar_select %p3954_p12, 1, 0 }
  0x18   : > { %6217 = sst [smem:[#allocation14_spill]] %s6216_s25  ;;  %s2996_s20 = sshll.u32 %s412_s27, 7 }
  0x19   : > { %6219 = sst [smem:[#allocation15_spill]] %s6218_s26  ;;  %s416_s18 = scalar_lea.vmem [#allocation3], %s2996_s20 }
  0x1a   : > { %s6220_s0 = sld [smem:[#allocation54_spill]]  ;;  %s424_s14 = sshll.u32 %s416_s18, 4  ;;  %s425_s14 = int_to_ptr.vmem [resolvable:$true] %s424_s14 }
  0x1b   : > { %p3965_p13 = pnand %p3257_p10, %p3939_p5  ;;  %p2999_p0 = scmp.ge.s32.totalorder %s3818_s16, 1 }
  0x1c   : > { %p432_p1 = scmp.lt.s32.totalorder %s3818_s16, 3  ;;  %s413_s15 = scalar_lea.sflag [#allocation4], %s412_s27 }
  0x1d   : > { %p3726_p3 = pneg %p3965_p13 }
  0x20   : > { %s421_s19 = scalar_lea.hbm %s6220_s0, %s3128_s28  ;;  %s3729_s23 = scalar_lea.hbm %s6220_s0, 256 }
  0x21   : > { %s422_s29 = sshll.u32 %s421_s19, 4  ;;  %s423_s29 = int_to_ptr.hbm [resolvable:$true] %s422_s29 }
  0x22   : > { %s3722_s26 = sshra.s32 %s423_s29, 4  ;;  %s3723_s26 = int_to_ptr.hbm [resolvable:$true] %s3722_s26 }
  0x23   : > { %s3724_s25 = scalar_lea.hbm %s3723_s26, 128  ;;  %p3730_p5 = scmp.lt.s32.totalorder %s3723_s26, %s6220_s0 }
  0x24   : > { %p3725_p2 = scmp.ne.s32.totalorder %s3723_s26, %s3724_s25  ;;  %p3731_p8 = scmp.lt.s32.totalorder %s3729_s23, %s3724_s25 }
  0x26   : > { %p3727_p4 = pnand %p3726_p3, %p3725_p2  ;;  %p3732_p10 = por %p3731_p8, %p3730_p5 }
  0x28   : > { %p3728_p7 = pneg %p3727_p4 }
  0x2a   : > { %p3733_p9 = pnand %p3732_p10, %p3728_p7 }
  0x2c   : > { %3736 = shalt.err (!%p3733_p9)
}
  0x2d   : > { %s3820_s27 = smov 64   ;;  %s3821_s21 = smov 4  }
  0x2e   : > { %3252 = dma.hbm_to_vmem [thread:$0]  (!%p3965_p13), %s423_s29, 2048, %s425_s14, %s413_s15, %s3820_s27, %s3820_s27, %s3821_s21  }
  0x2f   : > { %p433_p2 = pnand %p2999_p0, %p432_p1 }
  0x31   : > { %436 = sbr.rel (%p433_p2) target bundleno = 1173 (0x495), region = 76 }
  0x36   : > { %s3986_s18 = sand.u32 1, %s3810_s30  }
  0x37   : > { %s3000_s25 = sshll.u32 %s3986_s18, 7  ;;  %s439_s26 = scalar_lea.sflag [#allocation4], %s3986_s18 }
  0x38   : > { %s3990_s19 = scalar_lea.vmem [#allocation3], %s3000_s25 }
  0x39   : > { %3797 = dma.done.wait (%p3943_p6), %s439_s26, 2048  }
  0x3a   : > { %3799 = vsyncadd (%p3943_p6), %s439_s26, 4294965248  ;;  %s6222_s1 = sld [smem:[#allocation55_spill]]  ;;  %vm617_vm0 = vcmask 261120   ;;  %v3129_v2 = vld [vmem:[%s3990_s19] sm:$0xff]  ;;  %v3138_v3 = vld [vmem:[%s3990_s19 + $0x48] sm:$0xff]  ;;  %v3822_v43 = vmov 0.0   ;;  %v1183_v52 = vlaneseq }
  0x3b   : > { %v3130_v4 = vld [vmem:[%s3990_s19 + $0x8] sm:$0xff]  ;;  %v3139_v5 = vld [vmem:[%s3990_s19 + $0x50] sm:$0xff]  ;;  %v3140_v7 = vld [vmem:[%s3990_s19 + $0x58] sm:$0xff]  ;;  %v4063_v44 = vrot.slane %v3822_v43, 7  ;;  %v4078_v55 = vrot.slane %v3822_v43, 1  ;;  %vm2267_vm7 = vcmask 64512  }
  0x3c   : > { %v3131_v6 = vld [vmem:[%s3990_s19 + $0x10] sm:$0xff]  ;;  %v3132_v8 = vld [vmem:[%s3990_s19 + $0x18] sm:$0xff]  ;;  %v3141_v9 = vld [vmem:[%s3990_s19 + $0x60] sm:$0xff]  ;;  %v4090_v61 = vshrl.u32 %v1183_v52, 7  ;;  %s3001_s27 = sshll.u32 %s3986_s18, 8  ;;  %s6315_s25 = sld [smem:[#allocation11_spill]] }
  0x3d   : > { %v3133_v10 = vld [vmem:[%s3990_s19 + $0x20] sm:$0xff]  ;;  %v3142_v11 = vld [vmem:[%s3990_s19 + $0x68] sm:$0xff]  ;;  %v3143_v13 = vld [vmem:[%s3990_s19 + $0x70] sm:$0xff]  ;;  %s5900_s21 = scalar_lea.vmem [#allocation6], %s3001_s27  ;;  %s6316_s29 = sld [smem:[#allocation56_spill]] }
  0x3e   : > { %v3134_v12 = vld [vmem:[%s3990_s19 + $0x28] sm:$0xff]  ;;  %v3135_v14 = vld [vmem:[%s3990_s19 + $0x30] sm:$0xff]  ;;  %v3144_v15 = vld [vmem:[%s3990_s19 + $0x78] sm:$0xff]  ;;  %vm1185_vm1 = vcmp.lt.s32.totalorder %v4090_v61, 1  ;;  %vm1276_vm2 = vcmp.lt.s32.totalorder %v4090_v61, 7  ;;  %s2917_s22 = sshll.u32 %s5900_s21, 4  ;;  %s2918_s22 = int_to_ptr.vmem [resolvable:$true] %s2917_s22 }
  0x3f   : > { %v3136_v16 = vld [vmem:[%s3990_s19 + $0x38] sm:$0xff]  ;;  %v4035_v17 = vld [vmem:[%s6160_s2] ss:$0 sm:$0xff]  ;;  %v4068_v45 = vld [vmem:[%s6162_s4 + $0x1] ss:$0 sm:$0xff]  ;;  %s2905_s28 = scalar_lea.sflag [#allocation5], %s3986_s18 }
  0x40   : > { %v3146_v0 = vld [vmem:[%s6222_s1 + $0x8] sm:$0xff]  ;;  %v3145_v1 = vld [vmem:[%s6222_s1] sm:$0xff]  ;;  %v1381_v57 = vmul.f32 0.0, %v4068_v45 }
  0x41   : > { %672 = vmatpush.bf16.msra.mxu0 %v3146_v0  ;;  %3235 = vmatpush.bf16.msra.mxu1 %v3146_v0  ;;  %v4040_v18 = vld [vmem:[%s6161_s3] ss:$0 sm:$0xff]  ;;  %v4086_v58 = vld [vmem:[%s6162_s4 + $0x2] ss:$0 sm:$0xff] }
  0x42   : > { %v3137_v19 = vld [vmem:[%s3990_s19 + $0x40] sm:$0xff] }
  0x43   : > { %v4061_v39 = vld [vmem:[%s6162_s4] ss:$0 sm:$0xff]  ;;  %s6317_s17 = smov %s6316_s29 }
  0x44   : > { %v1315_v56 = vmul.f32 %v4061_v39, %v4063_v44  ;;  %s3772_s26 = scalar_lea.hbm %s6317_s17, 512 }
  0x45   : > { %673 = vmatpush.bf16.msra.mxu0 %v3145_v1  ;;  %3236 = vmatpush.bf16.msra.mxu1 %v3145_v1 }
  0x46   : > { %v1413_v1 = vadd.f32 %v1381_v57, %v1315_v56 }
  0x48   : > { %3074 = vmatmul.msk.bf16.vlgmr.msra.gmra.mxu0 %vm617_vm0, %v3129_v2  ;;  %3083 = vmatmul.msk.bf16.vlgmr.msra.gmra.mxu1 %vm617_vm0, %v3138_v3  ;;  %v1447_v2 = vmul.f32 %v4086_v58, %v4078_v55 }
  0x58   : > { %3075 = vmatmul.msk.bf16.gmra.mxu0 %vm617_vm0, %v3130_v4  ;;  %3084 = vmatmul.msk.bf16.gmra.mxu1 %vm617_vm0, %v3139_v5 }
  0x68   : > { %3076 = vmatmul.msk.bf16.gmra.mxu0 %vm617_vm0, %v3131_v6  ;;  %3085 = vmatmul.msk.bf16.gmra.mxu1 %vm617_vm0, %v3140_v7 }
  0x78   : > { %3077 = vmatmul.msk.bf16.gmra.mxu0 %vm617_vm0, %v3132_v8  ;;  %3086 = vmatmul.msk.bf16.gmra.mxu1 %vm617_vm0, %v3141_v9  ;;  %v4098_v9 = vld [vmem:[%s6162_s4 + $0x3] ss:$0 sm:$0xff] }
  0x88   : > { %3078 = vmatmul.msk.bf16.gmra.mxu0 %vm617_vm0, %v3133_v10  ;;  %3087 = vmatmul.msk.bf16.gmra.mxu1 %vm617_vm0, %v3142_v11 }
  0x98   : > { %3079 = vmatmul.msk.bf16.gmra.mxu0 %vm617_vm0, %v3134_v12  ;;  %3088 = vmatmul.msk.bf16.gmra.mxu1 %vm617_vm0, %v3143_v13  ;;  %v1479_v13 = vadd.f32 %v1447_v2, %v1413_v1 }
  0xa8   : > { %3080 = vmatmul.msk.bf16.gmra.mxu0 %vm617_vm0, %v3135_v14  ;;  %3089 = vmatmul.msk.bf16.gmra.mxu1 %vm617_vm0, %v3144_v15 }
  0xb8   : > { %3081 = vmatmul.msk.bf16.gmra.mxu0 %vm617_vm0, %v3136_v16 }
  0xc5   : > { %v675_v20 = vpop.f32.mrf.mxu0  ;;  %v720_v21 = vpop.f32.mrf.mxu1 }
  0xc6   : > { %v759_v22 = vmul.f32 %v4035_v17, %v675_v20  ;;  %v777_v23 = vmul.f32 %v4035_v17, %v720_v21  ;;  %v4111_v20 = vld [vmem:[%s6162_s4 + $0x4] ss:$0 sm:$0xff] }
  0xc8   : > { %v795_v24 = vadd.f32 %v4040_v18, %v759_v22  ;;  %v813_v25 = vadd.f32 %v4040_v18, %v777_v23  ;;  %3082 = vmatmul.msk.bf16.gmra.mxu0 %vm617_vm0, %v3137_v19 }
  0xca   : > { %v827_v26 = vsub.f32 0.0, %v795_v24  ;;  %v845_v27 = vsub.f32 0.0, %v813_v25 }
  0xcc   : > { %v859_v28 = vmul.f32 1.442695, %v827_v26  ;;  %v895_v29 = vmul.f32 1.442695, %v845_v27 }
  0xcd   : > { %v677_v30 = vpop.f32.mrf.mxu0  ;;  %v722_v31 = vpop.f32.mrf.mxu1 }
  0xce   : > { %3311 = vpow2.f32 %v859_v28  ;;  %v760_v32 = vmul.f32 %v4035_v17, %v677_v30  ;;  %v778_v33 = vmul.f32 %v4035_v17, %v722_v31 }
  0xcf   : > { %3313 = vpow2.f32 %v895_v29 }
  0xd0   : > { %v4051_v34 = vadd.f32 %v4040_v18, %v760_v32  ;;  %v4054_v35 = vadd.f32 %v4040_v18, %v778_v33 }
  0xd2   : > { %v828_v36 = vsub.f32 0.0, %v4051_v34  ;;  %v846_v37 = vsub.f32 0.0, %v4054_v35 }
  0xd4   : > { %v3312_v38 = vpop.eup %3311  ;;  %v861_v40 = vmul.f32 1.442695, %v828_v36  ;;  %v897_v46 = vmul.f32 1.442695, %v846_v37 }
  0xd5   : > { %v3314_v41 = vpop.eup %3313  ;;  %v923_v42 = vadd.f32 1.0, %v3312_v38  ;;  %v680_v47 = vpop.f32.mrf.mxu0 }
  0xd6   : > { %v725_v48 = vpop.f32.mrf.mxu1  ;;  %v941_v49 = vadd.f32 1.0, %v3314_v41  ;;  %3315 = vpow2.f32 %v861_v40  ;;  %v761_v50 = vmul.f32 %v4035_v17, %v680_v47 }
  0xd7   : > { %v779_v51 = vmul.f32 %v4035_v17, %v725_v48  ;;  %3317 = vrcp.f32 %v923_v42  ;;  %v4138_v48 = vld [vmem:[%s6162_s4 + $0x5] ss:$0 sm:$0xff] }
  0xd8   : > { %3319 = vrcp.f32 %v941_v49  ;;  %v4073_v53 = vadd.f32 %v4040_v18, %v761_v50 }
  0xd9   : > { %v4076_v54 = vadd.f32 %v4040_v18, %v779_v51  ;;  %3321 = vpow2.f32 %v897_v46 }
  0xda   : > { %v829_v59 = vsub.f32 0.0, %v4073_v53 }
  0xdb   : > { %v847_v60 = vsub.f32 0.0, %v4076_v54 }
  0xdc   : > { %v3316_v62 = vpop.eup %3315  ;;  %v863_v63 = vmul.f32 1.442695, %v829_v59 }
  0xdd   : > { %v3318_v0 = vpop.eup %3317  ;;  %v924_v3 = vadd.f32 1.0, %v3316_v62  ;;  %v682_v4 = vpop.f32.mrf.mxu0  ;;  %v899_v7 = vmul.f32 1.442695, %v847_v60 }
  0xde   : > { %v3320_v5 = vpop.eup %3319  ;;  %v987_v6 = vmul.f32 %v3318_v0, %v795_v24  ;;  %3323 = vpow2.f32 %v863_v63  ;;  %v762_v11 = vmul.f32 %v4035_v17, %v682_v4  ;;  %v727_v23 = vpop.f32.mrf.mxu1 }
  0xdf   : > { %v3322_v8 = vpop.eup %3321  ;;  %v4100_v10 = vmul.f32 %v3320_v5, %v813_v25  ;;  %3325 = vrcp.f32 %v924_v3  ;;  %v780_v27 = vmul.f32 %v4035_v17, %v727_v23 }
  0xe0   : > { %v1132_v12 = vrot.slane %v987_v6, 7  ;;  %v942_v16 = vadd.f32 1.0, %v3322_v8  ;;  %3327 = vpow2.f32 %v899_v7  ;;  %v4121_v22 = vadd.f32 %v4040_v18, %v762_v11 }
  0xe1   : > { %v1159_v14 = vrot.slane %v4100_v10, 7  ;;  %v1401_v26 = vmul.f32 %v4068_v45, %v4100_v10  ;;  %v1383_v33 = vmul.f32 %v4068_v45, %v987_v6  ;;  %v1225_v37 = vrot.slane %v987_v6, 1 }
  0xe2   : > { %v1219_v15 = vsel %vm1185_vm1, %v4063_v44, %v1132_v12  ;;  %3329 = vrcp.f32 %v942_v16  ;;  %v830_v32 = vsub.f32 0.0, %v4121_v22  ;;  %v1579_v38 = vmul.f32 %v4111_v20, %v987_v6 }
  0xe3   : > { %v1513_v19 = vmul.f32 %v4098_v9, %v1219_v15  ;;  %v4118_v21 = vsel %vm1185_vm1, %v4063_v44, %v1159_v14  ;;  %v1317_v25 = vmul.f32 %v4061_v39, %v1219_v15  ;;  %v1252_v43 = vrot.slane %v4100_v10, 1 }
  0xe4   : > { %v3324_v24 = vpop.eup %3323  ;;  %v1335_v30 = vmul.f32 %v4061_v39, %v4118_v21  ;;  %v865_v40 = vmul.f32 1.442695, %v830_v32  ;;  %v4141_v51 = vadd.f32 %v4040_v18, %v780_v27 }
  0xe5   : > { %v3326_v28 = vpop.eup %3325  ;;  %v1545_v29 = vadd.f32 %v1513_v19, %v1479_v13  ;;  %v925_v31 = vadd.f32 1.0, %v3324_v24  ;;  %v1415_v42 = vadd.f32 %v1383_v33, %v1317_v25  ;;  %v685_v1 = vpop.f32.mrf.mxu0 }
  0xe6   : > { %v988_v36 = vmul.f32 %v3326_v28, %v4051_v34  ;;  %v3328_v41 = vpop.eup %3327  ;;  %v1433_v34 = vadd.f32 %v1401_v26, %v1335_v30  ;;  %v763_v19 = vmul.f32 %v4035_v17, %v685_v1 }
  0xe7   : > { %3331 = vrcp.f32 %v925_v31  ;;  %v1611_v49 = vadd.f32 %v1579_v38, %v1545_v29  ;;  %v943_v50 = vadd.f32 1.0, %v3328_v41  ;;  %v848_v38 = vsub.f32 0.0, %v4141_v51 }
  0xe8   : > { %v1133_v46 = vrot.slane %v988_v36, 7  ;;  %v1226_v47 = vrot.slane %v988_v36, 1  ;;  %v3330_v52 = vpop.eup %3329  ;;  %v1384_v60 = vmul.f32 %v4068_v45, %v988_v36  ;;  %3333 = vpow2.f32 %v865_v40  ;;  %v4201_v40 = vld [vmem:[%s6162_s4 + $0x7] ss:$0 sm:$0xff] }
  0xe9   : > { %v1580_v2 = vmul.f32 %v4111_v20, %v988_v36  ;;  %v4157_v4 = vmul.f32 %v3330_v52, %v4054_v35  ;;  %3335 = vrcp.f32 %v943_v50  ;;  %v4195_v36 = vld [vmem:[%s6162_s4 + $0x6] ss:$0 sm:$0xff]  ;;  %v4204_v41 = vadd.f32 %v4040_v18, %v763_v19 }
  0xea   : > { %v1218_v56 = vsel %vm1185_vm1, %v1132_v12, %v1133_v46  ;;  %v1309_v57 = vsel %vm1276_vm2, %v1226_v47, %v4078_v55  ;;  %v1310_v59 = vsel %vm1276_vm2, %v1225_v37, %v1226_v47 }
  0xeb   : > { %v1318_v62 = vmul.f32 %v4061_v39, %v1218_v56  ;;  %v1449_v63 = vmul.f32 %v4086_v58, %v1310_v59  ;;  %v1514_v0 = vmul.f32 %v4098_v9, %v1218_v56  ;;  %v1645_v3 = vmul.f32 %v4138_v48, %v1310_v59 }
  0xec   : > { %v1450_v7 = vmul.f32 %v4086_v58, %v1309_v57  ;;  %v1160_v15 = vrot.slane %v4157_v4, 7  ;;  %v1253_v16 = vrot.slane %v4157_v4, 1  ;;  %v1646_v35 = vmul.f32 %v4138_v48, %v1309_v57 }
  0xed   : > { %v3332_v5 = vpop.eup %3331  ;;  %v1416_v6 = vadd.f32 %v1384_v60, %v1318_v62  ;;  %v1481_v8 = vadd.f32 %v1449_v63, %v1415_v42  ;;  %v1546_v11 = vadd.f32 %v1514_v0, %v1479_v13  ;;  %v1677_v12 = vadd.f32 %v1645_v3, %v1611_v49 }
  0xee   : > { %v1402_v25 = vmul.f32 %v4068_v45, %v4157_v4  ;;  %v4172_v13 = vsel %vm1185_vm1, %v1159_v14, %v1160_v15  ;;  %v4177_v26 = vsel %vm1276_vm2, %v1253_v16, %v4078_v55  ;;  %v4181_v27 = vsel %vm1276_vm2, %v1252_v43, %v1253_v16  ;;  %v3334_v29 = vpop.eup %3333 }
  0xef   : > { %v4163_v23 = vadd.f32 %v1450_v7, %v1416_v6  ;;  %v1612_v24 = vadd.f32 %v1580_v2, %v1546_v11  ;;  %v989_v28 = vmul.f32 %v3332_v5, %v4073_v53  ;;  %v1336_v31 = vmul.f32 %v4061_v39, %v4172_v13  ;;  %v3336_v33 = vpop.eup %3335  ;;  %v687_v7 = vpop.f32.mrf.mxu0 }
  0xf0   : > { %v1467_v14 = vmul.f32 %v4086_v58, %v4181_v27  ;;  %v1468_v32 = vmul.f32 %v4086_v58, %v4177_v26  ;;  %v4212_v46 = vmul.f32 %v3336_v33, %v4076_v54  ;;  %v926_v52 = vadd.f32 1.0, %v3334_v29 }
  0xf1   : > { %v4184_v30 = vadd.f32 %v1646_v35, %v1612_v24  ;;  %v1434_v37 = vadd.f32 %v1402_v25, %v1336_v31  ;;  %v1135_v53 = vrot.slane %v989_v28, 7  ;;  %v901_v57 = vmul.f32 1.442695, %v848_v38  ;;  %v4240_v35 = vld [vmem:[%s6162_s4 + $0x8] ss:$0 sm:$0xff] }
  0xf2   : > { %v1499_v47 = vadd.f32 %v1467_v14, %v1433_v34  ;;  %v1162_v56 = vrot.slane %v4212_v46, 7  ;;  %v1581_v60 = vmul.f32 %v4111_v20, %v989_v28  ;;  %v1777_v63 = vmul.f32 %v4201_v40, %v989_v28 }
  0xf3   : > { %v4206_v42 = vadd.f32 %v1468_v32, %v1434_v37  ;;  %v1217_v43 = vsel %vm1185_vm1, %v4063_v44, %v1135_v53  ;;  %3337 = vrcp.f32 %v926_v52  ;;  %v831_v34 = vsub.f32 0.0, %v4204_v41 }
  0xf4   : > { %v1515_v49 = vmul.f32 %v4098_v9, %v1217_v43  ;;  %v1711_v50 = vmul.f32 %v4195_v36, %v1217_v43  ;;  %v4224_v54 = vsel %vm1185_vm1, %v4063_v44, %v1162_v56  ;;  %v1599_v3 = vmul.f32 %v4111_v20, %v4212_v46 }
  0xf5   : > { %v1533_v2 = vmul.f32 %v4098_v9, %v4224_v54  ;;  %3339 = vpow2.f32 %v901_v57  ;;  %v867_v5 = vmul.f32 1.442695, %v831_v34  ;;  %v764_v15 = vmul.f32 %v4035_v17, %v687_v7 }
  0xf6   : > { %v1547_v59 = vadd.f32 %v1515_v49, %v1481_v8  ;;  %v1743_v62 = vadd.f32 %v1711_v50, %v1677_v12  ;;  %v1319_v12 = vmul.f32 %v4061_v39, %v1217_v43  ;;  %v1385_v24 = vmul.f32 %v4068_v45, %v989_v28 }
  0xf7   : > { %v1565_v6 = vadd.f32 %v1533_v2, %v1499_v47  ;;  %3341 = vpow2.f32 %v867_v5  ;;  %v1228_v25 = vrot.slane %v989_v28, 1  ;;  %v4244_v38 = vadd.f32 %v4040_v18, %v764_v15 }
  0xf8   : > { %v1613_v0 = vadd.f32 %v1581_v60, %v1547_v59  ;;  %v1809_v1 = vadd.f32 %v1777_v63, %v1743_v62  ;;  %v1417_v32 = vadd.f32 %v1385_v24, %v1319_v12 }
  0xf9   : > { %v4231_v8 = vadd.f32 %v1599_v3, %v1565_v6  ;;  %v3338_v11 = vpop.eup %3337 }
  0xfa   : > { %v990_v16 = vmul.f32 %v3338_v11, %v4121_v22 }
  0xfb   : > { %v3340_v19 = vpop.eup %3339 }
  0xfc   : > { %v1136_v29 = vrot.slane %v990_v16, 7  ;;  %v1229_v31 = vrot.slane %v990_v16, 1  ;;  %v1386_v33 = vmul.f32 %v4068_v45, %v990_v16  ;;  %v944_v37 = vadd.f32 1.0, %v3340_v19 }
  0xfd   : > { %v3342_v14 = vpop.eup %3341  ;;  %v1582_v57 = vmul.f32 %v4111_v20, %v990_v16  ;;  %v1778_v60 = vmul.f32 %v4201_v40, %v990_v16 }
  0xfe   : > { %v1216_v22 = vsel %vm1185_vm1, %v1135_v53, %v1136_v29  ;;  %v1307_v43 = vsel %vm1276_vm2, %v1229_v31, %v4078_v55  ;;  %v1308_v28 = vsel %vm1276_vm2, %v1228_v25, %v1229_v31  ;;  %v927_v47 = vadd.f32 1.0, %v3342_v14 }
  0xff   : > { %v1320_v49 = vmul.f32 %v4061_v39, %v1216_v22  ;;  %v1451_v50 = vmul.f32 %v4086_v58, %v1308_v28  ;;  %v1516_v52 = vmul.f32 %v4098_v9, %v1216_v22  ;;  %v1647_v59 = vmul.f32 %v4138_v48, %v1308_v28 }
 0x100   : > { %v1712_v53 = vmul.f32 %v4195_v36, %v1216_v22  ;;  %v1843_v62 = vmul.f32 %v4240_v35, %v1308_v28  ;;  %v1452_v34 = vmul.f32 %v4086_v58, %v1307_v43  ;;  %3343 = vrcp.f32 %v944_v37 }
 0x101   : > { %v1418_v63 = vadd.f32 %v1386_v33, %v1320_v49  ;;  %v1548_v2 = vadd.f32 %v1516_v52, %v4163_v23  ;;  %3345 = vrcp.f32 %v927_v47  ;;  %v1483_v6 = vadd.f32 %v1451_v50, %v1417_v32 }
 0x102   : > { %v1744_v3 = vadd.f32 %v1712_v53, %v4184_v30  ;;  %v4264_v5 = vadd.f32 %v1843_v62, %v1809_v1  ;;  %v1648_v12 = vmul.f32 %v4138_v48, %v1307_v43  ;;  %v1679_v15 = vadd.f32 %v1647_v59, %v1613_v0  ;;  %v690_v30 = vpop.f32.mrf.mxu0  ;;  %v730_v0 = vpop.f32.mrf.mxu1 }
 0x103   : > { %v4266_v7 = vadd.f32 %v1452_v34, %v1418_v63  ;;  %v1614_v11 = vadd.f32 %v1582_v57, %v1548_v2  ;;  %v1844_v19 = vmul.f32 %v4240_v35, %v1307_v43  ;;  %v832_v23 = vsub.f32 0.0, %v4244_v38 }
 0x104   : > { %v1810_v16 = vadd.f32 %v1778_v60, %v1744_v3  ;;  %v1255_v14 = vrot.slane %v4212_v46, 1  ;;  %v765_v33 = vmul.f32 %v4035_v17, %v690_v30  ;;  %v781_v28 = vmul.f32 %v4035_v17, %v730_v0 }
 0x105   : > { %v4270_v24 = vadd.f32 %v1648_v12, %v1614_v11  ;;  %v869_v43 = vmul.f32 1.442695, %v832_v23 }
 0x106   : > { %v4272_v25 = vadd.f32 %v1844_v19, %v1810_v16  ;;  %v3344_v1 = vpop.eup %3343  ;;  %v4302_v50 = vadd.f32 %v4040_v18, %v765_v33 }
 0x107   : > { %v3346_v29 = vpop.eup %3345  ;;  %v4276_v31 = vmul.f32 %v3344_v1, %v4141_v51  ;;  %3347 = vpow2.f32 %v869_v43 }
 0x108   : > { %v4280_v32 = vmul.f32 %v3346_v29, %v4204_v41  ;;  %v833_v53 = vsub.f32 0.0, %v4302_v50 }
 0x109   : > { %v1163_v37 = vrot.slane %v4276_v31, 7  ;;  %v6183_v22 = vrot.slane %v4276_v31, 1 }
 0x10a   : > { %v1138_v47 = vrot.slane %v4280_v32, 7  ;;  %v732_v34 = vpop.f32.mrf.mxu1  ;;  %v1779_v12 = vmul.f32 %v4201_v40, %v4280_v32  ;;  %v871_v19 = vmul.f32 1.442695, %v833_v53 }
 0x10b   : > { %v4290_v51 = vsel %vm1185_vm1, %v1162_v56, %v1163_v37  ;;  %v4297_v41 = vsel %vm1276_vm2, %v1255_v14, %v6183_v22  ;;  %v4308_v56 = vadd.f32 %v4040_v18, %v781_v28  ;;  %v782_v1 = vmul.f32 %v4035_v17, %v732_v34 }
 0x10c   : > { %v1534_v49 = vmul.f32 %v4098_v9, %v4290_v51  ;;  %v1665_v57 = vmul.f32 %v4138_v48, %v4297_v41  ;;  %v1215_v59 = vsel %vm1185_vm1, %v4063_v44, %v1138_v47  ;;  %3349 = vpow2.f32 %v871_v19 }
 0x10d   : > { %v1517_v60 = vmul.f32 %v4098_v9, %v1215_v59  ;;  %v1713_v62 = vmul.f32 %v4195_v36, %v1215_v59  ;;  %v849_v63 = vsub.f32 0.0, %v4308_v56  ;;  %v3348_v2 = vpop.eup %3347  ;;  %v4330_v0 = vadd.f32 %v4040_v18, %v782_v1 }
 0x10e   : > { %v4305_v52 = vadd.f32 %v1534_v49, %v4206_v42  ;;  %v1583_v42 = vmul.f32 %v4111_v20, %v4280_v32  ;;  %v4324_v16 = vadd.f32 %v1665_v57, %v4231_v8  ;;  %v928_v29 = vadd.f32 1.0, %v3348_v2 }
 0x10f   : > { %v1549_v3 = vadd.f32 %v1517_v60, %v1483_v6  ;;  %v1745_v11 = vadd.f32 %v1713_v62, %v1679_v15  ;;  %v903_v14 = vmul.f32 1.442695, %v849_v63  ;;  %v692_v6 = vpop.f32.mrf.mxu0  ;;  %v850_v15 = vsub.f32 0.0, %v4330_v0  ;;  %v4342_v63 = vld [vmem:[%s6163_s5] ss:$0 sm:$0xff] }
 0x110   : > { %3351 = vrcp.f32 %v928_v29  ;;  %v766_v8 = vmul.f32 %v4035_v17, %v692_v6  ;;  %v1231_v49 = vrot.slane %v4280_v32, 1 }
 0x111   : > { %v4326_v23 = vadd.f32 %v1583_v42, %v1549_v3  ;;  %v1811_v30 = vadd.f32 %v1779_v12, %v1745_v11  ;;  %3353 = vpow2.f32 %v903_v14  ;;  %v905_v57 = vmul.f32 1.442695, %v850_v15 }
 0x112   : > { %v3350_v33 = vpop.eup %3349  ;;  %v4337_v42 = vadd.f32 %v4040_v18, %v766_v8 }
 0x113   : > { %v929_v62 = vadd.f32 1.0, %v3350_v33  ;;  %3355 = vpow2.f32 %v905_v57 }
 0x114   : > { %v834_v14 = vsub.f32 0.0, %v4337_v42 }
 0x115   : > { %3357 = vrcp.f32 %v929_v62 }
 0x116   : > { %v3352_v37 = vpop.eup %3351 }
 0x117   : > { %v992_v43 = vmul.f32 %v3352_v37, %v4244_v38  ;;  %v3354_v28 = vpop.eup %3353  ;;  %v1911_v37 = vmul.f32 %v4342_v63, %v4264_v5  ;;  %v695_v22 = vpop.f32.mrf.mxu0 }
 0x118   : > { %v945_v34 = vadd.f32 1.0, %v3354_v28 }
 0x119   : > { %v1139_v53 = vrot.slane %v992_v43, 7  ;;  %v1232_v60 = vrot.slane %v992_v43, 1  ;;  %v1388_v12 = vmul.f32 %v4068_v45, %v992_v43  ;;  %v1584_v8 = vmul.f32 %v4111_v20, %v992_v43 }
 0x11a   : > { %3359 = vrcp.f32 %v945_v34 }
 0x11b   : > { %v1214_v2 = vsel %vm1185_vm1, %v1138_v47, %v1139_v53  ;;  %v1305_v38 = vsel %vm1276_vm2, %v1232_v60, %v4078_v55  ;;  %v1306_v3 = vsel %vm1276_vm2, %v1231_v49, %v1232_v60  ;;  %v735_v47 = vpop.f32.mrf.mxu1  ;;  %v1780_v49 = vmul.f32 %v4201_v40, %v992_v43  ;;  %v4369_v53 = vld [vmem:[%s6164_s6] ss:$0 sm:$0xff] }
 0x11c   : > { %v1322_v11 = vmul.f32 %v4061_v39, %v1214_v2  ;;  %v1518_v19 = vmul.f32 %v4098_v9, %v1214_v2  ;;  %v1714_v1 = vmul.f32 %v4195_v36, %v1214_v2  ;;  %v1845_v29 = vmul.f32 %v4240_v35, %v1306_v3 }
 0x11d   : > { %v1454_v15 = vmul.f32 %v4086_v58, %v1305_v38  ;;  %v1321_v60 = vmul.f32 %v4061_v39, %v1215_v59  ;;  %v1650_v2 = vmul.f32 %v4138_v48, %v1305_v38  ;;  %v1846_v5 = vmul.f32 %v4240_v35, %v1305_v38 }
 0x11e   : > { %v1420_v6 = vadd.f32 %v1388_v12, %v1322_v11  ;;  %v1550_v33 = vadd.f32 %v1518_v19, %v4266_v7  ;;  %v1746_v28 = vadd.f32 %v1714_v1, %v4270_v24  ;;  %v4364_v57 = vadd.f32 %v1845_v29, %v1811_v30  ;;  %v3356_v12 = vpop.eup %3355 }
 0x11f   : > { %v873_v24 = vmul.f32 1.442695, %v834_v14  ;;  %v1387_v30 = vmul.f32 %v4068_v45, %v4280_v32  ;;  %v1453_v43 = vmul.f32 %v4086_v58, %v1306_v3  ;;  %v1649_v19 = vmul.f32 %v4138_v48, %v1306_v3  ;;  %v3358_v59 = vpop.eup %3357 }
 0x120   : > { %v4372_v62 = vadd.f32 %v1454_v15, %v1420_v6  ;;  %v1616_v7 = vadd.f32 %v1584_v8, %v1550_v33  ;;  %v1812_v11 = vadd.f32 %v1780_v49, %v1746_v28  ;;  %v4385_v6 = vadd.f32 %v4369_v53, %v1911_v37  ;;  %v3360_v49 = vpop.eup %3359 }
 0x121   : > { %v1419_v15 = vadd.f32 %v1387_v30, %v1321_v60  ;;  %v1912_v38 = vmul.f32 %v4342_v63, %v4272_v25  ;;  %v946_v14 = vadd.f32 1.0, %v3356_v12  ;;  %v783_v32 = vmul.f32 %v4035_v17, %v735_v47 }
 0x122   : > { %v4380_v1 = vadd.f32 %v1650_v2, %v1616_v7  ;;  %v4382_v29 = vadd.f32 %v1846_v5, %v1812_v11  ;;  %3361 = vpow2.f32 %v873_v24  ;;  %v4391_v33 = vmul.f32 %v3358_v59, %v4302_v50 }
 0x123   : > { %v1485_v3 = vadd.f32 %v1453_v43, %v1419_v15  ;;  %v1681_v8 = vadd.f32 %v1649_v19, %v4326_v23  ;;  %v737_v34 = vpop.f32.mrf.mxu1  ;;  %v1979_v28 = vsub.f32 0.0, %v4385_v6  ;;  %v4397_v60 = vadd.f32 %v4369_v53, %v1912_v38 }
 0x124   : > { %v6182_v37 = vrot.slane %v4391_v33, 7  ;;  %3363 = vrcp.f32 %v946_v14  ;;  %v4400_v25 = vadd.f32 %v4040_v18, %v783_v32  ;;  %v4404_v50 = vmul.f32 %v4111_v20, %v4100_v10 }
 0x125   : > { %v784_v47 = vmul.f32 %v4035_v17, %v737_v34  ;;  %v4416_v2 = vmul.f32 %v4098_v9, %v4118_v21  ;;  %v4420_v11 = vmul.f32 %v4195_v36, %v4118_v21  ;;  %v4424_v5 = vmul.f32 %v4201_v40, %v4100_v10 }
 0x126   : > { %6223 = vst [vmem:[#allocation16_spill] sm:$0xff] %v4404_v50  ;;  %v4411_v23 = vsel %vm1185_vm1, %v4063_v44, %v6182_v37  ;;  %v4430_v12 = vmul.f32 %v4111_v20, %v4157_v4  ;;  %v2011_v30 = vmul.f32 1.442695, %v1979_v28  ;;  %v4433_v43 = vmul.f32 %v3360_v49, %v4308_v56 }
 0x127   : > { %6224 = vst [vmem:[#allocation17_spill] sm:$0xff] %v4416_v2  ;;  %v1519_v24 = vmul.f32 %v4098_v9, %v4411_v23  ;;  %v1715_v19 = vmul.f32 %v4195_v36, %v4411_v23  ;;  %v1980_v21 = vsub.f32 0.0, %v4397_v60  ;;  %v1585_v10 = vmul.f32 %v4111_v20, %v4391_v33 }
 0x128   : > { %v3362_v7 = vpop.eup %3361  ;;  %6225 = vst [vmem:[#allocation18_spill] sm:$0xff] %v4420_v11  ;;  %v851_v15 = vsub.f32 0.0, %v4400_v25  ;;  %v1781_v14 = vmul.f32 %v4201_v40, %v4391_v33  ;;  %v4444_v34 = vadd.f32 %v4040_v18, %v784_v47  ;;  %v4448_v28 = vmul.f32 %v4098_v9, %v4172_v13 }
 0x129   : > { %6226 = vst [vmem:[#allocation19_spill] sm:$0xff] %v4424_v5  ;;  %v1551_v59 = vadd.f32 %v1519_v24, %v1485_v3  ;;  %v1747_v38 = vadd.f32 %v1715_v19, %v1681_v8  ;;  %v930_v32 = vadd.f32 1.0, %v3362_v7  ;;  %v4452_v3 = vmul.f32 %v4201_v40, %v4157_v4 }
 0x12a   : > { %6227 = vst [vmem:[#allocation20_spill] sm:$0xff] %v4430_v12  ;;  %v3364_v56 = vpop.eup %3363  ;;  %v1403_v49 = vmul.f32 %v4068_v45, %v4212_v46  ;;  %v1337_v7 = vmul.f32 %v4061_v39, %v4224_v54  ;;  %3365 = vpow2.f32 %v2011_v30  ;;  %v1165_v47 = vrot.slane %v4433_v43, 7 }
 0x12b   : > { %6228 = vst [vmem:[#allocation21_spill] sm:$0xff] %v4448_v28  ;;  %v4456_v8 = vadd.f32 %v1585_v10, %v1551_v59  ;;  %v4461_v24 = vadd.f32 %v1781_v14, %v1747_v38  ;;  %v4465_v19 = vmul.f32 %v4138_v48, %v4181_v27  ;;  %v1600_v4 = vmul.f32 %v4111_v20, %v4276_v31 }
 0x12c   : > { %6229 = vst [vmem:[#allocation22_spill] sm:$0xff] %v4452_v3  ;;  %v907_v37 = vmul.f32 1.442695, %v851_v15  ;;  %3367 = vrcp.f32 %v930_v32  ;;  %v2013_v59 = vmul.f32 1.442695, %v1980_v21  ;;  %v6231_v10 = vrot.slane %v4276_v31, 1 }
 0x12d   : > { %6230 = vst [vmem:[#allocation23_spill] sm:$0xff] %v4465_v19  ;;  %v4477_v38 = vmul.f32 %v3364_v56, %v4330_v0  ;;  %v852_v14 = vsub.f32 0.0, %v4444_v34  ;;  %v4482_v3 = vmul.f32 %v4138_v48, %v4177_v26  ;;  %v4486_v15 = vmul.f32 %v4195_v36, %v4172_v13 }
 0x12e   : > { %v4474_v30 = vsel %vm1276_vm2, %v6231_v10, %v4078_v55  ;;  %v4490_v21 = vmul.f32 %v4240_v35, %v4181_v27  ;;  %v4494_v32 = vmul.f32 %v4240_v35, %v4177_v26  ;;  %v1435_v0 = vadd.f32 %v1403_v49, %v1337_v7 }
 0x12f   : > { %6232 = vst [vmem:[#allocation24_spill] sm:$0xff] %v4482_v3  ;;  %v1338_v56 = vmul.f32 %v4061_v39, %v4290_v51  ;;  %v1404_v10 = vmul.f32 %v4068_v45, %v4276_v31  ;;  %v4503_v13 = vsel %vm1185_vm1, %v4063_v44, %v1165_v47  ;;  %v1469_v27 = vmul.f32 %v4086_v58, %v4297_v41 }
 0x130   : > { %6233 = vst [vmem:[#allocation25_spill] sm:$0xff] %v4486_v15  ;;  %v1666_v3 = vmul.f32 %v4138_v48, %v4474_v30  ;;  %v1913_v26 = vmul.f32 %v4342_v63, %v4364_v57  ;;  %3369 = vpow2.f32 %v907_v37  ;;  %v3366_v49 = vpop.eup %3365  ;;  %v1632_v7 = vadd.f32 %v1600_v4, %v4305_v52 }
 0x131   : > { %6234 = vst [vmem:[#allocation26_spill] sm:$0xff] %v4490_v21  ;;  %3371 = vpow2.f32 %v2013_v59  ;;  %v909_v21 = vmul.f32 1.442695, %v852_v14  ;;  %v4515_v19 = vmul.f32 %v4195_v36, %v4224_v54  ;;  %v4519_v12 = vmul.f32 %v4201_v40, %v4212_v46 }
 0x132   : > { %6235 = vst [vmem:[#allocation27_spill] sm:$0xff] %v4494_v32  ;;  %v1166_v32 = vrot.slane %v4477_v38, 7  ;;  %v3368_v15 = vpop.eup %3367  ;;  %v4523_v57 = vmul.f32 %v4201_v40, %v4276_v31  ;;  %v1731_v37 = vmul.f32 %v4195_v36, %v4503_v13  ;;  %v1258_v52 = vrot.slane %v4433_v43, 1 }
 0x133   : > { %6236 = vst [vmem:[#allocation28_spill] sm:$0xff] %v4515_v19  ;;  %v1259_v4 = vrot.slane %v4477_v38, 1  ;;  %v4530_v59 = vmul.f32 %v3368_v15, %v4337_v42  ;;  %v767_v54 = vmul.f32 %v4035_v17, %v695_v22  ;;  %v2075_v14 = vadd.f32 1.0, %v3366_v49  ;;  %v4566_v49 = vpop.f32.mrf.mxu1 }
 0x134   : > { %6237 = vst [vmem:[#allocation29_spill] sm:$0xff] %v4519_v12  ;;  %v1436_v19 = vadd.f32 %v1404_v10, %v1338_v56  ;;  %v1470_v46 = vmul.f32 %v4086_v58, %v4474_v30  ;;  %v4536_v31 = vadd.f32 %v4369_v53, %v1913_v26  ;;  %v1501_v12 = vadd.f32 %v1469_v27, %v1435_v0  ;;  %v697_v10 = vpop.f32.mrf.mxu0 }
 0x135   : > { %6238 = vst [vmem:[#allocation30_spill] sm:$0xff] %v4523_v57  ;;  %v1698_v57 = vadd.f32 %v1666_v3, %v1632_v7  ;;  %v4540_v5 = vsel %vm1185_vm1, %v1165_v47, %v1166_v32  ;;  %3373 = vpow2.f32 %v909_v21  ;;  %v1763_v42 = vadd.f32 %v1731_v37, %v4324_v16 }
 0x136   : > { %6239 = vst [vmem:[#allocation31_spill] sm:$0xff] %v4536_v31  ;;  %v3370_v50 = vpop.eup %3369  ;;  %v1797_v22 = vmul.f32 %v4201_v40, %v4433_v43  ;;  %v1142_v15 = vrot.slane %v4530_v59, 7  ;;  %v6184_v56 = vrot.slane %v4530_v59, 1  ;;  %v1914_v3 = vmul.f32 %v4342_v63, %v4382_v29 }
 0x137   : > { %v3372_v26 = vpop.eup %3371  ;;  %v4551_v47 = vsel %vm1276_vm2, %v1258_v52, %v1259_v4  ;;  %v1234_v21 = vrot.slane %v4391_v33, 1  ;;  %v4555_v16 = vadd.f32 %v4040_v18, %v767_v54  ;;  %3375 = vrcp.f32 %v2075_v14 }
 0x138   : > { %v1981_v32 = vsub.f32 0.0, %v4536_v31  ;;  %v1732_v0 = vmul.f32 %v4195_v36, %v4540_v5  ;;  %v6241_v27 = vrot.slane %v4391_v33, 7  ;;  %v947_v7 = vadd.f32 1.0, %v3370_v50 }
 0x139   : > { %6240 = vst [vmem:[#allocation32_spill] sm:$0xff] %v4555_v16  ;;  %v4572_v37 = vsel %vm1276_vm2, %v1234_v21, %v6184_v56  ;;  %v768_v54 = vmul.f32 %v4035_v17, %v697_v10  ;;  %v2076_v14 = vadd.f32 1.0, %v3372_v26  ;;  %v1829_v28 = vadd.f32 %v1797_v22, %v1763_v42 }
 0x13a   : > { %v4564_v29 = vsel %vm1185_vm1, %v6241_v27, %v1142_v15  ;;  %v1863_v15 = vmul.f32 %v4240_v35, %v4551_v47  ;;  %v1535_v11 = vmul.f32 %v4098_v9, %v4503_v13  ;;  %v4584_v21 = vadd.f32 %v4369_v53, %v1914_v3 }
 0x13b   : > { %6242 = vst [vmem:[#allocation33_spill] sm:$0xff] %v4564_v29  ;;  %v1520_v52 = vmul.f32 %v4098_v9, %v4564_v29  ;;  %v1716_v27 = vmul.f32 %v4195_v36, %v4564_v29  ;;  %v3374_v50 = vpop.eup %3373  ;;  %v835_v10 = vsub.f32 0.0, %v4555_v16  ;;  %v1764_v26 = vadd.f32 %v1732_v0, %v1698_v57 }
 0x13c   : > { %v1798_v42 = vmul.f32 %v4201_v40, %v4477_v38  ;;  %v1847_v2 = vmul.f32 %v4240_v35, %v4572_v37  ;;  %v2015_v29 = vmul.f32 1.442695, %v1981_v32  ;;  %v1287_v3 = vsel %vm1276_vm2, %v1259_v4, %v4078_v55 }
 0x13d   : > { %v4587_v56 = vadd.f32 %v1520_v52, %v4372_v62  ;;  %v1748_v22 = vadd.f32 %v1716_v27, %v4380_v1  ;;  %3377 = vrcp.f32 %v947_v7  ;;  %v4599_v62 = vadd.f32 %v4040_v18, %v768_v54  ;;  %v3376_v52 = vpop.eup %3375 }
 0x13e   : > { %v1405_v57 = vmul.f32 %v4068_v45, %v4433_v43  ;;  %v1895_v0 = vadd.f32 %v1863_v15, %v1829_v28  ;;  %v948_v1 = vadd.f32 1.0, %v3374_v50  ;;  %3379 = vrcp.f32 %v2076_v14 }
 0x13f   : > { %6243 = vst [vmem:[#allocation34_spill] sm:$0xff] %v4587_v56  ;;  %v4604_v56 = vadd.f32 %v1847_v2, %v4461_v24  ;;  %v1339_v32 = vmul.f32 %v4061_v39, %v4503_v13  ;;  %v1601_v4 = vmul.f32 %v4111_v20, %v4433_v43  ;;  %v1982_v7 = vsub.f32 0.0, %v4584_v21 }
 0x140   : > { %v1567_v54 = vadd.f32 %v1535_v11, %v1501_v12  ;;  %v1830_v27 = vadd.f32 %v1798_v42, %v1764_v26  ;;  %v1864_v16 = vmul.f32 %v4240_v35, %v1287_v3  ;;  %v875_v31 = vmul.f32 1.442695, %v835_v10  ;;  %v742_v12 = vpop.f32.mrf.mxu1 }
 0x141   : > { %v4614_v28 = vmul.f32 %v4195_v36, %v4290_v51  ;;  %v4618_v2 = vmul.f32 %v4240_v35, %v4297_v41  ;;  %3381 = vpow2.f32 %v2015_v29  ;;  %v836_v24 = vsub.f32 0.0, %v4599_v62 }
 0x142   : > { %v1502_v13 = vadd.f32 %v1470_v46, %v1436_v19  ;;  %v1536_v43 = vmul.f32 %v4098_v9, %v4540_v5  ;;  %v1931_v11 = vmul.f32 %v4342_v63, %v1895_v0  ;;  %3383 = vrcp.f32 %v948_v1 }
 0x143   : > { %6244 = vst [vmem:[#allocation35_spill] sm:$0xff] %v4614_v28  ;;  %v3378_v14 = vpop.eup %3377  ;;  %v4626_v51 = vmul.f32 %v4240_v35, %v4474_v30  ;;  %v4628_v15 = vadd.f32 %v1405_v57, %v1339_v32  ;;  %v2017_v41 = vmul.f32 1.442695, %v1982_v7  ;;  %v1651_v29 = vmul.f32 %v4138_v48, %v4572_v37 }
 0x144   : > { %6245 = vst [vmem:[#allocation36_spill] sm:$0xff] %v4618_v2  ;;  %v4633_v19 = vmul.f32 %v3376_v52, %v4385_v6  ;;  %v1633_v46 = vadd.f32 %v1601_v4, %v1567_v54  ;;  %v1896_v50 = vadd.f32 %v1864_v16, %v1830_v27  ;;  %3385 = vpow2.f32 %v875_v31  ;;  %v3380_v10 = vpop.eup %3379 }
 0x145   : > { %6246 = vst [vmem:[#allocation37_spill] sm:$0xff] %v4626_v51  ;;  %v1340_v26 = vmul.f32 %v4061_v39, %v4540_v5  ;;  %v1406_v30 = vmul.f32 %v4068_v45, %v4477_v38  ;;  %v877_v42 = vmul.f32 1.442695, %v836_v24  ;;  %v786_v57 = vmul.f32 %v4035_v17, %v742_v12 }
 0x146   : > { %6247 = vst [vmem:[#allocation38_spill] sm:$0xff] %v4633_v19  ;;  %v1568_v0 = vadd.f32 %v1536_v43, %v1502_v13  ;;  %v1602_v1 = vmul.f32 %v4111_v20, %v4477_v38  ;;  %v4643_v6 = vadd.f32 %v4369_v53, %v1931_v11  ;;  %v4646_v16 = vmul.f32 %v3378_v14, %v4400_v25 }
 0x147   : > { %v3382_v31 = vpop.eup %3381  ;;  %3387 = vpow2.f32 %v2017_v41  ;;  %v1782_v5 = vmul.f32 %v4201_v40, %v4530_v59  ;;  %v4651_v52 = vadd.f32 %v1651_v29, %v4456_v8  ;;  %v785_v32 = vmul.f32 %v4035_v17, %v4566_v49  ;;  %v700_v29 = vpop.f32.mrf.mxu0 }
 0x148   : > { %6248 = vst [vmem:[#allocation39_spill] sm:$0xff] %v4643_v6  ;;  %v3384_v4 = vpop.eup %3383  ;;  %v4656_v38 = vmul.f32 %v3380_v10, %v4397_v60  ;;  %v1472_v7 = vmul.f32 %v4086_v58, %v1287_v3  ;;  %v1932_v25 = vmul.f32 %v4342_v63, %v1896_v50  ;;  %v6250_v54 = vrot.slane %v4530_v59, 1 }
 0x149   : > { %v1438_v8 = vadd.f32 %v1406_v30, %v1340_v26  ;;  %v1814_v24 = vadd.f32 %v1782_v5, %v1748_v22  ;;  %3389 = vpow2.f32 %v877_v42  ;;  %v4668_v17 = vadd.f32 %v4040_v18, %v786_v57 }
 0x14a   : > { %6249 = vst [vmem:[#allocation40_spill] sm:$0xff] %v4656_v38  ;;  %v4665_v27 = vsel %vm1276_vm2, %v6250_v54, %v4078_v55  ;;  %v3386_v49 = vpop.eup %3385  ;;  %v1634_v60 = vadd.f32 %v1602_v1, %v1568_v0  ;;  %v1668_v13 = vmul.f32 %v4138_v48, %v1287_v3  ;;  %v1999_v43 = vsub.f32 0.0, %v4643_v6 }
 0x14b   : > { %v1168_v11 = vrot.slane %v4646_v16, 7  ;;  %v2077_v12 = vadd.f32 1.0, %v3382_v31  ;;  %v1848_v14 = vmul.f32 %v4240_v35, %v4665_v27  ;;  %v4676_v41 = vmul.f32 %v3384_v4, %v4444_v34 }
 0x14c   : > { %v4679_v22 = vadd.f32 %v4040_v18, %v785_v32  ;;  %v4683_v50 = vadd.f32 %v4656_v38, %v4633_v19  ;;  %v1471_v3 = vmul.f32 %v4086_v58, %v4551_v47  ;;  %v1667_v10 = vmul.f32 %v4138_v48, %v4551_v47 }
 0x14d   : > { %v4690_v26 = vadd.f32 %v4369_v53, %v1932_v25  ;;  %v3388_v30 = vpop.eup %3387  ;;  %v4692_v34 = vadd.f32 %v1472_v7, %v1438_v8  ;;  %v1880_v42 = vadd.f32 %v1848_v14, %v1814_v24  ;;  %v931_v18 = vadd.f32 1.0, %v3386_v49 }
 0x14e   : > { %v854_v57 = vsub.f32 0.0, %v4668_v17  ;;  %v1700_v0 = vadd.f32 %v1668_v13, %v1634_v60  ;;  %v2051_v1 = vmul.f32 1.442695, %v1999_v43  ;;  %v1389_v31 = vmul.f32 %v4068_v45, %v4391_v33 }
 0x14f   : > { %6251 = vst [vmem:[#allocation41_spill] sm:$0xff] %v4690_v26  ;;  %v1195_v58 = vsel %vm1185_vm1, %v4063_v44, %v1168_v11  ;;  %v3390_v47 = vpop.eup %3389  ;;  %3391 = vrcp.f32 %v2077_v12  ;;  %v1915_v5 = vmul.f32 %v4342_v63, %v4604_v56  ;;  %v1169_v32 = vrot.slane %v4676_v41, 7 }
 0x150   : > { %v853_v4 = vsub.f32 0.0, %v4679_v22  ;;  %v2078_v7 = vadd.f32 1.0, %v3388_v30  ;;  %v2000_v25 = vsub.f32 0.0, %v4690_v26  ;;  %v1323_v54 = vmul.f32 %v4061_v39, %v4411_v23 }
 0x151   : > { %v1699_v33 = vadd.f32 %v1667_v10, %v1633_v46  ;;  %v1733_v8 = vmul.f32 %v4195_v36, %v1195_v58  ;;  %v1916_v24 = vmul.f32 %v4342_v63, %v1880_v42  ;;  %3393 = vrcp.f32 %v931_v18  ;;  %v702_v18 = vpop.f32.mrf.mxu0 }
 0x152   : > { %v913_v49 = vmul.f32 1.442695, %v854_v57  ;;  %v1261_v60 = vrot.slane %v4646_v16, 1  ;;  %v1503_v56 = vadd.f32 %v1471_v3, %v4628_v15  ;;  %v1262_v13 = vrot.slane %v4676_v41, 1 }
 0x153   : > { %v932_v43 = vadd.f32 1.0, %v3390_v47  ;;  %3395 = vpow2.f32 %v2051_v1  ;;  %v4713_v12 = vadd.f32 %v4369_v53, %v1915_v5  ;;  %v4717_v39 = vsel %vm1185_vm1, %v1168_v11, %v1169_v32  ;;  %v4730_v11 = vld [vmem:[%s6162_s4] ss:$0 sm:$0xff] }
 0x154   : > { %v911_v23 = vmul.f32 1.442695, %v853_v4  ;;  %3397 = vrcp.f32 %v2078_v7  ;;  %v2053_v46 = vmul.f32 1.442695, %v2000_v25  ;;  %v1407_v14 = vmul.f32 %v4068_v45, %v4646_v16  ;;  %v4743_v32 = vld [vmem:[%s6160_s2] ss:$0 sm:$0xff] }
 0x155   : > { %v1537_v10 = vmul.f32 %v4098_v9, %v1195_v58  ;;  %v3392_v15 = vpop.eup %3391  ;;  %v1765_v3 = vadd.f32 %v1733_v8, %v1699_v33  ;;  %v1799_v30 = vmul.f32 %v4201_v40, %v4646_v16  ;;  %v4725_v42 = vadd.f32 %v4369_v53, %v1916_v24  ;;  %v6252_v4 = vld [vmem:[#allocation31_spill] sm:$0xff] }
 0x156   : > { %3399 = vpow2.f32 %v913_v49  ;;  %v1341_v57 = vmul.f32 %v4730_v11, %v1195_v58  ;;  %v4735_v45 = vsel %vm1276_vm2, %v1261_v60, %v1262_v13  ;;  %v1734_v9 = vmul.f32 %v4195_v36, %v4717_v39 }
 0x157   : > { %3401 = vrcp.f32 %v932_v43  ;;  %v3394_v1 = vpop.eup %3393  ;;  %v1421_v47 = vadd.f32 %v1389_v31, %v1323_v54  ;;  %v1983_v5 = vsub.f32 0.0, %v4713_v12  ;;  %v769_v58 = vmul.f32 %v4743_v32, %v700_v29 }
 0x158   : > { %3403 = vpow2.f32 %v911_v23  ;;  %v4747_v7 = vmul.f32 %v3392_v15, %v6252_v4  ;;  %v1569_v25 = vadd.f32 %v1537_v10, %v1503_v56  ;;  %v1603_v33 = vmul.f32 %v4111_v20, %v4646_v16  ;;  %v6255_v23 = vld [vmem:[#allocation32_spill] sm:$0xff]  ;;  %v6256_v10 = vld [vmem:[#allocation33_spill] sm:$0xff] }
 0x159   : > { %v770_v8 = vmul.f32 %v4743_v32, %v702_v18  ;;  %v4752_v31 = vpop.eup %3395  ;;  %3405 = vpow2.f32 %v2053_v46  ;;  %v1831_v54 = vadd.f32 %v1799_v30, %v1765_v3  ;;  %v1984_v24 = vsub.f32 0.0, %v4725_v42 }
 0x15a   : > { %6253 = vst [vmem:[#allocation31_spill] sm:$0xff] %v4747_v7  ;;  %v1865_v49 = vmul.f32 %v4240_v35, %v4735_v45  ;;  %v3398_v60 = vpop.eup %3397  ;;  %v4757_v29 = vadd.f32 %v1407_v14, %v1341_v57  ;;  %v1766_v43 = vadd.f32 %v1734_v9, %v1700_v0  ;;  %v1800_v56 = vmul.f32 %v4201_v40, %v4676_v41  ;;  %v4774_v0 = vld [vmem:[%s6161_s3] ss:$0 sm:$0xff]  ;;  %v4786_v9 = vld [vmem:[%s6162_s4 + $0x1] ss:$0 sm:$0xff] }
 0x15b   : > { %6254 = vst [vmem:[#allocation42_spill] sm:$0xff] %v4752_v31  ;;  %v4762_v20 = vmul.f32 %v3394_v1, %v6255_v23  ;;  %v1324_v46 = vmul.f32 %v4730_v11, %v6256_v10  ;;  %v2019_v15 = vmul.f32 1.442695, %v1983_v5  ;;  %v4769_v3 = vsel %vm1276_vm2, %v1262_v13, %v4078_v55  ;;  %v745_v23 = vpop.f32.mrf.mxu1 }
 0x15c   : > { %v3400_v16 = vpop.eup %3399  ;;  %v4777_v14 = vadd.f32 %v4774_v0, %v769_v58  ;;  %v2172_v18 = vadd.f32 %v4683_v50, %v4747_v7  ;;  %v4781_v57 = vadd.f32 %v1603_v33, %v1569_v25  ;;  %v1390_v13 = vmul.f32 %v4786_v9, %v4530_v59  ;;  %v4799_v50 = vld [vmem:[%s6162_s4 + $0x2] ss:$0 sm:$0xff] }
 0x15d   : > { %v3402_v30 = vpop.eup %3401  ;;  %v4791_v1 = vadd.f32 %v4774_v0, %v770_v8  ;;  %v4794_v58 = vmul.f32 %v3398_v60, %v4584_v21  ;;  %v1455_v4 = vmul.f32 %v4799_v50, %v4572_v37  ;;  %v2021_v25 = vmul.f32 1.442695, %v1984_v24 }
 0x15e   : > { %v3404_v5 = vpop.eup %3403  ;;  %v1897_v33 = vadd.f32 %v1865_v49, %v1831_v54  ;;  %v1832_v10 = vadd.f32 %v1800_v56, %v1766_v43  ;;  %v1866_v8 = vmul.f32 %v4240_v35, %v4769_v3  ;;  %v1144_v7 = vrot.slane %v4762_v20, 7  ;;  %v4817_v54 = vld [vmem:[%s6162_s4 + $0x4] ss:$0 sm:$0xff] }
 0x15f   : > { %6257 = vst [vmem:[#allocation32_spill] sm:$0xff] %v4794_v58  ;;  %v950_v38 = vadd.f32 1.0, %v3400_v16  ;;  %v4806_v21 = vpop.eup %3405  ;;  %v1422_v60 = vadd.f32 %v1390_v13, %v1324_v46  ;;  %3407 = vpow2.f32 %v2019_v15  ;;  %v4809_v19 = vmul.f32 %v3402_v30, %v4599_v62  ;;  %v6259_v46 = vld [vmem:[#allocation34_spill] sm:$0xff] }
 0x160   : > { %6258 = vst [vmem:[#allocation33_spill] sm:$0xff] %v4806_v21  ;;  %v837_v26 = vsub.f32 0.0, %v4777_v14  ;;  %v1456_v37 = vmul.f32 %v4799_v50, %v4665_v27  ;;  %v1586_v24 = vmul.f32 %v4817_v54, %v4530_v59  ;;  %v949_v49 = vadd.f32 1.0, %v3404_v5 }
 0x161   : > { %v838_v43 = vsub.f32 0.0, %v4791_v1  ;;  %v4823_v56 = vadd.f32 %v2172_v18, %v4794_v58  ;;  %v1652_v62 = vmul.f32 %v4138_v48, %v4665_v27  ;;  %3409 = vpow2.f32 %v2021_v25  ;;  %v4842_v48 = vld [vmem:[%s6162_s4 + $0x3] ss:$0 sm:$0xff] }
 0x162   : > { %v1933_v16 = vmul.f32 %v4342_v63, %v1897_v33  ;;  %v1618_v15 = vadd.f32 %v1586_v24, %v6259_v46  ;;  %v1898_v30 = vadd.f32 %v1866_v8, %v1832_v10  ;;  %v4832_v13 = vsel %vm1185_vm1, %v4063_v44, %v1144_v7 }
 0x163   : > { %3411 = vrcp.f32 %v950_v38  ;;  %v4834_v59 = vadd.f32 %v1456_v37, %v1422_v60  ;;  %v4836_v5 = vadd.f32 %v1455_v4, %v1421_v47  ;;  %v1145_v18 = vrot.slane %v4809_v19, 7  ;;  %v747_v46 = vpop.f32.mrf.mxu1 }
 0x164   : > { %v879_v58 = vmul.f32 1.442695, %v837_v26  ;;  %v1538_v27 = vmul.f32 %v4842_v48, %v4717_v39  ;;  %3413 = vrcp.f32 %v949_v49  ;;  %v6194_v25 = vrot.slane %v4809_v19, 1 }
 0x165   : > { %v881_v33 = vmul.f32 1.442695, %v838_v43  ;;  %v3408_v38 = vpop.eup %3407  ;;  %v1342_v47 = vmul.f32 %v4730_v11, %v4717_v39  ;;  %v1408_v4 = vmul.f32 %v4786_v9, %v4676_v41  ;;  %v4852_v26 = vadd.f32 %v4369_v53, %v1933_v16 }
 0x166   : > { %v1717_v10 = vmul.f32 %v4195_v36, %v4832_v13  ;;  %v1684_v8 = vadd.f32 %v1652_v62, %v1618_v15  ;;  %v1934_v60 = vmul.f32 %v4342_v63, %v1898_v30  ;;  %v1237_v37 = vrot.slane %v4762_v20, 1 }
 0x167   : > { %6260 = vst [vmem:[#allocation34_spill] sm:$0xff] %v4852_v26  ;;  %v787_v24 = vmul.f32 %v4743_v32, %v745_v23  ;;  %v3410_v49 = vpop.eup %3409  ;;  %v1473_v39 = vmul.f32 %v4799_v50, %v4735_v45  ;;  %v1604_v43 = vmul.f32 %v4817_v54, %v4676_v41  ;;  %v4865_v16 = vsel %vm1185_vm1, %v1144_v7, %v1145_v18 }
 0x168   : > { %3415 = vpow2.f32 %v879_v58  ;;  %v2079_v15 = vadd.f32 1.0, %v3408_v38  ;;  %v1570_v30 = vadd.f32 %v1538_v27, %v4692_v34  ;;  %v4872_v23 = vsel %vm1276_vm2, %v1237_v37, %v6194_v25 }
 0x169   : > { %v3412_v62 = vpop.eup %3411  ;;  %3417 = vpow2.f32 %v881_v33  ;;  %v1440_v6 = vadd.f32 %v1408_v4, %v1342_v47  ;;  %v1474_v41 = vmul.f32 %v4799_v50, %v4769_v3  ;;  %v2001_v7 = vsub.f32 0.0, %v4852_v26 }
 0x16a   : > { %v1749_v58 = vadd.f32 %v1717_v10, %v4651_v52  ;;  %v3414_v18 = vpop.eup %3413  ;;  %v4879_v38 = vadd.f32 %v4369_v53, %v1934_v60  ;;  %v1718_v34 = vmul.f32 %v4195_v36, %v4865_v16  ;;  %v4884_v27 = vadd.f32 %v4774_v0, %v787_v24  ;;  %v4897_v36 = vld [vmem:[%s6162_s4 + $0x5] ss:$0 sm:$0xff] }
 0x16b   : > { %v788_v33 = vmul.f32 %v4743_v32, %v747_v46  ;;  %v2080_v47 = vadd.f32 1.0, %v3410_v49  ;;  %v1783_v4 = vmul.f32 %v4201_v40, %v4762_v20  ;;  %v1849_v37 = vmul.f32 %v4240_v35, %v4872_v23 }
 0x16c   : > { %6261 = vst [vmem:[#allocation43_spill] sm:$0xff] %v4879_v38  ;;  %v4892_v52 = vmul.f32 %v3412_v62, %v4668_v17  ;;  %3419 = vrcp.f32 %v2079_v15  ;;  %v1636_v10 = vadd.f32 %v1604_v43, %v1570_v30  ;;  %v1669_v60 = vmul.f32 %v4897_v36, %v4735_v45 }
 0x16d   : > { %v1670_v24 = vmul.f32 %v4897_v36, %v4769_v3  ;;  %v4903_v49 = vadd.f32 %v1474_v41, %v1440_v6  ;;  %v2055_v46 = vmul.f32 1.442695, %v2001_v7  ;;  %v1815_v25 = vadd.f32 %v1783_v4, %v1749_v58  ;;  %v4920_v7 = vld [vmem:[%s6162_s4 + $0x7] ss:$0 sm:$0xff] }
 0x16e   : > { %v3416_v40 = vpop.eup %3415  ;;  %v4906_v17 = vmul.f32 %v3414_v18, %v4679_v22  ;;  %v2002_v62 = vsub.f32 0.0, %v4879_v38  ;;  %v1521_v15 = vmul.f32 %v4842_v48, %v4832_v13  ;;  %v1750_v30 = vadd.f32 %v1718_v34, %v1684_v8  ;;  %v705_v18 = vpop.f32.mrf.mxu0 }
 0x16f   : > { %v3418_v43 = vpop.eup %3417  ;;  %v855_v45 = vsub.f32 0.0, %v4884_v27  ;;  %3421 = vrcp.f32 %v2080_v47  ;;  %v1881_v26 = vadd.f32 %v1849_v37, %v1815_v25  ;;  %v1172_v3 = vrot.slane %v4892_v52, 7 }
 0x170   : > { %v4914_v6 = vadd.f32 %v4774_v0, %v788_v33  ;;  %v1702_v41 = vadd.f32 %v1670_v24, %v1636_v10  ;;  %v1505_v22 = vadd.f32 %v1473_v39, %v4757_v29  ;;  %v1784_v8 = vmul.f32 %v4920_v7, %v4809_v19 }
 0x171   : > { %v933_v58 = vadd.f32 1.0, %v3416_v40  ;;  %3423 = vpow2.f32 %v2055_v46  ;;  %v1171_v25 = vrot.slane %v4906_v17, 7  ;;  %v6262_v34 = vrot.slane %v4809_v19, 1 }
 0x172   : > { %v934_v29 = vadd.f32 1.0, %v3418_v43  ;;  %v3420_v39 = vpop.eup %3419  ;;  %v2057_v47 = vmul.f32 1.442695, %v2002_v62  ;;  %v1325_v4 = vmul.f32 %v4730_v11, %v4832_v13  ;;  %v1553_v37 = vadd.f32 %v1521_v15, %v4836_v5 }
 0x173   : > { %v4930_v33 = vsel %vm1276_vm2, %v6262_v34, %v4078_v55  ;;  %v1816_v10 = vadd.f32 %v1784_v8, %v1750_v30  ;;  %v1917_v24 = vmul.f32 %v4342_v63, %v1881_v26  ;;  %v4938_v40 = vsel %vm1185_vm1, %v1171_v25, %v1172_v3 }
 0x174   : > { %v915_v46 = vmul.f32 1.442695, %v855_v45  ;;  %v856_v38 = vsub.f32 0.0, %v4914_v6  ;;  %v1391_v43 = vmul.f32 %v4786_v9, %v4762_v20  ;;  %v1701_v62 = vadd.f32 %v1669_v60, %v4781_v57 }
 0x175   : > { %v1850_v13 = vmul.f32 %v4240_v35, %v4930_v33  ;;  %3425 = vrcp.f32 %v933_v58  ;;  %v3422_v5 = vpop.eup %3421  ;;  %v4947_v15 = vmul.f32 %v3420_v39, %v4713_v12  ;;  %v1587_v26 = vmul.f32 %v4817_v54, %v4762_v20  ;;  %v4959_v35 = vld [vmem:[%s6162_s4 + $0x6] ss:$0 sm:$0xff] }
 0x176   : > { %v1193_v30 = vsel %vm1185_vm1, %v4063_v44, %v1171_v25  ;;  %3427 = vrcp.f32 %v934_v29  ;;  %v4954_v45 = vadd.f32 %v1391_v43, %v1325_v4  ;;  %v1736_v12 = vmul.f32 %v4959_v35, %v4938_v40 }
 0x177   : > { %6263 = vst [vmem:[#allocation44_spill] sm:$0xff] %v4947_v15  ;;  %3429 = vpow2.f32 %v2057_v47  ;;  %v1882_v57 = vadd.f32 %v1850_v13, %v1816_v10  ;;  %v4963_v60 = vpop.eup %3423  ;;  %v4965_v20 = vadd.f32 %v1587_v26, %v1553_v37  ;;  %v4968_v3 = vadd.f32 %v4369_v53, %v1917_v24 }
 0x178   : > { %6264 = vst [vmem:[#allocation45_spill] sm:$0xff] %v4963_v60  ;;  %3431 = vpow2.f32 %v915_v46  ;;  %v917_v8 = vmul.f32 1.442695, %v856_v38  ;;  %v4971_v58 = vmul.f32 %v3422_v5, %v4725_v42  ;;  %v1539_v25 = vmul.f32 %v4842_v48, %v1193_v30  ;;  %v707_v46 = vpop.f32.mrf.mxu0 }
 0x179   : > { %v1735_v34 = vmul.f32 %v4959_v35, %v1193_v30  ;;  %v6197_v29 = vrot.slane %v4892_v52, 1  ;;  %v2174_v39 = vadd.f32 %v4823_v56, %v4947_v15  ;;  %v1409_v4 = vmul.f32 %v4786_v9, %v4906_v17 }
 0x17a   : > { %6265 = vst [vmem:[#allocation46_spill] sm:$0xff] %v4971_v58  ;;  %v1605_v38 = vmul.f32 %v4817_v54, %v4906_v17  ;;  %v1918_v42 = vmul.f32 %v4342_v63, %v1882_v57  ;;  %v1768_v24 = vadd.f32 %v1736_v12, %v1702_v41  ;;  %v1802_v56 = vmul.f32 %v4920_v7, %v4892_v52 }
 0x17b   : > { %v3426_v37 = vpop.eup %3425  ;;  %v4989_v10 = vsel %vm1276_vm2, %v6197_v29, %v4078_v55  ;;  %v1801_v13 = vmul.f32 %v4920_v7, %v4906_v17  ;;  %v1522_v5 = vmul.f32 %v4842_v48, %v4865_v16  ;;  %v1985_v26 = vsub.f32 0.0, %v4968_v3 }
 0x17c   : > { %v3428_v43 = vpop.eup %3427  ;;  %v771_v57 = vmul.f32 %v4743_v32, %v705_v18  ;;  %v1343_v29 = vmul.f32 %v4730_v11, %v1193_v30  ;;  %v1571_v41 = vadd.f32 %v1539_v25, %v1505_v22  ;;  %v1767_v12 = vadd.f32 %v1735_v34, %v1701_v62  ;;  %v5012_v18 = vld [vmem:[%s6162_s4 + $0x8] ss:$0 sm:$0xff] }
 0x17d   : > { %v4999_v47 = vpop.eup %3429  ;;  %v1326_v15 = vmul.f32 %v4730_v11, %v4865_v16  ;;  %v5005_v21 = vadd.f32 %v2174_v39, %v4971_v58  ;;  %v1392_v31 = vmul.f32 %v4786_v9, %v4809_v19  ;;  %v1868_v30 = vmul.f32 %v5012_v18, %v4989_v10 }
 0x17e   : > { %6266 = vst [vmem:[#allocation47_spill] sm:$0xff] %v4999_v47  ;;  %v3432_v60 = vpop.eup %3431  ;;  %v772_v22 = vmul.f32 %v4743_v32, %v707_v46  ;;  %v5018_v62 = vadd.f32 %v4369_v53, %v1918_v42  ;;  %v1834_v16 = vadd.f32 %v1802_v56, %v1768_v24  ;;  %v5021_v25 = vmul.f32 %v3426_v37, %v4777_v14  ;;  %v750_v46 = vpop.f32.mrf.mxu1 }
 0x17f   : > { %v5024_v34 = vmul.f32 %v3428_v43, %v4791_v1  ;;  %v1554_v39 = vadd.f32 %v1522_v5, %v4834_v59  ;;  %v1588_v58 = vmul.f32 %v4817_v54, %v4809_v19  ;;  %v2023_v47 = vmul.f32 1.442695, %v1985_v26 }
 0x180   : > { %v5030_v51 = vadd.f32 %v4774_v0, %v771_v57  ;;  %v5032_v2 = vadd.f32 %v1409_v4, %v1343_v29  ;;  %v5034_v42 = vadd.f32 %v1605_v38, %v1571_v41  ;;  %v5036_v24 = vadd.f32 %v1801_v13, %v1767_v12 }
 0x181   : > { %v1424_v14 = vadd.f32 %v1392_v31, %v1326_v15  ;;  %v5040_v1 = vmul.f32 %v4799_v50, %v4872_v23  ;;  %v1458_v59 = vmul.f32 %v4799_v50, %v4930_v33  ;;  %v951_v19 = vadd.f32 1.0, %v3432_v60 }
 0x182   : > { %6267 = vst [vmem:[#allocation48_spill] sm:$0xff] %v5030_v51  ;;  %v5045_v37 = vadd.f32 %v4774_v0, %v772_v22  ;;  %v1986_v56 = vsub.f32 0.0, %v5018_v62  ;;  %v1900_v29 = vadd.f32 %v1868_v30, %v1834_v16  ;;  %v1147_v4 = vrot.slane %v5021_v25, 7 }
 0x183   : > { %v1148_v38 = vrot.slane %v5024_v34, 7  ;;  %v1620_v43 = vadd.f32 %v1588_v58, %v1554_v39  ;;  %v1653_v31 = vmul.f32 %v4897_v36, %v4872_v23  ;;  %3433 = vpow2.f32 %v2023_v47 }
 0x184   : > { %6268 = vst [vmem:[#allocation49_spill] sm:$0xff] %v5045_v37  ;;  %v839_v15 = vsub.f32 0.0, %v5030_v51  ;;  %v5053_v13 = vadd.f32 %v1458_v59, %v1424_v14  ;;  %v1654_v60 = vmul.f32 %v4897_v36, %v4930_v33  ;;  %3435 = vpow2.f32 %v917_v8 }
 0x185   : > { %v789_v5 = vmul.f32 %v4743_v32, %v750_v46  ;;  %v1410_v26 = vmul.f32 %v4786_v9, %v4892_v52  ;;  %v1606_v58 = vmul.f32 %v4817_v54, %v4892_v52  ;;  %3437 = vrcp.f32 %v951_v19 }
 0x186   : > { %6269 = vst [vmem:[#allocation50_spill] sm:$0xff] %v5053_v13  ;;  %v840_v23 = vsub.f32 0.0, %v5045_v37  ;;  %v2025_v47 = vmul.f32 1.442695, %v1986_v56  ;;  %v1936_v57 = vmul.f32 %v4342_v63, %v1900_v29  ;;  %v5067_v41 = vsel %vm1185_vm1, %v4063_v44, %v1147_v4 }
 0x187   : > { %v5071_v33 = vsel %vm1185_vm1, %v1147_v4, %v1148_v38  ;;  %v1686_v8 = vadd.f32 %v1654_v60, %v1620_v43  ;;  %v6270_v12 = vrot.slane %v4892_v52, 1  ;;  %v6271_v30 = vrot.slane %v4906_v17, 1  ;;  %v752_v4 = vpop.f32.mrf.mxu1 }
 0x188   : > { %v1540_v63 = vmul.f32 %v4842_v48, %v4938_v40  ;;  %v883_v16 = vmul.f32 1.442695, %v839_v15  ;;  %v1344_v39 = vmul.f32 %v4730_v11, %v4938_v40  ;;  %v1241_v14 = vrot.slane %v5024_v34, 1 }
 0x189   : > { %v1284_v22 = vsel %vm1276_vm2, %v6271_v30, %v6270_v12  ;;  %v5086_v59 = vadd.f32 %v4774_v0, %v789_v5  ;;  %v3434_v52 = vpop.eup %3433  ;;  %v1476_v17 = vmul.f32 %v4799_v50, %v4989_v10  ;;  %v1719_v19 = vmul.f32 %v4959_v35, %v5067_v41 }
 0x18a   : > { %v1475_v46 = vmul.f32 %v4799_v50, %v1284_v22  ;;  %v1720_v56 = vmul.f32 %v4959_v35, %v5071_v33  ;;  %v885_v29 = vmul.f32 1.442695, %v840_v23  ;;  %v3436_v40 = vpop.eup %3435  ;;  %3439 = vpow2.f32 %v2025_v47 }
 0x18b   : > { %v1671_v38 = vmul.f32 %v4897_v36, %v1284_v22  ;;  %v5096_v43 = vadd.f32 %v4369_v53, %v1936_v57  ;;  %v1240_v15 = vrot.slane %v5021_v25, 1  ;;  %v3438_v60 = vpop.eup %3437  ;;  %v1572_v5 = vadd.f32 %v1540_v63, %v4903_v49 }
 0x18c   : > { %v1867_v12 = vmul.f32 %v5012_v18, %v1284_v22  ;;  %v1685_v30 = vadd.f32 %v1653_v31, %v4965_v20  ;;  %3441 = vpow2.f32 %v883_v16  ;;  %v2081_v28 = vadd.f32 1.0, %v3434_v52 }
 0x18d   : > { %6272 = vst [vmem:[#allocation51_spill] sm:$0xff] %v5096_v43  ;;  %v5104_v23 = vsel %vm1276_vm2, %v1240_v15, %v1241_v14  ;;  %v857_v47 = vsub.f32 0.0, %v5086_v59  ;;  %v790_v53 = vmul.f32 %v4743_v32, %v752_v4  ;;  %v1752_v37 = vadd.f32 %v1720_v56, %v1686_v8 }
 0x18e   : > { %v1751_v57 = vadd.f32 %v1719_v19, %v1685_v30  ;;  %v952_v51 = vadd.f32 1.0, %v3436_v40  ;;  %3443 = vpow2.f32 %v885_v29  ;;  %v1442_v13 = vadd.f32 %v1410_v26, %v1344_v39  ;;  %v710_v29 = vpop.f32.mrf.mxu0 }
 0x18f   : > { %v1672_v49 = vmul.f32 %v4897_v36, %v4989_v10  ;;  %v2004_v20 = vsub.f32 0.0, %v5096_v43  ;;  %v5112_v31 = vmul.f32 %v3438_v60, %v4884_v27  ;;  %v1638_v22 = vadd.f32 %v1606_v58, %v1572_v5 }
 0x190   : > { %v1785_v63 = vmul.f32 %v4920_v7, %v5021_v25  ;;  %v1786_v16 = vmul.f32 %v4920_v7, %v5024_v34  ;;  %v1851_v8 = vmul.f32 %v5012_v18, %v5104_v23  ;;  %v3440_v52 = vpop.eup %3439  ;;  %3445 = vrcp.f32 %v2081_v28 }
 0x191   : > { %v1899_v26 = vadd.f32 %v1867_v12, %v5036_v24  ;;  %v5124_v10 = vsel %vm1276_vm2, %v1241_v14, %v4078_v55  ;;  %v5127_v27 = vadd.f32 %v4774_v0, %v790_v53  ;;  %3447 = vrcp.f32 %v952_v51  ;;  %v5141_v51 = vld [vmem:[%s6163_s5] ss:$0 sm:$0xff] }
 0x192   : > { %v3442_v58 = vpop.eup %3441  ;;  %v1817_v39 = vadd.f32 %v1785_v63, %v1751_v57  ;;  %v1818_v19 = vadd.f32 %v1786_v16, %v1752_v37  ;;  %v919_v56 = vmul.f32 1.442695, %v857_v47  ;;  %v5129_v4 = vadd.f32 %v1476_v17, %v1442_v13 }
 0x193   : > { %v2061_v40 = vmul.f32 1.442695, %v2004_v20  ;;  %v1489_v28 = vadd.f32 %v5040_v1, %v4954_v45  ;;  %v1174_v24 = vrot.slane %v5112_v31, 7  ;;  %v2082_v14 = vadd.f32 1.0, %v3440_v52 }
 0x194   : > { %v3444_v15 = vpop.eup %3443  ;;  %v5134_v60 = vadd.f32 %v1672_v49, %v1638_v22  ;;  %v1852_v5 = vmul.f32 %v5012_v18, %v5124_v10  ;;  %v1883_v12 = vadd.f32 %v1851_v8, %v1817_v39  ;;  %v5144_v37 = vmul.f32 %v5141_v51, %v1899_v26 }
 0x195   : > { %v1523_v45 = vmul.f32 %v4842_v48, %v5067_v41  ;;  %v1507_v1 = vadd.f32 %v1475_v46, %v5032_v2  ;;  %v935_v13 = vadd.f32 1.0, %v3442_v58  ;;  %v1703_v17 = vadd.f32 %v1671_v38, %v5034_v42 }
 0x196   : > { %v1884_v30 = vadd.f32 %v1852_v5, %v1818_v19  ;;  %3449 = vpow2.f32 %v919_v56  ;;  %v858_v47 = vsub.f32 0.0, %v5127_v27  ;;  %v3446_v53 = vpop.eup %3445  ;;  %v1393_v57 = vmul.f32 %v4786_v9, %v5021_v25 }
 0x197   : > { %3451 = vpow2.f32 %v2061_v40  ;;  %v1191_v49 = vsel %vm1185_vm1, %v4063_v44, %v1174_v24  ;;  %v936_v20 = vadd.f32 1.0, %v3444_v15  ;;  %v3448_v2 = vpop.eup %3447  ;;  %v1327_v42 = vmul.f32 %v4730_v11, %v5067_v41 }
 0x198   : > { %3453 = vrcp.f32 %v2082_v14  ;;  %v1541_v46 = vmul.f32 %v4842_v48, %v1191_v49  ;;  %v1919_v38 = vmul.f32 %v5141_v51, %v1883_v12  ;;  %v1555_v22 = vadd.f32 %v1523_v45, %v1489_v28  ;;  %v5183_v28 = vld [vmem:[%s6164_s6] ss:$0 sm:$0xff]  ;;  %v5188_v14 = vpop.f32.mrf.mxu0 }
 0x199   : > { %v1589_v63 = vmul.f32 %v4817_v54, %v5021_v25  ;;  %v1411_v16 = vmul.f32 %v4786_v9, %v5112_v31  ;;  %3455 = vrcp.f32 %v935_v13  ;;  %v5167_v8 = vmul.f32 %v3446_v53, %v4968_v3 }
 0x19a   : > { %v1345_v52 = vmul.f32 %v4730_v11, %v1191_v49  ;;  %v1920_v26 = vmul.f32 %v5141_v51, %v1884_v30  ;;  %3457 = vrcp.f32 %v936_v20  ;;  %v1267_v41 = vrot.slane %v5112_v31, 1 }
 0x19b   : > { %6273 = vst [vmem:[#allocation52_spill] sm:$0xff] %v5167_v8  ;;  %v1607_v58 = vmul.f32 %v4817_v54, %v5112_v31  ;;  %v1737_v39 = vmul.f32 %v4959_v35, %v1191_v49  ;;  %v5176_v25 = vmul.f32 %v3448_v2, %v4914_v6  ;;  %v1425_v56 = vadd.f32 %v1393_v57, %v1327_v42 }
 0x19c   : > { %v3450_v19 = vpop.eup %3449  ;;  %v1573_v40 = vadd.f32 %v1541_v46, %v1507_v1  ;;  %v1803_v3 = vmul.f32 %v4920_v7, %v5112_v31  ;;  %v5186_v15 = vadd.f32 %v5183_v28, %v1919_v38  ;;  %v1621_v6 = vadd.f32 %v1589_v63, %v1555_v22 }
 0x19d   : > { %v5190_v5 = vpop.eup %3451  ;;  %v1328_v12 = vmul.f32 %v4730_v11, %v5071_v33  ;;  %v1524_v45 = vmul.f32 %v4842_v48, %v5071_v33  ;;  %v921_v1 = vmul.f32 1.442695, %v858_v47  ;;  %v2176_v30 = vadd.f32 %v5005_v21, %v5167_v8 }
 0x19e   : > { %v3454_v13 = vpop.eup %3453  ;;  %v5198_v53 = vadd.f32 %v1411_v16, %v1345_v52  ;;  %v5201_v57 = vadd.f32 %v5183_v28, %v1920_v26  ;;  %v773_v49 = vmul.f32 %v4743_v32, %v710_v29  ;;  %v1769_v2 = vadd.f32 %v1737_v39, %v1703_v17  ;;  %v6275_v16 = vld [vmem:[#allocation50_spill] sm:$0xff] }
 0x19f   : > { %v3456_v20 = vpop.eup %3455  ;;  %v1394_v42 = vmul.f32 %v4786_v9, %v5024_v34  ;;  %v1175_v46 = vrot.slane %v5176_v25, 7  ;;  %v953_v33 = vadd.f32 1.0, %v3450_v19  ;;  %v5207_v38 = vadd.f32 %v1607_v58, %v1573_v40  ;;  %v6276_v40 = vld [vmem:[#allocation48_spill] sm:$0xff] }
 0x1a0   : > { %v3458_v47 = vpop.eup %3457  ;;  %v1459_v21 = vmul.f32 %v4799_v50, %v5104_v23  ;;  %v1460_v22 = vmul.f32 %v4799_v50, %v5124_v10  ;;  %v1987_v63 = vsub.f32 0.0, %v5186_v15  ;;  %v5215_v29 = vmul.f32 %v3454_v13, %v5018_v62 }
 0x1a1   : > { %v1426_v17 = vadd.f32 %v1394_v42, %v1328_v12  ;;  %v1556_v52 = vadd.f32 %v1524_v45, %v6275_v16  ;;  %3459 = vpow2.f32 %v921_v1  ;;  %v1590_v26 = vmul.f32 %v4817_v54, %v5024_v34  ;;  %v6277_v45 = vld [vmem:[#allocation49_spill] sm:$0xff] }
 0x1a2   : > { %6274 = vst [vmem:[#allocation53_spill] sm:$0xff] %v5215_v29  ;;  %v1988_v58 = vsub.f32 0.0, %v5201_v57  ;;  %v1268_v39 = vrot.slane %v5176_v25, 1  ;;  %v5223_v19 = vadd.f32 %v4774_v0, %v773_v49  ;;  %v1190_v62 = vsel %vm1185_vm1, %v1174_v24, %v1175_v46 }
 0x1a3   : > { %v5230_v12 = vmul.f32 %v3456_v20, %v6276_v40  ;;  %3461 = vrcp.f32 %v953_v33  ;;  %v5233_v1 = vmul.f32 %v3458_v47, %v6277_v45  ;;  %v1835_v34 = vadd.f32 %v1803_v3, %v1769_v2  ;;  %v715_v33 = vpop.f32.mrf.mxu0 }
 0x1a4   : > { %v1655_v13 = vmul.f32 %v4897_v36, %v5104_v23  ;;  %v1656_v49 = vmul.f32 %v4897_v36, %v5124_v10  ;;  %v2027_v42 = vmul.f32 1.442695, %v1987_v63  ;;  %v5240_v31 = vadd.f32 %v2176_v30, %v5215_v29 }
 0x1a5   : > { %v5242_v16 = vadd.f32 %v1460_v22, %v1426_v17  ;;  %v1622_v24 = vadd.f32 %v1590_v26, %v1556_v52  ;;  %v1412_v20 = vmul.f32 %v4786_v9, %v5176_v25  ;;  %v2029_v46 = vmul.f32 1.442695, %v1988_v58 }
 0x1a6   : > { %v1282_v3 = vsel %vm1276_vm2, %v1267_v41, %v1268_v39  ;;  %v1346_v2 = vmul.f32 %v4730_v11, %v1190_v62  ;;  %v1738_v23 = vmul.f32 %v4959_v35, %v1190_v62  ;;  %v1542_v47 = vmul.f32 %v4842_v48, %v1190_v62 }
 0x1a7   : > { %v3460_v10 = vpop.eup %3459  ;;  %v1150_v30 = vrot.slane %v5230_v12, 7  ;;  %v1151_v22 = vrot.slane %v5233_v1, 7  ;;  %v841_v63 = vsub.f32 0.0, %v5223_v19  ;;  %3463 = vpow2.f32 %v2027_v42 }
 0x1a8   : > { %v5254_v17 = vadd.f32 %v1459_v21, %v1425_v56  ;;  %v1687_v52 = vadd.f32 %v1655_v13, %v1621_v6  ;;  %v5258_v41 = vadd.f32 %v5183_v28, %v5144_v37  ;;  %v1281_v58 = vsel %vm1276_vm2, %v1268_v39, %v4078_v55 }
 0x1a9   : > { %v3462_v26 = vpop.eup %3461  ;;  %v1608_v62 = vmul.f32 %v4817_v54, %v5176_v25  ;;  %v1804_v40 = vmul.f32 %v4920_v7, %v5176_v25  ;;  %v1869_v45 = vmul.f32 %v5012_v18, %v1282_v3  ;;  %3465 = vpow2.f32 %v2029_v46 }
 0x1aa   : > { %v1444_v56 = vadd.f32 %v1412_v20, %v1346_v2  ;;  %v1770_v6 = vadd.f32 %v1738_v23, %v5134_v60  ;;  %v954_v21 = vadd.f32 1.0, %v3460_v10  ;;  %v1574_v37 = vadd.f32 %v1542_v47, %v5129_v4 }
 0x1ab   : > { %v5273_v13 = vsel %vm1185_vm1, %v4063_v44, %v1150_v30  ;;  %v5277_v39 = vsel %vm1185_vm1, %v1150_v30, %v1151_v22  ;;  %v887_v42 = vmul.f32 1.442695, %v841_v63  ;;  %v5280_v25 = vmul.f32 %v3462_v26, %v5086_v59  ;;  %v717_v29 = vpop.f32.mrf.mxu0 }
 0x1ac   : > { %v1477_v20 = vmul.f32 %v4799_v50, %v1282_v3  ;;  %v1673_v60 = vmul.f32 %v4897_v36, %v1282_v3  ;;  %v1478_v46 = vmul.f32 %v4799_v50, %v1281_v58  ;;  %v1688_v4 = vadd.f32 %v1656_v49, %v1622_v24 }
 0x1ad   : > { %v1870_v2 = vmul.f32 %v5012_v18, %v1281_v58  ;;  %v1244_v23 = vrot.slane %v5233_v1, 1  ;;  %v3464_v47 = vpop.eup %3463  ;;  %v1836_v30 = vadd.f32 %v1804_v40, %v1770_v6  ;;  %v1721_v22 = vmul.f32 %v4959_v35, %v5273_v13 }
 0x1ae   : > { %v1722_v59 = vmul.f32 %v4959_v35, %v5277_v39  ;;  %3467 = vrcp.f32 %v954_v21  ;;  %v5292_v63 = vadd.f32 %v1608_v62, %v1574_v37  ;;  %v5294_v3 = vadd.f32 %v1869_v45, %v1835_v34 }
 0x1af   : > { %v1243_v49 = vrot.slane %v5230_v12, 1  ;;  %3469 = vpow2.f32 %v887_v42  ;;  %v3466_v24 = vpop.eup %3465  ;;  %v6204_v26 = vrot.slane %v5280_v25, 7  ;;  %v1509_v10 = vadd.f32 %v1477_v20, %v5198_v53 }
 0x1b0   : > { %v1705_v40 = vadd.f32 %v1673_v60, %v5207_v38  ;;  %v5300_v6 = vadd.f32 %v1478_v46, %v1444_v56  ;;  %v2083_v8 = vadd.f32 1.0, %v3464_v47  ;;  %v1674_v34 = vmul.f32 %v4897_v36, %v1281_v58 }
 0x1b1   : > { %v5304_v62 = vsel %vm1276_vm2, %v1243_v49, %v1244_v23  ;;  %v5309_v45 = vmul.f32 %v4959_v35, %v4063_v44  ;;  %v1902_v21 = vadd.f32 %v1870_v2, %v1836_v30  ;;  %v1395_v53 = vmul.f32 %v4786_v9, %v5230_v12 }
 0x1b2   : > { %v1753_v37 = vadd.f32 %v1721_v22, %v1687_v52  ;;  %v1754_v38 = vadd.f32 %v1722_v59, %v1688_v4  ;;  %v1787_v56 = vmul.f32 %v4920_v7, %v5230_v12  ;;  %v774_v42 = vmul.f32 %v4743_v32, %v5188_v14 }
 0x1b3   : > { %v775_v20 = vmul.f32 %v4743_v32, %v715_v33  ;;  %v776_v58 = vmul.f32 %v4743_v32, %v717_v29  ;;  %v2084_v46 = vadd.f32 1.0, %v3466_v24  ;;  %v1189_v2 = vsel %vm1185_vm1, %v4063_v44, %v6204_v26 }
 0x1b4   : > { %v3468_v60 = vpop.eup %3467  ;;  %v1788_v52 = vmul.f32 %v4920_v7, %v5233_v1  ;;  %v1853_v4 = vmul.f32 %v5012_v18, %v5304_v62  ;;  %v5331_v14 = vsel %vm1276_vm2, %v1244_v23, %v4078_v55  ;;  %v5334_v32 = vadd.f32 %v4774_v0, %v774_v42 }
 0x1b5   : > { %v3470_v47 = vpop.eup %3469  ;;  %v5337_v29 = vadd.f32 %v4774_v0, %v775_v20  ;;  %v5340_v33 = vadd.f32 %v4774_v0, %v776_v58  ;;  %3471 = vrcp.f32 %v2083_v8  ;;  %v1819_v30 = vadd.f32 %v1787_v56, %v1753_v37 }
 0x1b6   : > { %v1820_v22 = vadd.f32 %v1788_v52, %v1754_v38  ;;  %v937_v59 = vadd.f32 1.0, %v3470_v47  ;;  %v1525_v49 = vmul.f32 %v4842_v48, %v5273_v13  ;;  %v842_v24 = vsub.f32 0.0, %v5334_v32 }
 0x1b7   : > { %v843_v23 = vsub.f32 0.0, %v5337_v29  ;;  %v844_v42 = vsub.f32 0.0, %v5340_v33  ;;  %v1543_v26 = vmul.f32 %v4842_v48, %v1189_v2  ;;  %v1854_v20 = vmul.f32 %v5012_v18, %v5331_v14 }
 0x1b8   : > { %v1885_v0 = vadd.f32 %v1853_v4, %v1819_v30  ;;  %v5351_v8 = vmul.f32 %v3468_v60, %v5127_v27  ;;  %3473 = vrcp.f32 %v937_v59  ;;  %v889_v37 = vmul.f32 1.442695, %v842_v24 }
 0x1b9   : > { %v891_v38 = vmul.f32 1.442695, %v843_v23  ;;  %v893_v56 = vmul.f32 1.442695, %v844_v42  ;;  %3475 = vrcp.f32 %v2084_v46  ;;  %v1591_v58 = vmul.f32 %v4817_v54, %v5230_v12 }
 0x1ba   : > { %v1739_v52 = vmul.f32 %v4959_v35, %v1189_v2  ;;  %v1886_v47 = vadd.f32 %v1854_v20, %v1820_v22  ;;  %v5357_v43 = vmul.f32 %v5141_v51, %v1902_v21  ;;  %v1329_v4 = vmul.f32 %v4730_v11, %v5273_v13 }
 0x1bb   : > { %v1557_v27 = vadd.f32 %v1525_v49, %v5254_v17  ;;  %3477 = vpow2.f32 %v889_v37  ;;  %v3472_v60 = vpop.eup %3471  ;;  %v1270_v30 = vrot.slane %v5280_v25, 1  ;;  %v1575_v59 = vadd.f32 %v1543_v26, %v1509_v10 }
 0x1bc   : > { %v1609_v46 = vmul.f32 %v4817_v54, %v5280_v25  ;;  %3479 = vpow2.f32 %v891_v38  ;;  %v1330_v12 = vmul.f32 %v4730_v11, %v5277_v39  ;;  %v1921_v21 = vmul.f32 %v5141_v51, %v1885_v0 }
 0x1bd   : > { %v1178_v2 = vrot.slane %v5351_v8, 7  ;;  %3481 = vpow2.f32 %v893_v56  ;;  %v1771_v13 = vadd.f32 %v1739_v52, %v1705_v40  ;;  %v1805_v17 = vmul.f32 %v4920_v7, %v5280_v25 }
 0x1be   : > { %v1526_v22 = vmul.f32 %v4842_v48, %v5277_v39  ;;  %v1922_v10 = vmul.f32 %v5141_v51, %v1886_v47  ;;  %v3474_v26 = vpop.eup %3473  ;;  %v1427_v49 = vadd.f32 %v1395_v53, %v1329_v4  ;;  %v1623_v24 = vadd.f32 %v1591_v58, %v1557_v27 }
 0x1bf   : > { %v1396_v11 = vmul.f32 %v4786_v9, %v5233_v1  ;;  %v1706_v23 = vadd.f32 %v1674_v34, %v5292_v63  ;;  %v5377_v42 = vpop.eup %3475  ;;  %v5380_v40 = vmul.f32 %v3472_v60, %v5186_v15  ;;  %v1592_v20 = vmul.f32 %v4817_v54, %v5233_v1 }
 0x1c0   : > { %v1271_v39 = vrot.slane %v5351_v8, 1  ;;  %v5386_v0 = vmul.f32 %v3474_v26, %v5223_v19  ;;  %v1641_v37 = vadd.f32 %v1609_v46, %v1575_v59  ;;  %v5389_v56 = vadd.f32 %v5183_v28, %v1921_v21 }
 0x1c1   : > { %v3478_v53 = vpop.eup %3477  ;;  %v1428_v38 = vadd.f32 %v1396_v11, %v1330_v12  ;;  %v6278_v63 = vrot.slane %v5280_v25, 7  ;;  %v1837_v58 = vadd.f32 %v1805_v17, %v1771_v13  ;;  %v1558_v1 = vadd.f32 %v1526_v22, %v5242_v16 }
 0x1c2   : > { %v3480_v34 = vpop.eup %3479  ;;  %v5397_v52 = vadd.f32 %v5183_v28, %v1922_v10  ;;  %v1153_v19 = vrot.slane %v5386_v0, 7  ;;  %v1461_v4 = vmul.f32 %v4799_v50, %v5304_v62  ;;  %v1462_v27 = vmul.f32 %v4799_v50, %v5331_v14 }
 0x1c3   : > { %v1188_v15 = vsel %vm1185_vm1, %v6278_v63, %v1178_v2  ;;  %v3482_v47 = vpop.eup %3481  ;;  %v1657_v25 = vmul.f32 %v4897_v36, %v5304_v62  ;;  %v938_v60 = vadd.f32 1.0, %v3478_v53  ;;  %v1280_v59 = vsel %vm1276_vm2, %v1270_v30, %v1271_v39 }
 0x1c4   : > { %v1544_v16 = vmul.f32 %v4842_v48, %v1188_v15  ;;  %v1205_v46 = vsel %vm1185_vm1, %v4063_v44, %v1153_v19  ;;  %v939_v12 = vadd.f32 1.0, %v3480_v34  ;;  %v5414_v21 = vadd.f32 %v1462_v27, %v1428_v38  ;;  %v5438_v27 = vld [vmem:[%s6162_s4] ss:$0 sm:$0xff] }
 0x1c5   : > { %v1658_v50 = vmul.f32 %v4897_v36, %v5331_v14  ;;  %v1989_v62 = vsub.f32 0.0, %v5389_v56  ;;  %v940_v2 = vadd.f32 1.0, %v3482_v47  ;;  %v1624_v13 = vadd.f32 %v1592_v20, %v1558_v1 }
 0x1c6   : > { %v1990_v30 = vsub.f32 0.0, %v5397_v52  ;;  %v1610_v17 = vmul.f32 %v4817_v54, %v5351_v8  ;;  %3483 = vrcp.f32 %v938_v60  ;;  %v1675_v22 = vmul.f32 %v4897_v36, %v1280_v59 }
 0x1c7   : > { %v5425_v10 = vmul.f32 %v4920_v7, %v5351_v8  ;;  %v1527_v26 = vmul.f32 %v4842_v48, %v1205_v46  ;;  %v1723_v14 = vmul.f32 %v4959_v35, %v1205_v46  ;;  %v1279_v11 = vsel %vm1276_vm2, %v1271_v39, %v4078_v55 }
 0x1c8   : > { %v1576_v20 = vadd.f32 %v1544_v16, %v5300_v6  ;;  %v1740_v53 = vmul.f32 %v4959_v35, %v1188_v15  ;;  %3485 = vrcp.f32 %v939_v12  ;;  %v2031_v38 = vmul.f32 1.442695, %v1989_v62 }
 0x1c9   : > { %v1493_v63 = vadd.f32 %v1461_v4, %v1427_v49  ;;  %v1689_v34 = vadd.f32 %v1657_v25, %v1623_v24  ;;  %3487 = vrcp.f32 %v940_v2  ;;  %v1690_v1 = vadd.f32 %v1658_v50, %v1624_v13 }
 0x1ca   : > { %v2033_v8 = vmul.f32 1.442695, %v1990_v30  ;;  %v1871_v47 = vmul.f32 %v5012_v18, %v1280_v59  ;;  %v1331_v39 = vmul.f32 %v5438_v27, %v1205_v46  ;;  %v5442_v6 = vmul.f32 %v4897_v36, %v1279_v11 }
 0x1cb   : > { %v5444_v15 = vadd.f32 %v1675_v22, %v1641_v37  ;;  %v1559_v60 = vadd.f32 %v1527_v26, %v1493_v63  ;;  %v1755_v49 = vadd.f32 %v1723_v14, %v1689_v34  ;;  %v5446_v4 = vadd.f32 %v1610_v17, %v1576_v20 }
 0x1cc   : > { %v3484_v24 = vpop.eup %3483  ;;  %v5448_v25 = vadd.f32 %v1740_v53, %v1706_v23  ;;  %v5451_v59 = vmul.f32 %v5012_v18, %v1279_v11  ;;  %v1397_v16 = vmul.f32 %v4786_v9, %v5386_v0  ;;  %3489 = vpow2.f32 %v2031_v38 }
 0x1cd   : > { %v1593_v46 = vmul.f32 %v4817_v54, %v5386_v0  ;;  %v1789_v37 = vmul.f32 %v4920_v7, %v5386_v0  ;;  %v1002_v12 = vmul.f32 %v3484_v24, %v5334_v32  ;;  %3491 = vpow2.f32 %v2033_v8 }
 0x1ce   : > { %v3486_v50 = vpop.eup %3485  ;;  %v5460_v62 = vadd.f32 %v1871_v47, %v1837_v58  ;;  %v1246_v23 = vrot.slane %v5386_v0, 1  ;;  %v1429_v2 = vadd.f32 %v1397_v16, %v1331_v39 }
 0x1cf   : > { %v3488_v13 = vpop.eup %3487  ;;  %v1625_v30 = vadd.f32 %v1593_v46, %v1559_v60  ;;  %v1821_v17 = vadd.f32 %v1789_v37, %v1755_v49  ;;  %v1154_v22 = vrot.slane %v1002_v12, 7  ;;  %v1247_v26 = vrot.slane %v1002_v12, 1 }
 0x1d0   : > { %v1398_v14 = vmul.f32 %v4786_v9, %v1002_v12  ;;  %v1594_v11 = vmul.f32 %v4817_v54, %v1002_v12  ;;  %v1790_v20 = vmul.f32 %v4920_v7, %v1002_v12  ;;  %v1003_v32 = vmul.f32 %v3486_v50, %v5337_v29  ;;  %v3717_v29 = vld [vmem:[%s6162_s4 + $0x2] ss:$0 sm:$0xff] }
 0x1d1   : > { %v1204_v58 = vsel %vm1185_vm1, %v1153_v19, %v1154_v22  ;;  %v1295_v53 = vsel %vm1276_vm2, %v1247_v26, %v4078_v55  ;;  %v1296_v38 = vsel %vm1276_vm2, %v1246_v23, %v1247_v26  ;;  %v5477_v9 = vmul.f32 %v3488_v13, %v5340_v33  ;;  %v3718_v23 = vld [vmem:[%s6162_s4 + $0x1] ss:$0 sm:$0xff] }
 0x1d2   : > { %v1332_v54 = vmul.f32 %v5438_v27, %v1204_v58  ;;  %v1463_v0 = vmul.f32 %v3717_v29, %v1296_v38  ;;  %v1464_v63 = vmul.f32 %v3717_v29, %v1295_v53  ;;  %v1528_v19 = vmul.f32 %v4842_v48, %v1204_v58  ;;  %v5484_v34 = vpop.eup %3489 }
 0x1d3   : > { %v1659_v8 = vmul.f32 %v4897_v36, %v1296_v38  ;;  %v1660_v47 = vmul.f32 %v4897_v36, %v1295_v53  ;;  %v1724_v39 = vmul.f32 %v4959_v35, %v1204_v58  ;;  %v1855_v33 = vmul.f32 %v5012_v18, %v1296_v38  ;;  %v5490_v60 = vpop.eup %3491 }
 0x1d4   : > { %v1430_v49 = vadd.f32 %v1398_v14, %v1332_v54  ;;  %v1560_v24 = vadd.f32 %v1528_v19, %v5414_v21  ;;  %v1856_v16 = vmul.f32 %v5012_v18, %v1295_v53  ;;  %v1156_v46 = vrot.slane %v1003_v32, 7  ;;  %v3719_v54 = vld [vmem:[%s6162_s4 + $0x4] ss:$0 sm:$0xff] }
 0x1d5   : > { %v1756_v37 = vadd.f32 %v1724_v39, %v1690_v1  ;;  %v1887_v12 = vadd.f32 %v1855_v33, %v1821_v17  ;;  %v1249_v50 = vrot.slane %v1003_v32, 1  ;;  %v1399_v13 = vmul.f32 %v3718_v23, %v1003_v32 }
 0x1d6   : > { %v1496_v22 = vadd.f32 %v1464_v63, %v1430_v49  ;;  %v1626_v26 = vadd.f32 %v1594_v11, %v1560_v24  ;;  %v1203_v58 = vsel %vm1185_vm1, %v4063_v44, %v1156_v46  ;;  %v1495_v14 = vadd.f32 %v1463_v0, %v1429_v2 }
 0x1d7   : > { %v1822_v38 = vadd.f32 %v1790_v20, %v1756_v37  ;;  %v1923_v21 = vmul.f32 %v5141_v51, %v1887_v12  ;;  %v1333_v53 = vmul.f32 %v5438_v27, %v1203_v58  ;;  %v1529_v1 = vmul.f32 %v4842_v48, %v1203_v58 }
 0x1d8   : > { %v1692_v17 = vadd.f32 %v1660_v47, %v1626_v26  ;;  %v1595_v19 = vmul.f32 %v3719_v54, %v1003_v32  ;;  %v1691_v63 = vadd.f32 %v1659_v8, %v1625_v30  ;;  %v1725_v11 = vmul.f32 %v4959_v35, %v1203_v58 }
 0x1d9   : > { %v1888_v39 = vadd.f32 %v1856_v16, %v1822_v38  ;;  %v5508_v44 = vadd.f32 %v5183_v28, %v1923_v21  ;;  %v1431_v2 = vadd.f32 %v1399_v13, %v1333_v53  ;;  %v1561_v20 = vadd.f32 %v1529_v1, %v1495_v14 }
 0x1da   : > { %v1757_v0 = vadd.f32 %v1725_v11, %v1691_v63  ;;  %v1791_v33 = vmul.f32 %v4920_v7, %v1003_v32  ;;  %v1157_v48 = vrot.slane %v5477_v9, 7  ;;  %v1250_v47 = vrot.slane %v5477_v9, 1 }
 0x1db   : > { %v1924_v49 = vmul.f32 %v5141_v51, %v1888_v39  ;;  %v1991_v24 = vsub.f32 0.0, %v5508_v44  ;;  %v1627_v30 = vadd.f32 %v1595_v19, %v1561_v20  ;;  %v1400_v8 = vmul.f32 %v3718_v23, %v5477_v9  ;;  %v3720_v23 = vld [vmem:[%s6162_s4 + $0x3] ss:$0 sm:$0xff]  ;;  %v6279_v20 = vld [vmem:[#allocation17_spill] sm:$0xff] }
 0x1dc   : > { %v1823_v16 = vadd.f32 %v1791_v33, %v1757_v0  ;;  %v1202_v37 = vsel %vm1185_vm1, %v1156_v46, %v1157_v48  ;;  %v1293_v12 = vsel %vm1276_vm2, %v1250_v47, %v4078_v55  ;;  %v1294_v32 = vsel %vm1276_vm2, %v1249_v50, %v1250_v47  ;;  %v6280_v47 = vld [vmem:[#allocation18_spill] sm:$0xff] }
 0x1dd   : > { %v5524_v13 = vadd.f32 %v5183_v28, %v1924_v49  ;;  %v2035_v26 = vmul.f32 1.442695, %v1991_v24  ;;  %v1334_v58 = vmul.f32 %v5438_v27, %v1202_v37  ;;  %v1465_v14 = vmul.f32 %v3717_v29, %v1294_v32 }
 0x1de   : > { %v1466_v38 = vmul.f32 %v3717_v29, %v1293_v12  ;;  %v1530_v46 = vmul.f32 %v3720_v23, %v1202_v37  ;;  %v1596_v21 = vmul.f32 %v3719_v54, %v5477_v9  ;;  %v1661_v53 = vmul.f32 %v4897_v36, %v1294_v32 }
 0x1df   : > { %v1992_v61 = vsub.f32 0.0, %v5524_v13  ;;  %3493 = vpow2.f32 %v2035_v26  ;;  %v1432_v50 = vadd.f32 %v1400_v8, %v1334_v58  ;;  %v1497_v1 = vadd.f32 %v1465_v14, %v1431_v2  ;;  %v6283_v58 = vld [vmem:[#allocation19_spill] sm:$0xff] }
 0x1e0   : > { %v1562_v19 = vadd.f32 %v1530_v46, %v1496_v22  ;;  %v1662_v63 = vmul.f32 %v4897_v36, %v1293_v12  ;;  %v1693_v27 = vadd.f32 %v1661_v53, %v1627_v30  ;;  %v1726_v29 = vmul.f32 %v4959_v35, %v1202_v37  ;;  %v6281_v36 = vld [vmem:[#allocation21_spill] sm:$0xff]  ;;  %v6282_v35 = vld [vmem:[#allocation16_spill] sm:$0xff] }
 0x1e1   : > { %v2037_v11 = vmul.f32 1.442695, %v1992_v61  ;;  %v1498_v39 = vadd.f32 %v1466_v38, %v1432_v50  ;;  %v1563_v0 = vadd.f32 %v6279_v20, %v1497_v1  ;;  %v1792_v54 = vmul.f32 %v4920_v7, %v5477_v9  ;;  %v6287_v61 = vld [vmem:[#allocation26_spill] sm:$0xff]  ;;  %v6288_v1 = vld [vmem:[#allocation24_spill] sm:$0xff]  ;;  %v6291_v20 = vld [vmem:[#allocation35_spill] sm:$0xff] }
 0x1e2   : > { %v1628_v33 = vadd.f32 %v1596_v21, %v1562_v19  ;;  %v1758_v48 = vadd.f32 %v1726_v29, %v1692_v17  ;;  %v1759_v49 = vadd.f32 %v6280_v47, %v1693_v27  ;;  %v1857_v24 = vmul.f32 %v5012_v18, %v1294_v32  ;;  %v6284_v32 = vld [vmem:[#allocation20_spill] sm:$0xff]  ;;  %v6286_v21 = vld [vmem:[#allocation25_spill] sm:$0xff]  ;;  %v6290_v29 = vld [vmem:[#allocation22_spill] sm:$0xff] }
 0x1e3   : > { %v5542_v22 = vadd.f32 %v5309_v45, %v5444_v15  ;;  %v1564_v2 = vadd.f32 %v6281_v36, %v1498_v39  ;;  %v1629_v30 = vadd.f32 %v6282_v35, %v1563_v0  ;;  %v1858_v8 = vmul.f32 %v5012_v18, %v1293_v12  ;;  %v6285_v15 = vld [vmem:[#allocation23_spill] sm:$0xff] }
 0x1e4   : > { %v1694_v37 = vadd.f32 %v1662_v63, %v1628_v33  ;;  %v1824_v26 = vadd.f32 %v1792_v54, %v1758_v48  ;;  %v1825_v7 = vadd.f32 %v6283_v58, %v1759_v49  ;;  %v1889_v9 = vadd.f32 %v1857_v24, %v1823_v16  ;;  %v6289_v63 = vld [vmem:[#allocation28_spill] sm:$0xff]  ;;  %v6292_v54 = vld [vmem:[#allocation29_spill] sm:$0xff]  ;;  %v2224_v48 = vld [vmem:[%s6165_s7 + $0x78] sm:$0xff] }
 0x1e5   : > { %v3494_v17 = vpop.eup %3493  ;;  %v1708_v14 = vadd.f32 %v5442_v6, %v5446_v4  ;;  %3495 = vpow2.f32 %v2037_v11  ;;  %v1630_v38 = vadd.f32 %v6284_v32, %v1564_v2  ;;  %v1695_v23 = vadd.f32 %v6285_v15, %v1629_v30  ;;  %v6293_v47 = vld [vmem:[#allocation27_spill] sm:$0xff]  ;;  %2226 = vmatpush.msrb.mxu1 %v2224_v48  ;;  %v3721_v2 = vld [vmem:[%s6162_s4 + $0x7] ss:$0 sm:$0xff]  ;;  %v6296_v15 = vld [vmem:[#allocation37_spill] sm:$0xff] }
 0x1e6   : > { %v5554_v46 = vadd.f32 %v5425_v10, %v5448_v25  ;;  %v1760_v12 = vadd.f32 %v6286_v21, %v1694_v37  ;;  %v1890_v53 = vadd.f32 %v1858_v8, %v1824_v26  ;;  %v1891_v50 = vadd.f32 %v6287_v61, %v1825_v7  ;;  %v6294_v8 = vld [vmem:[#allocation30_spill] sm:$0xff]  ;;  %v6295_v26 = vld [vmem:[#allocation36_spill] sm:$0xff]  ;;  %v2218_v48 = vld [vmem:[%s6165_s7 + $0x48] sm:$0xff] }
 0x1e7   : > { %v2085_v16 = vadd.f32 1.0, %v5484_v34  ;;  %v1696_v19 = vadd.f32 %v6288_v1, %v1630_v38  ;;  %v1761_v6 = vadd.f32 %v6289_v63, %v1695_v23  ;;  %v1925_v4 = vmul.f32 %v5141_v51, %v1889_v9  ;;  %v2222_v9 = vld [vmem:[%s6165_s7 + $0x68] sm:$0xff] }
 0x1e8   : > { %v2086_v27 = vadd.f32 1.0, %v5490_v60  ;;  %v1826_v11 = vadd.f32 %v6290_v29, %v1760_v12  ;;  %v1926_v10 = vmul.f32 %v5141_v51, %v1890_v53  ;;  %v1927_v25 = vmul.f32 %v5141_v51, %v1891_v50  ;;  %v2223_v60 = vld [vmem:[%s6165_s7 + $0x70] sm:$0xff]  ;;  %v2221_v53 = vld [vmem:[%s6165_s7 + $0x60] sm:$0xff] }
 0x1e9   : > { %v2087_v39 = vadd.f32 1.0, %v3494_v17  ;;  %v1762_v0 = vadd.f32 %v6291_v20, %v1696_v19  ;;  %v1827_v33 = vadd.f32 %v6292_v54, %v1761_v6  ;;  %v5569_v34 = vadd.f32 %v5183_v28, %v1925_v4  ;;  %2227 = vmatpush.msrb.mxu1 %v2223_v60  ;;  %v2220_v4 = vld [vmem:[%s6165_s7 + $0x58] sm:$0xff] }
 0x1ea   : > { %v1892_v49 = vadd.f32 %v6293_v47, %v1826_v11  ;;  %v5579_v24 = vadd.f32 %v5183_v28, %v1926_v10  ;;  %v5582_v36 = vadd.f32 %v5183_v28, %v1927_v25  ;;  %v1807_v35 = vmul.f32 0.0, %v3721_v2  ;;  %v2219_v25 = vld [vmem:[%s6165_s7 + $0x50] sm:$0xff] }
 0x1eb   : > { %v3496_v30 = vpop.eup %3495  ;;  %3497 = vrcp.f32 %v2085_v16  ;;  %v1828_v37 = vadd.f32 %v6294_v8, %v1762_v0  ;;  %v1893_v58 = vadd.f32 %v6295_v26, %v1827_v33  ;;  %v1993_v7 = vsub.f32 0.0, %v5569_v34  ;;  %2228 = vmatpush.msrb.mxu1 %v2222_v9  ;;  %v2216_v9 = vld [vmem:[%s6165_s7 + $0x38] sm:$0xff] }
 0x1ec   : > { %3499 = vrcp.f32 %v2086_v27  ;;  %v1928_v17 = vmul.f32 %v5141_v51, %v1892_v49  ;;  %v1994_v32 = vsub.f32 0.0, %v5579_v24  ;;  %v1995_v38 = vsub.f32 0.0, %v5582_v36 }
 0x1ed   : > { %3501 = vrcp.f32 %v2087_v39  ;;  %v1894_v23 = vadd.f32 %v6296_v15, %v1828_v37  ;;  %v1929_v21 = vmul.f32 %v5141_v51, %v1893_v58  ;;  %v2039_v12 = vmul.f32 1.442695, %v1993_v7  ;;  %2229 = vmatpush.msrb.mxu1 %v2221_v53 }
 0x1ee   : > { %v2088_v61 = vadd.f32 1.0, %v3496_v30  ;;  %v5602_v50 = vadd.f32 %v5183_v28, %v1928_v17  ;;  %v2041_v16 = vmul.f32 1.442695, %v1994_v32  ;;  %v2043_v1 = vmul.f32 1.442695, %v1995_v38 }
 0x1ef   : > { %v1774_v19 = vadd.f32 %v5309_v45, %v1708_v14  ;;  %v1930_v63 = vmul.f32 %v5141_v51, %v1894_v23  ;;  %v5607_v6 = vadd.f32 %v5183_v28, %v1929_v21  ;;  %3503 = vpow2.f32 %v2039_v12  ;;  %2230 = vmatpush.msrb.mxu1 %v2220_v4  ;;  %v2215_v21 = vld [vmem:[%s6165_s7 + $0x30] sm:$0xff]  ;;  %v2214_v4 = vld [vmem:[%s6165_s7 + $0x28] sm:$0xff] }
 0x1f0   : > { %v1996_v27 = vsub.f32 0.0, %v5602_v50  ;;  %3505 = vpow2.f32 %v2041_v16  ;;  %v1839_v29 = vadd.f32 %v1807_v35, %v5542_v22  ;;  %v1873_v11 = vmul.f32 %v5012_v18, %v4078_v55 }
 0x1f1   : > { %v3498_v45 = vpop.eup %3497  ;;  %v5617_v14 = vadd.f32 %v5183_v28, %v1930_v63  ;;  %v1997_v10 = vsub.f32 0.0, %v5607_v6  ;;  %3507 = vpow2.f32 %v2043_v1  ;;  %v1937_v39 = vmul.f32 %v5141_v51, %v5294_v3  ;;  %2231 = vmatpush.msrb.mxu1 %v2219_v25 }
 0x1f2   : > { %v3500_v20 = vpop.eup %3499  ;;  %v5627_v22 = vmul.f32 %v5377_v42, %v5201_v57  ;;  %v1904_v55 = vadd.f32 %v5451_v59, %v5554_v46  ;;  %3509 = vrcp.f32 %v2088_v61  ;;  %v2045_v18 = vmul.f32 1.442695, %v1996_v27 }
 0x1f3   : > { %v3502_v0 = vpop.eup %3501  ;;  %v1998_v54 = vsub.f32 0.0, %v5617_v14  ;;  %v2047_v33 = vmul.f32 1.442695, %v1997_v10  ;;  %v1840_v3 = vadd.f32 %v1807_v35, %v1774_v19  ;;  %v6297_v60 = vsub.f32 0.0, %v5258_v41  ;;  %v2217_v35 = vld [vmem:[%s6165_s7 + $0x40] sm:$0xff]  ;;  %2232 = vmatpush.msrb.mxu1 %v2218_v48 }
 0x1f4   : > { %v2178_v57 = vadd.f32 %v5240_v31, %v5380_v40  ;;  %v1939_v42 = vmul.f32 %v5141_v51, %v5460_v62  ;;  %3511 = vpow2.f32 %v2045_v18  ;;  %v1905_v59 = vadd.f32 %v1873_v11, %v1839_v29 }
 0x1f5   : > { %v2059_v47 = vmul.f32 1.442695, %v6297_v60  ;;  %v3504_v46 = vpop.eup %3503  ;;  %v5642_v49 = vmul.f32 %v3498_v45, %v5389_v56  ;;  %3513 = vpow2.f32 %v2047_v33  ;;  %v2049_v2 = vmul.f32 1.442695, %v1998_v54  ;;  %2233 = vmatpush.msrb.mxu1 %v2217_v35 }
 0x1f6   : > { %v5648_v30 = vadd.f32 %v5183_v28, %v1937_v39  ;;  %v3506_v31 = vpop.eup %3505  ;;  %v2179_v8 = vadd.f32 %v2178_v57, %v5627_v22  ;;  %v1940_v62 = vmul.f32 %v5141_v51, %v1904_v55  ;;  %v2089_v37 = vadd.f32 1.0, %v3504_v46  ;;  %v6298_v55 = vld [vmem:[#allocation42_spill] sm:$0xff] }
 0x1f7   : > { %v5654_v56 = vadd.f32 %v5183_v28, %v5357_v43  ;;  %v3508_v26 = vpop.eup %3507  ;;  %v5657_v58 = vmul.f32 %v3500_v20, %v5397_v52  ;;  %3515 = vpow2.f32 %v2049_v2  ;;  %v2090_v7 = vadd.f32 1.0, %v3506_v31  ;;  %2234 = vmatpush.msrb.mxu1 %v2216_v9 }
 0x1f8   : > { %v1906_v17 = vadd.f32 %v1873_v11, %v1840_v3  ;;  %v3510_v32 = vpop.eup %3509  ;;  %v2091_v38 = vadd.f32 1.0, %v3508_v26  ;;  %3517 = vrcp.f32 %v2089_v37  ;;  %v1941_v15 = vmul.f32 %v5141_v51, %v1905_v59  ;;  %v2212_v3 = vld [vmem:[%s6165_s7 + $0x18] sm:$0xff] }
 0x1f9   : > { %v5664_v43 = vadd.f32 %v5183_v28, %v1939_v42  ;;  %v2180_v23 = vadd.f32 %v2179_v8, %v5642_v49  ;;  %v5668_v52 = vmul.f32 %v3502_v0, %v5508_v44  ;;  %3519 = vrcp.f32 %v2090_v7  ;;  %2235 = vmatpush.msrb.mxu1 %v2215_v21  ;;  %v6299_v42 = vld [vmem:[#allocation33_spill] sm:$0xff] }
 0x1fa   : > { %v2005_v12 = vsub.f32 0.0, %v5648_v30  ;;  %v3512_v53 = vpop.eup %3511  ;;  %3521 = vrcp.f32 %v2091_v38  ;;  %v5675_v61 = vadd.f32 %v5183_v28, %v1940_v62  ;;  %v2006_v16 = vsub.f32 0.0, %v5654_v56  ;;  %v6300_v62 = vld [vmem:[#allocation45_spill] sm:$0xff] }
 0x1fb   : > { %v3514_v1 = vpop.eup %3513  ;;  %v2181_v19 = vadd.f32 %v2180_v23, %v5657_v58  ;;  %v5680_v44 = vmul.f32 %v3510_v32, %v5524_v13  ;;  %v2092_v63 = vadd.f32 1.0, %v3512_v53  ;;  %v1942_v27 = vmul.f32 %v5141_v51, %v1906_v17  ;;  %v2213_v13 = vld [vmem:[%s6165_s7 + $0x20] sm:$0xff]  ;;  %2236 = vmatpush.msrb.mxu1 %v2214_v4  ;;  %v6301_v32 = vld [vmem:[#allocation47_spill] sm:$0xff] }
 0x1fc   : > { %v2093_v29 = vadd.f32 1.0, %v3514_v1  ;;  %v2007_v11 = vsub.f32 0.0, %v5664_v43  ;;  %3523 = vpow2.f32 %v2059_v47  ;;  %v5692_v25 = vadd.f32 %v5183_v28, %v1941_v15 }
 0x1fd   : > { %v3516_v45 = vpop.eup %3515  ;;  %v2182_v10 = vadd.f32 %v2181_v19, %v5668_v52  ;;  %3525 = vrcp.f32 %v2092_v63  ;;  %v2063_v39 = vmul.f32 1.442695, %v2005_v12  ;;  %v2095_v51 = vadd.f32 1.0, %v6298_v55  ;;  %2237 = vmatpush.msrb.mxu1 %v2213_v13  ;;  %v2209_v12 = vld [vmem:[%s6165_s7] sm:$0xff] }
 0x1fe   : > { %v3518_v20 = vpop.eup %3517  ;;  %v2094_v18 = vadd.f32 1.0, %v3516_v45  ;;  %3527 = vrcp.f32 %v2093_v29  ;;  %v2008_v0 = vsub.f32 0.0, %v5675_v61  ;;  %v5704_v60 = vadd.f32 %v5183_v28, %v1942_v27  ;;  %v2211_v28 = vld [vmem:[%s6165_s7 + $0x10] sm:$0xff] }
 0x1ff   : > { %v3520_v54 = vpop.eup %3519  ;;  %v2183_v33 = vadd.f32 %v2182_v10, %v5680_v44  ;;  %v5698_v48 = vmul.f32 %v3518_v20, %v5569_v34  ;;  %v2065_v47 = vmul.f32 1.442695, %v2006_v16  ;;  %v2096_v59 = vadd.f32 1.0, %v6299_v42  ;;  %2238 = vmatpush.msrb.mxu1 %v2212_v3 }
 0x200   : > { %v3522_v57 = vpop.eup %3521  ;;  %3529 = vrcp.f32 %v2094_v18  ;;  %v5708_v46 = vmul.f32 %v3520_v54, %v5579_v24  ;;  %v2067_v2 = vmul.f32 1.442695, %v2007_v11  ;;  %v2009_v31 = vsub.f32 0.0, %v5692_v25 }
 0x201   : > { %v5711_v34 = vmul.f32 %v3522_v57, %v5582_v36  ;;  %v2184_v35 = vadd.f32 %v2183_v33, %v5698_v48  ;;  %3531 = vpow2.f32 %v2063_v39  ;;  %v2097_v37 = vadd.f32 1.0, %v6300_v62  ;;  %v2210_v36 = vld [vmem:[%s6165_s7 + $0x8] sm:$0xff]  ;;  %2239 = vmatpush.msrb.mxu1 %v2211_v28  ;;  %v6302_v39 = vld [vmem:[#allocation39_spill] sm:$0xff]  ;;  %v6304_v57 = vld [vmem:[#allocation34_spill] sm:$0xff] }
 0x202   : > { %v3524_v8 = vpop.eup %3523  ;;  %3533 = vrcp.f32 %v2095_v51  ;;  %v2010_v7 = vsub.f32 0.0, %v5704_v60  ;;  %v2069_v9 = vmul.f32 1.442695, %v2008_v0  ;;  %v2098_v38 = vadd.f32 1.0, %v6301_v32 }
 0x203   : > { %v3526_v24 = vpop.eup %3525  ;;  %v2185_v26 = vadd.f32 %v2184_v35, %v5708_v46  ;;  %3535 = vpow2.f32 %v2065_v47  ;;  %v2071_v53 = vmul.f32 1.442695, %v2009_v31  ;;  %2240 = vmatpush.msrb.mxu1 %v2210_v36  ;;  %v2099_v1 = vadd.f32 1.0, %v3524_v8  ;;  %v6305_v31 = vld [vmem:[#allocation43_spill] sm:$0xff] }
 0x204   : > { %v3528_v17 = vpop.eup %3527  ;;  %3537 = vrcp.f32 %v2096_v59  ;;  %v5726_v15 = vmul.f32 %v3526_v24, %v5602_v50  ;;  %v2073_v63 = vmul.f32 1.442695, %v2010_v7  ;;  %v2100_v27 = vadd.f32 1.0, %v5190_v5  ;;  %v6303_v5 = vld [vmem:[#allocation41_spill] sm:$0xff] }
 0x205   : > { %v5729_v23 = vmul.f32 %v3528_v17, %v5607_v6  ;;  %v2186_v21 = vadd.f32 %v2185_v26, %v5711_v34  ;;  %3539 = vpow2.f32 %v2067_v2  ;;  %2241 = vmatpush.msrb.mxu1 %v2209_v12  ;;  %v6306_v17 = vld [vmem:[#allocation51_spill] sm:$0xff] }
 0x206   : > { %v3530_v16 = vpop.eup %3529  ;;  %3541 = vrcp.f32 %v2097_v37 }
 0x207   : > { %v3532_v19 = vpop.eup %3531  ;;  %v2187_v50 = vadd.f32 %v2186_v21, %v5726_v15  ;;  %3543 = vpow2.f32 %v2069_v9  ;;  %v5737_v6 = vmul.f32 %v3530_v16, %v5617_v14 }
 0x208   : > { %v3534_v4 = vpop.eup %3533  ;;  %3545 = vrcp.f32 %v2098_v38  ;;  %v2101_v10 = vadd.f32 1.0, %v3532_v19 }
 0x209   : > { %v3536_v29 = vpop.eup %3535  ;;  %v2188_v11 = vadd.f32 %v2187_v50, %v5729_v23  ;;  %3547 = vpow2.f32 %v2071_v53  ;;  %v5742_v20 = vmul.f32 %v3534_v4, %v6302_v39 }
 0x20a   : > { %v3538_v45 = vpop.eup %3537  ;;  %3549 = vrcp.f32 %v2099_v1  ;;  %v2102_v51 = vadd.f32 1.0, %v3536_v29 }
 0x20b   : > { %v3540_v13 = vpop.eup %3539  ;;  %3551 = vpow2.f32 %v2073_v63  ;;  %v2189_v14 = vadd.f32 %v2188_v11, %v5737_v6  ;;  %v5746_v0 = vmul.f32 %v3538_v45, %v6303_v5 }
 0x20c   : > { %v3542_v55 = vpop.eup %3541  ;;  %3553 = vrcp.f32 %v2100_v27  ;;  %v2103_v3 = vadd.f32 1.0, %v3540_v13 }
 0x20d   : > { %v3544_v18 = vpop.eup %3543  ;;  %v2190_v54 = vadd.f32 %v2189_v14, %v5742_v20  ;;  %3555 = vrcp.f32 %v2101_v10  ;;  %v5750_v42 = vmul.f32 %v3542_v55, %v6304_v57 }
 0x20e   : > { %v3546_v33 = vpop.eup %3545  ;;  %v2104_v35 = vadd.f32 1.0, %v3544_v18  ;;  %3557 = vrcp.f32 %v2102_v51 }
 0x20f   : > { %v3548_v47 = vpop.eup %3547  ;;  %v2191_v59 = vadd.f32 %v2190_v54, %v5746_v0  ;;  %v5754_v8 = vmul.f32 %v3546_v33, %v6305_v31  ;;  %3559 = vrcp.f32 %v2103_v3 }
 0x210   : > { %v3550_v2 = vpop.eup %3549  ;;  %v2105_v24 = vadd.f32 1.0, %v3548_v47  ;;  %3561 = vrcp.f32 %v2104_v35 }
 0x211   : > { %v3552_v28 = vpop.eup %3551  ;;  %v2192_v62 = vadd.f32 %v2191_v59, %v5750_v42  ;;  %v5758_v26 = vmul.f32 %v3550_v2, %v5258_v41 }
 0x212   : > { %v3554_v37 = vpop.eup %3553  ;;  %v2106_v9 = vadd.f32 1.0, %v3552_v28  ;;  %3563 = vrcp.f32 %v2105_v24 }
 0x213   : > { %v2193_v36 = vadd.f32 %v2192_v62, %v5754_v8  ;;  %v3556_v7 = vpop.eup %3555  ;;  %v5762_v32 = vmul.f32 %v3554_v37, %v6306_v17  ;;  %v2266_v17 = vld [vmem:[%s6168_s10] sm:$0x1] }
 0x214   : > { %v3558_v21 = vpop.eup %3557  ;;  %v5766_v12 = vmul.f32 %v3556_v7, %v5648_v30  ;;  %3565 = vrcp.f32 %v2106_v9 }
 0x215   : > { %v2194_v38 = vadd.f32 %v2193_v36, %v5758_v26  ;;  %v3560_v16 = vpop.eup %3559  ;;  %v5770_v41 = vmul.f32 %v3558_v21, %v5654_v56 }
 0x216   : > { %v3562_v19 = vpop.eup %3561  ;;  %v5774_v50 = vmul.f32 %v3560_v16, %v5664_v43 }
 0x217   : > { %v2195_v53 = vadd.f32 %v2194_v38, %v5762_v32  ;;  %v5778_v27 = vmul.f32 %v3562_v19, %v5675_v61 }
 0x218   : > { %v3564_v4 = vpop.eup %3563 }
 0x219   : > { %v2196_v1 = vadd.f32 %v2195_v53, %v5766_v12  ;;  %v5782_v11 = vmul.f32 %v3564_v4, %v5692_v25  ;;  %v2225_v25 = vld [vmem:[%s6166_s8] sm:$0x1]  ;;  %v3154_v53 = vld [vmem:[%s6169_s11 + $0x38] sm:$0xff] }
 0x21a   : > { %v3566_v29 = vpop.eup %3565  ;;  %2423 = vmatpush.bf16.msra.mxu2 %v3154_v53  ;;  %3237 = vmatpush.bf16.msra.mxu3 %v3154_v53  ;;  %v3151_v4 = vld [vmem:[%s6169_s11 + $0x20] sm:$0xff]  ;;  %v6312_v53 = vld [vmem:[#allocation46_spill] sm:$0xff] }
 0x21b   : > { %v2197_v63 = vadd.f32 %v2196_v1, %v5770_v41  ;;  %v5786_v45 = vmul.f32 %v3566_v29, %v5704_v60  ;;  %v2265_v60 = vld [vmem:[%s6167_s9] sm:$0xff]  ;;  %v3153_v1 = vld [vmem:[%s6169_s11 + $0x30] sm:$0xff] }
 0x21c   : > { %2286 = vmatpush.msra.mxu1 %v2265_v60 }
 0x21d   : > { %v2198_v30 = vadd.f32 %v2197_v63, %v5774_v50  ;;  %v3152_v63 = vld [vmem:[%s6169_s11 + $0x28] sm:$0xff] }
 0x21e   : > { %2424 = vmatpush.bf16.msra.mxu2 %v3153_v1  ;;  %3238 = vmatpush.bf16.msra.mxu3 %v3153_v1 }
 0x21f   : > { %v2199_v56 = vadd.f32 %v2198_v30, %v5778_v27 }
 0x221   : > { %v2200_v43 = vadd.f32 %v2199_v56, %v5782_v11  ;;  %v3150_v56 = vld [vmem:[%s6169_s11 + $0x18] sm:$0xff] }
 0x222   : > { %2425 = vmatpush.bf16.msra.mxu2 %v3152_v63  ;;  %3239 = vmatpush.bf16.msra.mxu3 %v3152_v63 }
 0x223   : > { %v2201_v10 = vadd.f32 %v2200_v43, %v5786_v45  ;;  %v3149_v43 = vld [vmem:[%s6169_s11 + $0x10] sm:$0xff] }
 0x225   : > { %v2202_v13 = vrot.slane %v2201_v10, 4 }
 0x226   : > { %2426 = vmatpush.bf16.msra.mxu2 %v3151_v4  ;;  %3240 = vmatpush.bf16.msra.mxu3 %v3151_v4  ;;  %v6313_v4 = vld [vmem:[#allocation52_spill] sm:$0xff] }
 0x227   : > { %v2203_v39 = vadd.f32 %v2202_v13, %v2201_v10 }
 0x229   : > { %v2204_v14 = vrot.slane %v2203_v39, 2 }
 0x22a   : > { %2427 = vmatpush.bf16.msra.mxu2 %v3150_v56  ;;  %3241 = vmatpush.bf16.msra.mxu3 %v3150_v56 }
 0x22b   : > { %v2205_v61 = vadd.f32 %v2204_v14, %v2203_v39  ;;  %v3148_v39 = vld [vmem:[%s6169_s11 + $0x8] sm:$0xff] }
 0x22d   : > { %v2206_v55 = vrot.slane %v2205_v61, 1 }
 0x22e   : > { %2428 = vmatpush.bf16.msra.mxu2 %v3149_v43  ;;  %3242 = vmatpush.bf16.msra.mxu3 %v3149_v43 }
 0x22f   : > { %v2207_v51 = vadd.f32 %v2206_v55, %v2205_v61 }
 0x231   : > { %v2208_v18 = vmul.f32 0.00390625, %v2207_v51 }
 0x232   : > { %2429 = vmatpush.bf16.msra.mxu2 %v3148_v39  ;;  %3243 = vmatpush.bf16.msra.mxu3 %v3148_v39 }
 0x233   : > { %2242 = vmatmul.f32.vlgmr.msrb.gmra.mxu1 %v2208_v18  ;;  %v3147_v18 = vld [vmem:[%s6169_s11] sm:$0xff] }
 0x236   : > { %2430 = vmatpush.bf16.msra.mxu2 %v3147_v18  ;;  %3244 = vmatpush.bf16.msra.mxu3 %v3147_v18 }
 0x2b0   : > { %v2243_v5 = vpop.f32.mrf.mxu1 }
 0x2b1   : > { %v2244_v54 = vadd.f32 %v2243_v5, %v2225_v25 }
 0x2b3   : > { %v2246_v33 = vsub.f32 0.0, %v2244_v54 }
 0x2b5   : > { %v2247_v3 = vmul.f32 1.442695, %v2246_v33 }
 0x2b7   : > { %3567 = vpow2.f32 %v2247_v3  ;;  %v6307_v3 = vld [vmem:[#allocation38_spill] sm:$0xff] }
 0x2bd   : > { %v3568_v47 = vpop.eup %3567 }
 0x2be   : > { %v2249_v57 = vadd.f32 1.0, %v3568_v47 }
 0x2c0   : > { %3569 = vrcp.f32 %v2249_v57  ;;  %v2261_v28 = vand.u32 2147483648, %v2249_v57  ;;  %v2259_v62 = vand.u32 2147483647, %v2249_v57  ;;  %vm2255_vm4 = vweird.f32 %v2249_v57 }
 0x2c2   : > { %v2262_v24 = vor.u32 1.1754944e-38, %v2261_v28  ;;  %vm2260_vm6 = vcmp.eq.f32.partialorder %v2259_v62, 8.507059e+37  ;;  %v6309_v62 = vld [vmem:[#allocation31_spill] sm:$0xff] }
 0x2c6   : > { %v3570_v59 = vpop.eup %3569 }
 0x2c7   : > { %v2251_v2 = vmul.f32 %v3570_v59, %v2249_v57  ;;  %vm2256_vm3 = vweird.f32 %v3570_v59  ;;  %v6308_v57 = vld [vmem:[#allocation40_spill] sm:$0xff] }
 0x2c8   : > { %vm2257_vm5 = vmor %vm2255_vm4, %vm2256_vm3 }
 0x2c9   : > { %v2252_v35 = vsub.f32 1.0, %v2251_v2 }
 0x2cb   : > { %v2253_v31 = vmul.f32 %v3570_v59, %v2252_v35 }
 0x2cd   : > { %v2254_v37 = vadd.f32 %v3570_v59, %v2253_v31 }
 0x2cf   : > { %v2258_v36 = vsel %vm2257_vm5, %v3570_v59, %v2254_v37 }
 0x2d0   : > { %v2263_v7 = vsel %vm2260_vm6, %v2262_v24, %v2258_v36  ;;  %v6310_v24 = vld [vmem:[#allocation32_spill] sm:$0xff] }
 0x2d1   : > { %v2264_v9 = vmul.f32 %v2263_v7, %v2244_v54 }
 0x2d3   : > { %3090 = vmatmul.msk.f32.vlgmr.msra.gmra.mxu1 %vm2267_vm7, %v2264_v9 }
 0x350   : > { %v2288_v38 = vpop.f32.mrf.mxu1 }
 0x351   : > { %v2289_v21 = vadd.f32 %v2288_v38, %v2266_v17 }
 0x353   : > { %v2291_v16 = vsub.f32 0.0, %v2289_v21  ;;  %v6311_v21 = vld [vmem:[#allocation44_spill] sm:$0xff] }
 0x355   : > { %v2292_v19 = vmul.f32 1.442695, %v2291_v16 }
 0x357   : > { %3571 = vpow2.f32 %v2292_v19 }
 0x35d   : > { %v3572_v30 = vpop.eup %3571 }
 0x35e   : > { %v2294_v29 = vadd.f32 1.0, %v3572_v30  ;;  %v6314_v30 = vld [vmem:[#allocation53_spill] sm:$0xff] }
 0x360   : > { %3573 = vrcp.f32 %v2294_v29  ;;  %v2306_v61 = vand.u32 2147483648, %v2294_v29  ;;  %v2304_v51 = vand.u32 2147483647, %v2294_v29  ;;  %vm2300_vm9 = vweird.f32 %v2294_v29 }
 0x362   : > { %v2307_v5 = vor.u32 1.1754944e-38, %v2306_v61  ;;  %vm2305_vm11 = vcmp.eq.f32.partialorder %v2304_v51, 8.507059e+37 }
 0x366   : > { %v3574_v10 = vpop.eup %3573 }
 0x367   : > { %v2296_v13 = vmul.f32 %v3574_v10, %v2294_v29  ;;  %vm2301_vm8 = vweird.f32 %v3574_v10 }
 0x368   : > { %vm2302_vm10 = vmor %vm2300_vm9, %vm2301_vm8 }
 0x369   : > { %v2297_v14 = vsub.f32 1.0, %v2296_v13 }
 0x36b   : > { %v2298_v55 = vmul.f32 %v3574_v10, %v2297_v14 }
 0x36d   : > { %v2299_v25 = vadd.f32 %v3574_v10, %v2298_v55 }
 0x36f   : > { %v2303_v54 = vsel %vm2302_vm10, %v3574_v10, %v2299_v25 }
 0x370   : > { %v2308_v60 = vsel %vm2305_vm11, %v2307_v5, %v2303_v54 }
 0x371   : > { %v2310_v33 = vperm.slane %v2308_v60, 0 }
 0x373   : > { %v2311_v47 = vmul.f32 %v2310_v33, %v6307_v3  ;;  %v2312_v59 = vmul.f32 %v2310_v33, %v6308_v57  ;;  %v2327_v2 = vmul.f32 %v2310_v33, %v5711_v34  ;;  %v2328_v35 = vmul.f32 %v2310_v33, %v5726_v15 }
 0x374   : > { %v2313_v37 = vmul.f32 %v2310_v33, %v6309_v62  ;;  %v2314_v36 = vmul.f32 %v2310_v33, %v6310_v24  ;;  %v2329_v7 = vmul.f32 %v2310_v33, %v5729_v23  ;;  %v2330_v9 = vmul.f32 %v2310_v33, %v5737_v6 }
 0x375   : > { %v2343_v28 = vpack.c.bf16 %v2312_v59, %v2311_v47  ;;  %v2351_v31 = vpack.c.bf16 %v2328_v35, %v2327_v2  ;;  %v2315_v34 = vmul.f32 %v2310_v33, %v6311_v21  ;;  %v2316_v15 = vmul.f32 %v2310_v33, %v6312_v53 }
 0x376   : > { %v2344_v17 = vpack.c.bf16 %v2314_v36, %v2313_v37  ;;  %v2352_v38 = vpack.c.bf16 %v2330_v9, %v2329_v7  ;;  %v2331_v16 = vmul.f32 %v2310_v33, %v5742_v20  ;;  %v2332_v1 = vmul.f32 %v2310_v33, %v5746_v0 }
 0x377   : > { %2431 = vmatmul.bf16.vlgmr.msra.gmra.mxu2 %v2343_v28  ;;  %2471 = vmatmul.bf16.vlgmr.msra.gmra.mxu3 %v2351_v31  ;;  %v2345_v19 = vpack.c.bf16 %v2316_v15, %v2315_v34  ;;  %v2317_v23 = vmul.f32 %v2310_v33, %v6313_v4  ;;  %v2318_v6 = vmul.f32 %v2310_v33, %v6314_v30  ;;  %v3157_v4 = vld [vmem:[%s3990_s19] sm:$0xff]  }
 0x378   : > { %v2353_v63 = vpack.c.bf16 %v2332_v1, %v2331_v16  ;;  %v2333_v29 = vmul.f32 %v2310_v33, %v5750_v42  ;;  %v2334_v56 = vmul.f32 %v2310_v33, %v5754_v8  ;;  %v2319_v20 = vmul.f32 %v2310_v33, %v5380_v40 }
 0x379   : > { %v2346_v43 = vpack.c.bf16 %v2318_v6, %v2317_v23  ;;  %v2320_v0 = vmul.f32 %v2310_v33, %v5627_v22  ;;  %v2335_v13 = vmul.f32 %v2310_v33, %v5758_v26  ;;  %v2336_v39 = vmul.f32 %v2310_v33, %v5762_v32  ;;  %v3227_v23 = vld [vmem:[%s3990_s19 + $0x40] sm:$0xff]  }
 0x37a   : > { %v2354_v10 = vpack.c.bf16 %v2334_v56, %v2333_v29  ;;  %v2321_v42 = vmul.f32 %v2310_v33, %v5642_v49  ;;  %v2322_v8 = vmul.f32 %v2310_v33, %v5657_v58  ;;  %v2337_v55 = vmul.f32 %v2310_v33, %v5766_v12 }
 0x37b   : > { %v2347_v14 = vpack.c.bf16 %v2320_v0, %v2319_v20  ;;  %v2355_v61 = vpack.c.bf16 %v2336_v39, %v2335_v13  ;;  %v2338_v51 = vmul.f32 %v2310_v33, %v5770_v41  ;;  %v2323_v22 = vmul.f32 %v2310_v33, %v5668_v52 }
 0x37c   : > { %v2348_v18 = vpack.c.bf16 %v2322_v8, %v2321_v42  ;;  %v2324_v26 = vmul.f32 %v2310_v33, %v5680_v44  ;;  %v2339_v32 = vmul.f32 %v2310_v33, %v5774_v50  ;;  %v2340_v25 = vmul.f32 %v2310_v33, %v5778_v27  ;;  %v5858_v44 = vld [vmem:[%s6170_s12] ss:$0 sm:$0xff] }
 0x37d   : > { %v2356_v40 = vpack.c.bf16 %v2338_v51, %v2337_v55  ;;  %v2325_v58 = vmul.f32 %v2310_v33, %v5698_v48  ;;  %v2326_v12 = vmul.f32 %v2310_v33, %v5708_v46  ;;  %v2341_v41 = vmul.f32 %v2310_v33, %v5782_v11  ;;  %v5863_v50 = vld [vmem:[%s6171_s13] ss:$0 sm:$0xff] }
 0x37e   : > { %v2349_v5 = vpack.c.bf16 %v2324_v26, %v2323_v22  ;;  %v2357_v49 = vpack.c.bf16 %v2340_v25, %v2339_v32  ;;  %v2342_v54 = vmul.f32 %v2310_v33, %v5786_v45  ;;  %v3158_v56 = vunpack.c.l.bf16 %v3157_v4 }
 0x37f   : > { %v2350_v60 = vpack.c.bf16 %v2326_v12, %v2325_v58  ;;  %v3190_v0 = vunpack.c.l.bf16 %v3227_v23  ;;  %v3159_v12 = vunpack.c.h.bf16 %v3157_v4 }
 0x380   : > { %v2358_v52 = vpack.c.bf16 %v2342_v54, %v2341_v41 }
 0x387   : > { %2436 = vmatmul.bf16.gmra.mxu2 %v2344_v17  ;;  %2476 = vmatmul.bf16.gmra.mxu3 %v2352_v38 }
 0x397   : > { %2441 = vmatmul.bf16.gmra.mxu2 %v2345_v19  ;;  %2481 = vmatmul.bf16.gmra.mxu3 %v2353_v63 }
 0x3a7   : > { %2446 = vmatmul.bf16.gmra.mxu2 %v2346_v43  ;;  %2486 = vmatmul.bf16.gmra.mxu3 %v2354_v10 }
 0x3b7   : > { %2451 = vmatmul.bf16.gmra.mxu2 %v2347_v14  ;;  %2491 = vmatmul.bf16.gmra.mxu3 %v2355_v61 }
 0x3c7   : > { %2456 = vmatmul.bf16.gmra.mxu2 %v2348_v18  ;;  %2496 = vmatmul.bf16.gmra.mxu3 %v2356_v40 }
 0x3d7   : > { %2461 = vmatmul.bf16.gmra.mxu2 %v2349_v5  ;;  %2501 = vmatmul.bf16.gmra.mxu3 %v2357_v49 }
 0x3e7   : > { %2466 = vmatmul.bf16.gmra.mxu2 %v2350_v60  ;;  %2506 = vmatmul.bf16.gmra.mxu3 %v2358_v52 }
 0x3fa   : > { %v2432_v48 = vpop.f32.mrf.mxu2  ;;  %v2472_v46 = vpop.f32.mrf.mxu3 }
 0x3fb   : > { %v2516_v27 = vmul.f32 %v5858_v44, %v2432_v48  ;;  %v2532_v11 = vmul.f32 %v5858_v44, %v2472_v46 }
 0x3fd   : > { %v2552_v45 = vadd.f32 %v5863_v50, %v2516_v27  ;;  %v2568_v33 = vadd.f32 %v5863_v50, %v2532_v11 }
 0x3ff   : > { %v2584_v3 = vsub.f32 0.0, %v2552_v45  ;;  %v2600_v47 = vsub.f32 0.0, %v2568_v33 }
 0x401   : > { %v2616_v57 = vmul.f32 1.442695, %v2584_v3  ;;  %v2648_v59 = vmul.f32 1.442695, %v2600_v47  ;;  %v3191_v3 = vunpack.c.h.bf16 %v3227_v23 }
 0x402   : > { %v2434_v2 = vpop.f32.mrf.mxu2  ;;  %v2474_v35 = vpop.f32.mrf.mxu3 }
 0x403   : > { %3575 = vpow2.f32 %v2616_v57  ;;  %v2517_v28 = vmul.f32 %v5858_v44, %v2434_v2  ;;  %v2533_v31 = vmul.f32 %v5858_v44, %v2474_v35 }
 0x404   : > { %3577 = vpow2.f32 %v2648_v59 }
 0x405   : > { %v5872_v62 = vadd.f32 %v5863_v50, %v2517_v28  ;;  %v5875_v37 = vadd.f32 %v5863_v50, %v2533_v31  ;;  %v3220_v31 = vld [vmem:[%s3990_s19 + $0x8] sm:$0xff]  }
 0x407   : > { %v2585_v24 = vsub.f32 0.0, %v5872_v62  ;;  %v2601_v36 = vsub.f32 0.0, %v5875_v37 }
 0x409   : > { %v3576_v7 = vpop.eup %3575  ;;  %v2618_v9 = vmul.f32 1.442695, %v2585_v24  ;;  %v2650_v21 = vmul.f32 1.442695, %v2601_v36 }
 0x40a   : > { %v3578_v17 = vpop.eup %3577  ;;  %v2680_v38 = vadd.f32 1.0, %v3576_v7  ;;  %v2437_v34 = vpop.f32.mrf.mxu2 }
 0x40b   : > { %v2477_v53 = vpop.f32.mrf.mxu3  ;;  %v2696_v15 = vadd.f32 1.0, %v3578_v17  ;;  %3579 = vpow2.f32 %v2618_v9  ;;  %v2518_v16 = vmul.f32 %v5858_v44, %v2437_v34  ;;  %v3162_v17 = vunpack.c.l.bf16 %v3220_v31 }
 0x40c   : > { %v2534_v1 = vmul.f32 %v5858_v44, %v2477_v53  ;;  %3581 = vrcp.f32 %v2680_v38 }
 0x40d   : > { %3583 = vrcp.f32 %v2696_v15  ;;  %v5882_v19 = vadd.f32 %v5863_v50, %v2518_v16 }
 0x40e   : > { %v5885_v63 = vadd.f32 %v5863_v50, %v2534_v1  ;;  %3585 = vpow2.f32 %v2650_v21 }
 0x40f   : > { %v2586_v30 = vsub.f32 0.0, %v5882_v19 }
 0x410   : > { %v2602_v6 = vsub.f32 0.0, %v5885_v63 }
 0x411   : > { %v3580_v29 = vpop.eup %3579  ;;  %v2620_v43 = vmul.f32 1.442695, %v2586_v30 }
 0x412   : > { %v2652_v10 = vmul.f32 1.442695, %v2602_v6  ;;  %v3582_v20 = vpop.eup %3581  ;;  %v2681_v13 = vadd.f32 1.0, %v3580_v29  ;;  %v2439_v39 = vpop.f32.mrf.mxu2 }
 0x413   : > { %v2479_v14 = vpop.f32.mrf.mxu3  ;;  %v3584_v61 = vpop.eup %3583  ;;  %v2744_v42 = vmul.f32 %v3582_v20, %v2552_v45  ;;  %3587 = vpow2.f32 %v2620_v43  ;;  %v2519_v8 = vmul.f32 %v5858_v44, %v2439_v39 }
 0x414   : > { %v2535_v55 = vmul.f32 %v5858_v44, %v2479_v14  ;;  %v3586_v51 = vpop.eup %3585  ;;  %v2760_v18 = vmul.f32 %v3584_v61, %v2568_v33  ;;  %3589 = vrcp.f32 %v2681_v13  ;;  %v3163_v14 = vunpack.c.h.bf16 %v3220_v31 }
 0x415   : > { %v2840_v40 = vadd.f32 %v3158_v56, %v2744_v42  ;;  %v2697_v22 = vadd.f32 1.0, %v3586_v51  ;;  %3591 = vpow2.f32 %v2652_v10  ;;  %v5895_v26 = vadd.f32 %v5863_v50, %v2519_v8 }
 0x416   : > { %v2856_v32 = vadd.f32 %v3190_v0, %v2760_v18  ;;  %v5898_v25 = vadd.f32 %v5863_v50, %v2535_v55 }
 0x417   : > { %2872 = vst.msk [vmem:[%s5900_s21] sm:$0xff] %vm617_vm0, %v2840_v40  ;;  %3593 = vrcp.f32 %v2697_v22  ;;  %v2587_v5 = vsub.f32 0.0, %v5895_v26 }
 0x418   : > { %2888 = vst.msk [vmem:[%s5900_s21 + $0x80] sm:$0xff] %vm617_vm0, %v2856_v32  ;;  %v2603_v49 = vsub.f32 0.0, %v5898_v25 }
 0x419   : > { %v3588_v58 = vpop.eup %3587  ;;  %v2622_v41 = vmul.f32 1.442695, %v2587_v5 }
 0x41a   : > { %v3590_v54 = vpop.eup %3589  ;;  %v2682_v60 = vadd.f32 1.0, %v3588_v58  ;;  %v2654_v52 = vmul.f32 1.442695, %v2603_v49  ;;  %v2442_v48 = vpop.f32.mrf.mxu2 }
 0x41b   : > { %v2482_v46 = vpop.f32.mrf.mxu3  ;;  %v3592_v27 = vpop.eup %3591  ;;  %v2745_v11 = vmul.f32 %v3590_v54, %v5872_v62  ;;  %3595 = vpow2.f32 %v2622_v41  ;;  %v2520_v45 = vmul.f32 %v5858_v44, %v2442_v48  ;;  %v3228_v62 = vld [vmem:[%s3990_s19 + $0x48] sm:$0xff]   ;;  %v3229_v48 = vld [vmem:[%s3990_s19 + $0x50] sm:$0xff]  }
 0x41c   : > { %v2536_v33 = vmul.f32 %v5858_v44, %v2482_v46  ;;  %3597 = vrcp.f32 %v2682_v60  ;;  %v2698_v47 = vadd.f32 1.0, %v3592_v27  ;;  %v3194_v53 = vunpack.c.l.bf16 %v3228_v62  ;;  %v3221_v60 = vld [vmem:[%s3990_s19 + $0x10] sm:$0xff]  }
 0x41d   : > { %v3594_v57 = vpop.eup %3593  ;;  %v2841_v59 = vadd.f32 %v3159_v12, %v2745_v11  ;;  %3599 = vpow2.f32 %v2654_v52  ;;  %v5912_v2 = vadd.f32 %v5863_v50, %v2520_v45  ;;  %v3195_v42 = vunpack.c.h.bf16 %v3228_v62 }
 0x41e   : > { %v5915_v35 = vadd.f32 %v5863_v50, %v2536_v33  ;;  %v2761_v28 = vmul.f32 %v3594_v57, %v5875_v37  ;;  %3601 = vrcp.f32 %v2698_v47 }
 0x41f   : > { %2873 = vst.msk [vmem:[%s5900_s21 + $0x8] sm:$0xff] %vm617_vm0, %v2841_v59  ;;  %v2588_v24 = vsub.f32 0.0, %v5912_v2 }
 0x420   : > { %v2604_v36 = vsub.f32 0.0, %v5915_v35  ;;  %v2857_v7 = vadd.f32 %v3191_v3, %v2761_v28  ;;  %v3198_v3 = vunpack.c.l.bf16 %v3229_v48 }
 0x421   : > { %v3596_v9 = vpop.eup %3595  ;;  %v2624_v38 = vmul.f32 1.442695, %v2588_v24 }
 0x422   : > { %v2656_v21 = vmul.f32 1.442695, %v2604_v36  ;;  %v3598_v34 = vpop.eup %3597  ;;  %2889 = vst.msk [vmem:[%s5900_s21 + $0x88] sm:$0xff] %vm617_vm0, %v2857_v7  ;;  %v2683_v15 = vadd.f32 1.0, %v3596_v9  ;;  %v2444_v37 = vpop.f32.mrf.mxu2 }
 0x423   : > { %v2484_v16 = vpop.f32.mrf.mxu3  ;;  %v3600_v1 = vpop.eup %3599  ;;  %v2746_v4 = vmul.f32 %v3598_v34, %v5882_v19  ;;  %3603 = vpow2.f32 %v2624_v38  ;;  %v2521_v23 = vmul.f32 %v5858_v44, %v2444_v37 }
 0x424   : > { %v2537_v30 = vmul.f32 %v5858_v44, %v2484_v16  ;;  %v3602_v6 = vpop.eup %3601  ;;  %3605 = vrcp.f32 %v2683_v15  ;;  %v2699_v29 = vadd.f32 1.0, %v3600_v1  ;;  %v3167_v16 = vunpack.c.h.bf16 %v3221_v60 }
 0x425   : > { %v2842_v56 = vadd.f32 %v3162_v17, %v2746_v4  ;;  %v2762_v43 = vmul.f32 %v3602_v6, %v5885_v63  ;;  %3607 = vpow2.f32 %v2656_v21  ;;  %v5931_v10 = vadd.f32 %v5863_v50, %v2521_v23 }
 0x426   : > { %3609 = vrcp.f32 %v2699_v29  ;;  %v5934_v20 = vadd.f32 %v5863_v50, %v2537_v30  ;;  %v3199_v4 = vunpack.c.h.bf16 %v3229_v48 }
 0x427   : > { %2874 = vst.msk [vmem:[%s5900_s21 + $0x10] sm:$0xff] %vm617_vm0, %v2842_v56  ;;  %v2858_v19 = vadd.f32 %v3194_v53, %v2762_v43  ;;  %v2589_v0 = vsub.f32 0.0, %v5931_v10 }
 0x428   : > { %v2605_v13 = vsub.f32 0.0, %v5934_v20 }
 0x429   : > { %v3604_v39 = vpop.eup %3603  ;;  %2890 = vst.msk [vmem:[%s5900_s21 + $0x90] sm:$0xff] %vm617_vm0, %v2858_v19  ;;  %v2626_v63 = vmul.f32 1.442695, %v2589_v0 }
 0x42a   : > { %v3606_v61 = vpop.eup %3605  ;;  %v2684_v8 = vadd.f32 1.0, %v3604_v39  ;;  %v2658_v55 = vmul.f32 1.442695, %v2605_v13  ;;  %v2447_v51 = vpop.f32.mrf.mxu2 }
 0x42b   : > { %v2487_v18 = vpop.f32.mrf.mxu3  ;;  %v3608_v40 = vpop.eup %3607  ;;  %v2747_v22 = vmul.f32 %v3606_v61, %v5895_v26  ;;  %3611 = vpow2.f32 %v2626_v63  ;;  %v2522_v32 = vmul.f32 %v5858_v44, %v2447_v51 }
 0x42c   : > { %v2538_v5 = vmul.f32 %v5858_v44, %v2487_v18  ;;  %v3610_v49 = vpop.eup %3609  ;;  %3613 = vrcp.f32 %v2684_v8  ;;  %v2700_v58 = vadd.f32 1.0, %v3608_v40 }
 0x42d   : > { %v2843_v12 = vadd.f32 %v3163_v14, %v2747_v22  ;;  %v2763_v41 = vmul.f32 %v3610_v49, %v5898_v25  ;;  %3615 = vpow2.f32 %v2658_v55  ;;  %v5947_v54 = vadd.f32 %v5863_v50, %v2522_v32  ;;  %v3230_v55 = vld [vmem:[%s3990_s19 + $0x58] sm:$0xff]  }
 0x42e   : > { %3617 = vrcp.f32 %v2700_v58  ;;  %v5951_v26 = vadd.f32 %v5863_v50, %v2538_v5  ;;  %v3166_v25 = vunpack.c.l.bf16 %v3221_v60  ;;  %v3202_v5 = vunpack.c.l.bf16 %v3230_v55 }
 0x42f   : > { %2875 = vst.msk [vmem:[%s5900_s21 + $0x18] sm:$0xff] %vm617_vm0, %v2843_v12  ;;  %v2859_v52 = vadd.f32 %v3195_v42, %v2763_v41  ;;  %v2590_v46 = vsub.f32 0.0, %v5947_v54  ;;  %v3222_v42 = vld [vmem:[%s3990_s19 + $0x18] sm:$0xff]  }
 0x430   : > { %v2606_v27 = vsub.f32 0.0, %v5951_v26 }
 0x431   : > { %v3612_v11 = vpop.eup %3611  ;;  %2891 = vst.msk [vmem:[%s5900_s21 + $0x98] sm:$0xff] %vm617_vm0, %v2859_v52  ;;  %v2628_v45 = vmul.f32 1.442695, %v2590_v46 }
 0x432   : > { %v3614_v33 = vpop.eup %3613  ;;  %v2685_v47 = vadd.f32 1.0, %v3612_v11  ;;  %v2660_v57 = vmul.f32 1.442695, %v2606_v27  ;;  %v2449_v59 = vpop.f32.mrf.mxu2 }
 0x433   : > { %v2489_v28 = vpop.f32.mrf.mxu3  ;;  %v3616_v31 = vpop.eup %3615  ;;  %v2748_v62 = vmul.f32 %v3614_v33, %v5912_v2  ;;  %3619 = vpow2.f32 %v2628_v45  ;;  %v2523_v24 = vmul.f32 %v5858_v44, %v2449_v59 }
 0x434   : > { %v2539_v36 = vmul.f32 %v5858_v44, %v2489_v28  ;;  %v3618_v7 = vpop.eup %3617  ;;  %3621 = vrcp.f32 %v2685_v47  ;;  %v2701_v9 = vadd.f32 1.0, %v3616_v31  ;;  %v3171_v28 = vunpack.c.h.bf16 %v3222_v42 }
 0x435   : > { %v2844_v17 = vadd.f32 %v3166_v25, %v2748_v62  ;;  %v2764_v38 = vmul.f32 %v3618_v7, %v5915_v35  ;;  %3623 = vpow2.f32 %v2660_v57  ;;  %v5965_v21 = vadd.f32 %v5863_v50, %v2523_v24 }
 0x436   : > { %3625 = vrcp.f32 %v2701_v9  ;;  %v5968_v34 = vadd.f32 %v5863_v50, %v2539_v36  ;;  %v3203_v62 = vunpack.c.h.bf16 %v3230_v55 }
 0x437   : > { %2876 = vst.msk [vmem:[%s5900_s21 + $0x20] sm:$0xff] %vm617_vm0, %v2844_v17  ;;  %v2860_v2 = vadd.f32 %v3198_v3, %v2764_v38  ;;  %v2591_v53 = vsub.f32 0.0, %v5965_v21 }
 0x438   : > { %v2607_v15 = vsub.f32 0.0, %v5968_v34 }
 0x439   : > { %v3620_v37 = vpop.eup %3619  ;;  %2892 = vst.msk [vmem:[%s5900_s21 + $0xa0] sm:$0xff] %vm617_vm0, %v2860_v2  ;;  %v2630_v35 = vmul.f32 1.442695, %v2591_v53 }
 0x43a   : > { %v3622_v1 = vpop.eup %3621  ;;  %v2686_v23 = vadd.f32 1.0, %v3620_v37  ;;  %v2662_v30 = vmul.f32 1.442695, %v2607_v15  ;;  %v2452_v6 = vpop.f32.mrf.mxu2 }
 0x43b   : > { %v2492_v29 = vpop.f32.mrf.mxu3  ;;  %v3624_v56 = vpop.eup %3623  ;;  %v2749_v43 = vmul.f32 %v3622_v1, %v5931_v10  ;;  %3627 = vpow2.f32 %v2630_v35  ;;  %v2524_v19 = vmul.f32 %v5858_v44, %v2452_v6 }
 0x43c   : > { %v2540_v0 = vmul.f32 %v5858_v44, %v2492_v29  ;;  %v3626_v13 = vpop.eup %3625  ;;  %3629 = vrcp.f32 %v2686_v23  ;;  %v2702_v39 = vadd.f32 1.0, %v3624_v56 }
 0x43d   : > { %v2845_v14 = vadd.f32 %v3167_v16, %v2749_v43  ;;  %v2765_v63 = vmul.f32 %v3626_v13, %v5934_v20  ;;  %3631 = vpow2.f32 %v2662_v30  ;;  %v5981_v61 = vadd.f32 %v5863_v50, %v2524_v19  ;;  %v3231_v30 = vld [vmem:[%s3990_s19 + $0x60] sm:$0xff]  }
 0x43e   : > { %3633 = vrcp.f32 %v2702_v39  ;;  %v5985_v10 = vadd.f32 %v5863_v50, %v2540_v0  ;;  %v3170_v20 = vunpack.c.l.bf16 %v3222_v42  ;;  %v3206_v0 = vunpack.c.l.bf16 %v3231_v30 }
 0x43f   : > { %2877 = vst.msk [vmem:[%s5900_s21 + $0x28] sm:$0xff] %vm617_vm0, %v2845_v14  ;;  %v2861_v8 = vadd.f32 %v3199_v4, %v2765_v63  ;;  %v2592_v51 = vsub.f32 0.0, %v5981_v61  ;;  %v3223_v4 = vld [vmem:[%s3990_s19 + $0x20] sm:$0xff]  }
 0x440   : > { %v2608_v18 = vsub.f32 0.0, %v5985_v10 }
 0x441   : > { %v3628_v40 = vpop.eup %3627  ;;  %2893 = vst.msk [vmem:[%s5900_s21 + $0xa8] sm:$0xff] %vm617_vm0, %v2861_v8  ;;  %v2632_v22 = vmul.f32 1.442695, %v2592_v51 }
 0x442   : > { %v3630_v32 = vpop.eup %3629  ;;  %v2687_v49 = vadd.f32 1.0, %v3628_v40  ;;  %v2664_v58 = vmul.f32 1.442695, %v2608_v18  ;;  %v2454_v12 = vpop.f32.mrf.mxu2 }
 0x443   : > { %v2494_v41 = vpop.f32.mrf.mxu3  ;;  %v3632_v60 = vpop.eup %3631  ;;  %v2750_v52 = vmul.f32 %v3630_v32, %v5947_v54  ;;  %3635 = vpow2.f32 %v2632_v22  ;;  %v2525_v48 = vmul.f32 %v5858_v44, %v2454_v12 }
 0x444   : > { %v2541_v46 = vmul.f32 %v5858_v44, %v2494_v41  ;;  %v3634_v27 = vpop.eup %3633  ;;  %3637 = vrcp.f32 %v2687_v49  ;;  %v2703_v11 = vadd.f32 1.0, %v3632_v60  ;;  %v3175_v41 = vunpack.c.h.bf16 %v3223_v4 }
 0x445   : > { %v2846_v25 = vadd.f32 %v3170_v20, %v2750_v52  ;;  %v2766_v45 = vmul.f32 %v3634_v27, %v5951_v26  ;;  %3639 = vpow2.f32 %v2664_v58  ;;  %v5999_v33 = vadd.f32 %v5863_v50, %v2525_v48 }
 0x446   : > { %3641 = vrcp.f32 %v2703_v11  ;;  %v6002_v3 = vadd.f32 %v5863_v50, %v2541_v46  ;;  %v3207_v52 = vunpack.c.h.bf16 %v3231_v30 }
 0x447   : > { %2878 = vst.msk [vmem:[%s5900_s21 + $0x30] sm:$0xff] %vm617_vm0, %v2846_v25  ;;  %v2862_v54 = vadd.f32 %v3202_v5, %v2766_v45  ;;  %v2593_v47 = vsub.f32 0.0, %v5999_v33 }
 0x448   : > { %v2609_v57 = vsub.f32 0.0, %v6002_v3 }
 0x449   : > { %v3636_v59 = vpop.eup %3635  ;;  %2894 = vst.msk [vmem:[%s5900_s21 + $0xb0] sm:$0xff] %vm617_vm0, %v2862_v54  ;;  %v2634_v26 = vmul.f32 1.442695, %v2593_v47 }
 0x44a   : > { %v3638_v31 = vpop.eup %3637  ;;  %v2688_v24 = vadd.f32 1.0, %v3636_v59  ;;  %v2666_v36 = vmul.f32 1.442695, %v2609_v57  ;;  %v2457_v7 = vpop.f32.mrf.mxu2 }
 0x44b   : > { %v2497_v9 = vpop.f32.mrf.mxu3  ;;  %v3640_v17 = vpop.eup %3639  ;;  %v2751_v38 = vmul.f32 %v3638_v31, %v5965_v21  ;;  %3643 = vpow2.f32 %v2634_v26  ;;  %v2526_v2 = vmul.f32 %v5858_v44, %v2457_v7 }
 0x44c   : > { %v2542_v53 = vmul.f32 %v5858_v44, %v2497_v9  ;;  %v3642_v15 = vpop.eup %3641  ;;  %3645 = vrcp.f32 %v2688_v24  ;;  %v2704_v37 = vadd.f32 1.0, %v3640_v17 }
 0x44d   : > { %v2847_v16 = vadd.f32 %v3171_v28, %v2751_v38  ;;  %v2767_v35 = vmul.f32 %v3642_v15, %v5968_v34  ;;  %3647 = vpow2.f32 %v2666_v36  ;;  %v6015_v1 = vadd.f32 %v5863_v50, %v2526_v2  ;;  %v3232_v36 = vld [vmem:[%s3990_s19 + $0x68] sm:$0xff]  }
 0x44e   : > { %3649 = vrcp.f32 %v2704_v37  ;;  %v6019_v21 = vadd.f32 %v5863_v50, %v2542_v53  ;;  %v3174_v34 = vunpack.c.l.bf16 %v3223_v4  ;;  %v3210_v53 = vunpack.c.l.bf16 %v3232_v36 }
 0x44f   : > { %2879 = vst.msk [vmem:[%s5900_s21 + $0x38] sm:$0xff] %vm617_vm0, %v2847_v16  ;;  %v2863_v23 = vadd.f32 %v3203_v62, %v2767_v35  ;;  %v2594_v6 = vsub.f32 0.0, %v6015_v1  ;;  %v3224_v62 = vld [vmem:[%s3990_s19 + $0x28] sm:$0xff]  }
 0x450   : > { %v2610_v29 = vsub.f32 0.0, %v6019_v21 }
 0x451   : > { %v3644_v56 = vpop.eup %3643  ;;  %2895 = vst.msk [vmem:[%s5900_s21 + $0xb8] sm:$0xff] %vm617_vm0, %v2863_v23  ;;  %v2636_v43 = vmul.f32 1.442695, %v2594_v6 }
 0x452   : > { %v3646_v19 = vpop.eup %3645  ;;  %v2689_v13 = vadd.f32 1.0, %v3644_v56  ;;  %v2668_v39 = vmul.f32 1.442695, %v2610_v29  ;;  %v2459_v14 = vpop.f32.mrf.mxu2 }
 0x453   : > { %v2499_v63 = vpop.f32.mrf.mxu3  ;;  %v3648_v42 = vpop.eup %3647  ;;  %v2752_v8 = vmul.f32 %v3646_v19, %v5981_v61  ;;  %3651 = vpow2.f32 %v2636_v43  ;;  %v2527_v55 = vmul.f32 %v5858_v44, %v2459_v14 }
 0x454   : > { %v2543_v51 = vmul.f32 %v5858_v44, %v2499_v63  ;;  %v3650_v18 = vpop.eup %3649  ;;  %3653 = vrcp.f32 %v2689_v13  ;;  %v2705_v40 = vadd.f32 1.0, %v3648_v42  ;;  %v3179_v63 = vunpack.c.h.bf16 %v3224_v62 }
 0x455   : > { %v2848_v20 = vadd.f32 %v3174_v34, %v2752_v8  ;;  %v2768_v22 = vmul.f32 %v3650_v18, %v5985_v10  ;;  %3655 = vpow2.f32 %v2668_v39  ;;  %v6033_v32 = vadd.f32 %v5863_v50, %v2527_v55 }
 0x456   : > { %3657 = vrcp.f32 %v2705_v40  ;;  %v6036_v5 = vadd.f32 %v5863_v50, %v2543_v51  ;;  %v3211_v8 = vunpack.c.h.bf16 %v3232_v36 }
 0x457   : > { %2880 = vst.msk [vmem:[%s5900_s21 + $0x40] sm:$0xff] %vm617_vm0, %v2848_v20  ;;  %v2864_v61 = vadd.f32 %v3206_v0, %v2768_v22  ;;  %v2595_v49 = vsub.f32 0.0, %v6033_v32 }
 0x458   : > { %v2611_v58 = vsub.f32 0.0, %v6036_v5 }
 0x459   : > { %v3652_v12 = vpop.eup %3651  ;;  %2896 = vst.msk [vmem:[%s5900_s21 + $0xc0] sm:$0xff] %vm617_vm0, %v2864_v61  ;;  %v2638_v10 = vmul.f32 1.442695, %v2595_v49 }
 0x45a   : > { %v3654_v60 = vpop.eup %3653  ;;  %v2690_v48 = vadd.f32 1.0, %v3652_v12  ;;  %v2670_v46 = vmul.f32 1.442695, %v2611_v58  ;;  %v2462_v27 = vpop.f32.mrf.mxu2 }
 0x45b   : > { %v2502_v11 = vpop.f32.mrf.mxu3  ;;  %v3656_v25 = vpop.eup %3655  ;;  %v2753_v45 = vmul.f32 %v3654_v60, %v5999_v33  ;;  %3659 = vpow2.f32 %v2638_v10  ;;  %v2528_v54 = vmul.f32 %v5858_v44, %v2462_v27 }
 0x45c   : > { %v2544_v47 = vmul.f32 %v5858_v44, %v2502_v11  ;;  %v3658_v57 = vpop.eup %3657  ;;  %3661 = vrcp.f32 %v2690_v48  ;;  %v2706_v59 = vadd.f32 1.0, %v3656_v25 }
 0x45d   : > { %v2849_v28 = vadd.f32 %v3175_v41, %v2753_v45  ;;  %v2769_v26 = vmul.f32 %v3658_v57, %v6002_v3  ;;  %3663 = vpow2.f32 %v2670_v46  ;;  %v6049_v31 = vadd.f32 %v5863_v50, %v2528_v54  ;;  %v3233_v46 = vld [vmem:[%s3990_s19 + $0x70] sm:$0xff]  }
 0x45e   : > { %3665 = vrcp.f32 %v2706_v59  ;;  %v6053_v33 = vadd.f32 %v5863_v50, %v2544_v47  ;;  %v3178_v3 = vunpack.c.l.bf16 %v3224_v62  ;;  %v3214_v47 = vunpack.c.l.bf16 %v3233_v46 }
 0x45f   : > { %2881 = vst.msk [vmem:[%s5900_s21 + $0x48] sm:$0xff] %vm617_vm0, %v2849_v28  ;;  %v2865_v24 = vadd.f32 %v3207_v52, %v2769_v26  ;;  %v2596_v7 = vsub.f32 0.0, %v6049_v31  ;;  %v3225_v52 = vld [vmem:[%s3990_s19 + $0x30] sm:$0xff]  }
 0x460   : > { %v2612_v9 = vsub.f32 0.0, %v6053_v33 }
 0x461   : > { %v3660_v17 = vpop.eup %3659  ;;  %2897 = vst.msk [vmem:[%s5900_s21 + $0xc8] sm:$0xff] %vm617_vm0, %v2865_v24  ;;  %v2640_v38 = vmul.f32 1.442695, %v2596_v7 }
 0x462   : > { %v3662_v2 = vpop.eup %3661  ;;  %v2691_v15 = vadd.f32 1.0, %v3660_v17  ;;  %v2672_v37 = vmul.f32 1.442695, %v2612_v9  ;;  %v2464_v16 = vpop.f32.mrf.mxu2 }
 0x463   : > { %v2504_v35 = vpop.f32.mrf.mxu3  ;;  %v3664_v4 = vpop.eup %3663  ;;  %v2754_v23 = vmul.f32 %v3662_v2, %v6015_v1  ;;  %3667 = vpow2.f32 %v2640_v38  ;;  %v2529_v30 = vmul.f32 %v5858_v44, %v2464_v16 }
 0x464   : > { %v2545_v6 = vmul.f32 %v5858_v44, %v2504_v35  ;;  %v3666_v29 = vpop.eup %3665  ;;  %3669 = vrcp.f32 %v2691_v15  ;;  %v2707_v56 = vadd.f32 1.0, %v3664_v4 }
 0x465   : > { %v2850_v34 = vadd.f32 %v3178_v3, %v2754_v23  ;;  %v2770_v43 = vmul.f32 %v3666_v29, %v6019_v21  ;;  %3671 = vpow2.f32 %v2672_v37  ;;  %v6067_v19 = vadd.f32 %v5863_v50, %v2529_v30 }
 0x466   : > { %3673 = vrcp.f32 %v2707_v56  ;;  %v6070_v0 = vadd.f32 %v5863_v50, %v2545_v6  ;;  %v3215_v6 = vunpack.c.h.bf16 %v3233_v46 }
 0x467   : > { %2882 = vst.msk [vmem:[%s5900_s21 + $0x50] sm:$0xff] %vm617_vm0, %v2850_v34  ;;  %v2866_v1 = vadd.f32 %v3210_v53, %v2770_v43  ;;  %v2597_v13 = vsub.f32 0.0, %v6067_v19 }
 0x468   : > { %v2613_v39 = vsub.f32 0.0, %v6070_v0 }
 0x469   : > { %v3668_v14 = vpop.eup %3667  ;;  %2898 = vst.msk [vmem:[%s5900_s21 + $0xd0] sm:$0xff] %vm617_vm0, %v2866_v1  ;;  %v2642_v21 = vmul.f32 1.442695, %v2597_v13  ;;  %v3226_v1 = vld [vmem:[%s3990_s19 + $0x38] sm:$0xff]  }
 0x46a   : > { %v3670_v42 = vpop.eup %3669  ;;  %v2692_v55 = vadd.f32 1.0, %v3668_v14  ;;  %v2674_v51 = vmul.f32 1.442695, %v2613_v39  ;;  %v2467_v18 = vpop.f32.mrf.mxu2  ;;  %v3234_v39 = vld [vmem:[%s3990_s19 + $0x78] sm:$0xff]   ;;  %s3155_s19 = sshll.u32 %s6315_s25, 8 }
 0x46b   : > { %v2507_v40 = vpop.f32.mrf.mxu3  ;;  %v3672_v20 = vpop.eup %3671  ;;  %v2755_v22 = vmul.f32 %v3670_v42, %v6033_v32  ;;  %3675 = vpow2.f32 %v2642_v21  ;;  %v2530_v61 = vmul.f32 %v5858_v44, %v2467_v18  ;;  %s2916_s15 = scalar_lea.hbm %s6316_s29, %s3155_s19 }
 0x46c   : > { %v2546_v49 = vmul.f32 %v5858_v44, %v2507_v40  ;;  %v3674_v58 = vpop.eup %3673  ;;  %3677 = vrcp.f32 %v2692_v55  ;;  %v2708_v12 = vadd.f32 1.0, %v3672_v20  ;;  %s2919_s23 = sshll.u32 %s2916_s15, 4  ;;  %s2920_s23 = int_to_ptr.hbm [resolvable:$true] %s2919_s23 }
 0x46d   : > { %v2851_v41 = vadd.f32 %v3179_v63, %v2755_v22  ;;  %v2771_v10 = vmul.f32 %v3674_v58, %v6036_v5  ;;  %3679 = vpow2.f32 %v2674_v51  ;;  %v6083_v60 = vadd.f32 %v5863_v50, %v2530_v61  ;;  %s3766_s20 = sshra.s32 %s2920_s23, 4  ;;  %s3767_s20 = int_to_ptr.hbm [resolvable:$true] %s3766_s20 }
 0x46e   : > { %3681 = vrcp.f32 %v2708_v12  ;;  %v6087_v32 = vadd.f32 %v5863_v50, %v2546_v49  ;;  %v3182_v5 = vunpack.c.l.bf16 %v3225_v52  ;;  %v3187_v22 = vunpack.c.h.bf16 %v3226_v1  ;;  %s3768_s27 = scalar_lea.hbm %s3767_s20, 256  ;;  %p3773_p0 = scmp.lt.s32.totalorder %s3767_s20, %s6317_s17 }
 0x46f   : > { %2883 = vst.msk [vmem:[%s5900_s21 + $0x58] sm:$0xff] %vm617_vm0, %v2851_v41  ;;  %v2867_v48 = vadd.f32 %v3211_v8, %v2771_v10  ;;  %v2598_v27 = vsub.f32 0.0, %v6083_v60  ;;  %v3219_v58 = vunpack.c.h.bf16 %v3234_v39  ;;  %p3769_p6 = scmp.ne.s32.totalorder %s3767_s20, %s3768_s27  ;;  %p3774_p1 = scmp.lt.s32.totalorder %s3772_s26, %s3768_s27 }
 0x470   : > { %v2614_v11 = vsub.f32 0.0, %v6087_v32 }
 0x471   : > { %v3676_v25 = vpop.eup %3675  ;;  %2899 = vst.msk [vmem:[%s5900_s21 + $0xd8] sm:$0xff] %vm617_vm0, %v2867_v48  ;;  %v2644_v45 = vmul.f32 1.442695, %v2598_v27  ;;  %p3770_p9 = pnand %p3769_p6, %p3950_p11  ;;  %p3775_p3 = por %p3774_p1, %p3773_p0 }
 0x472   : > { %v3678_v54 = vpop.eup %3677  ;;  %v2693_v57 = vadd.f32 1.0, %v3676_v25  ;;  %v2676_v59 = vmul.f32 1.442695, %v2614_v11  ;;  %v2469_v28 = vpop.f32.mrf.mxu2 }
 0x473   : > { %v2509_v26 = vpop.f32.mrf.mxu3  ;;  %v3680_v62 = vpop.eup %3679  ;;  %v2756_v24 = vmul.f32 %v3678_v54, %v6049_v31  ;;  %3683 = vpow2.f32 %v2644_v45  ;;  %v2531_v36 = vmul.f32 %v5858_v44, %v2469_v28  ;;  %p3771_p13 = pneg %p3770_p9 }
 0x474   : > { %v2547_v7 = vmul.f32 %v5858_v44, %v2509_v26  ;;  %v3682_v9 = vpop.eup %3681  ;;  %3685 = vrcp.f32 %v2693_v57  ;;  %v2709_v17 = vadd.f32 1.0, %v3680_v62  ;;  %v3183_v44 = vunpack.c.h.bf16 %v3225_v52 }
 0x475   : > { %v2852_v3 = vadd.f32 %v3182_v5, %v2756_v24  ;;  %v2772_v38 = vmul.f32 %v3682_v9, %v6053_v33  ;;  %3687 = vpow2.f32 %v2676_v59  ;;  %v2567_v2 = vadd.f32 %v5863_v50, %v2531_v36  ;;  %p3776_p4 = pnand %p3775_p3, %p3771_p13 }
 0x476   : > { %3689 = vrcp.f32 %v2709_v17  ;;  %v2583_v53 = vadd.f32 %v5863_v50, %v2547_v7 }
 0x477   : > { %2884 = vst.msk [vmem:[%s5900_s21 + $0x60] sm:$0xff] %vm617_vm0, %v2852_v3  ;;  %v2868_v31 = vadd.f32 %v3214_v47, %v2772_v38  ;;  %v2599_v15 = vsub.f32 0.0, %v2567_v2 }
 0x478   : > { %v2615_v37 = vsub.f32 0.0, %v2583_v53 }
 0x479   : > { %v3684_v16 = vpop.eup %3683  ;;  %2900 = vst.msk [vmem:[%s5900_s21 + $0xe0] sm:$0xff] %vm617_vm0, %v2868_v31  ;;  %v2646_v35 = vmul.f32 1.442695, %v2599_v15 }
 0x47a   : > { %v3686_v4 = vpop.eup %3685  ;;  %v2694_v33 = vadd.f32 1.0, %v3684_v16  ;;  %v2678_v23 = vmul.f32 1.442695, %v2615_v37 }
 0x47b   : > { %v3688_v30 = vpop.eup %3687  ;;  %v2757_v50 = vmul.f32 %v3686_v4, %v6067_v19  ;;  %3691 = vpow2.f32 %v2646_v35  ;;  %v3186_v19 = vunpack.c.l.bf16 %v3226_v1 }
 0x47c   : > { %v3690_v29 = vpop.eup %3689  ;;  %3693 = vrcp.f32 %v2694_v33  ;;  %v2710_v56 = vadd.f32 1.0, %v3688_v30 }
 0x47d   : > { %v2853_v34 = vadd.f32 %v3183_v44, %v2757_v50  ;;  %v2773_v43 = vmul.f32 %v3690_v29, %v6070_v0  ;;  %3695 = vpow2.f32 %v2678_v23  ;;  %v3218_v0 = vunpack.c.l.bf16 %v3234_v39 }
 0x47e   : > { %3697 = vrcp.f32 %v2710_v56 }
 0x47f   : > { %2885 = vst.msk [vmem:[%s5900_s21 + $0x68] sm:$0xff] %vm617_vm0, %v2853_v34  ;;  %v2869_v13 = vadd.f32 %v3215_v6, %v2773_v43 }
 0x481   : > { %v3692_v14 = vpop.eup %3691  ;;  %2901 = vst.msk [vmem:[%s5900_s21 + $0xe8] sm:$0xff] %vm617_vm0, %v2869_v13 }
 0x482   : > { %v3694_v63 = vpop.eup %3693  ;;  %v2695_v21 = vadd.f32 1.0, %v3692_v14 }
 0x483   : > { %v3696_v42 = vpop.eup %3695  ;;  %v2758_v8 = vmul.f32 %v3694_v63, %v6083_v60 }
 0x484   : > { %v3698_v55 = vpop.eup %3697  ;;  %3699 = vrcp.f32 %v2695_v21  ;;  %v2711_v51 = vadd.f32 1.0, %v3696_v42 }
 0x485   : > { %v2854_v18 = vadd.f32 %v3186_v19, %v2758_v8  ;;  %v2774_v40 = vmul.f32 %v3698_v55, %v6087_v32 }
 0x486   : > { %3701 = vrcp.f32 %v2711_v51 }
 0x487   : > { %2886 = vst.msk [vmem:[%s5900_s21 + $0x70] sm:$0xff] %vm617_vm0, %v2854_v18  ;;  %v2870_v20 = vadd.f32 %v3218_v0, %v2774_v40 }
 0x489   : > { %2902 = vst.msk [vmem:[%s5900_s21 + $0xf0] sm:$0xff] %vm617_vm0, %v2870_v20 }
 0x48a   : > { %v3700_v61 = vpop.eup %3699 }
 0x48b   : > { %v2759_v49 = vmul.f32 %v3700_v61, %v2567_v2 }
 0x48c   : > { %v3702_v12 = vpop.eup %3701 }
 0x48d   : > { %v2855_v41 = vadd.f32 %v3187_v22, %v2759_v49  ;;  %v2775_v10 = vmul.f32 %v3702_v12, %v2583_v53 }
 0x48f   : > { %2887 = vst.msk [vmem:[%s5900_s21 + $0x78] sm:$0xff] %vm617_vm0, %v2855_v41  ;;  %v2871_v60 = vadd.f32 %v3219_v58, %v2775_v10 }
 0x491   : > { %2903 = vst.msk [vmem:[%s5900_s21 + $0xf8] sm:$0xff] %vm617_vm0, %v2871_v60 }
 0x492   : > { %3779 = shalt.err (!%p3776_p4)
}
 0x493   : > { %s3823_s18 = smov 128   ;;  %s3824_s21 = smov 8  }
 0x494   : > { %3247 = dma.vmem_to_hbm [thread:$0]  (%p3950_p11), %s2918_s22, 4096, %s2920_s23, %s2905_s28, %s3823_s18, %s3823_s18, %s3824_s21  }
 0x495 PF: > { %s6319_s15 = sld [smem:[#allocation9_spill]]  ;;  %p6321_p7 = scmp.ge.s32.totalorder %s3818_s16, 2 }
 0x497   : > { %p3254_p5 = pnand %p6321_p7, %p3954_p12 }
 0x499   : > { %p3255_p8 = pneg %p3254_p5 }
 0x49b   : > { %s2934_s1 = sand.u32 1, %s6319_s15  }
 0x49c   : > { %s2935_s25 = scalar_lea.sflag [#allocation5], %s2934_s1 }
 0x49d   : > { %3801 = dma.done.wait (%p3255_p8), %s2935_s25, 4096  }
 0x49e   : > { %3803 = vsyncadd (%p3255_p8), %s2935_s25, 4294963200  ;;  %s6322_s16 = sld [smem:[#allocation12_spill]]  ;;  %s6325_s29 = smov %s3810_s30 }
 0x49f   : > { %s6323_s20 = sld [smem:[#allocation10_spill]] }
 0x4a0   : > { %s6324_s15 = sld [smem:[#allocation13_spill]] }
 0x4a4   : > { %p27_p10 = scmp.ge.s32.totalorder %s6322_s16, 4  }
 0x4a5   : > { %s6326_s30 = smov %s6323_s20 }
 0x4a6   :  { %29 = sbr.rel (!%p27_p10) target bundleno = 9 (0x9), region = 123 }
 0x4ab   :  { %2941 = vsyncpa [#allocation4], 1 }
 0x4ac   :  { %2943 = vsyncpa [#allocation4 + $0x1], 1 }
 0x4ad   :  { %2944 = vsyncpa [#allocation5], 1 }
 0x4ae   :  { %2946 = vsyncpa [#allocation5 + $0x1], 1 }

</bundles_post_ra>
